<compile_context>
chip_gen: v7x
topology: tpu7x:2x2x1
jax: 0.10.0
libtpu: 0.0.40
codegen_flags: <defaults>
</compile_context>

<pallas_src>
import jax
import jax.numpy as jnp
from jax.experimental import pallas as pl
from jax.experimental.pallas import tpu as pltpu

# model constants (from CNNModel / ResCNN1DLayer definitions)
L = 21          # sequence length (the "in_channel=21" arg is really the length)
C = 128         # conv / fc hidden width
K = 5           # conv kernel size
PAD = K // 2    # = 2 (padding=2 -> "same")
BN_EPS = 1e-5


# ----------------------------- kernel ----------------------------------------

def cnn_kernel(x_ref, w1_ref, b1_ref, w2_ref, b2_ref, w3_ref, b3_ref,
               wfc1_ref, bfc1_ref, fc2w_ref, fc2b_ref, out_ref, hbuf):
    tb = x_ref.shape[1]
    n = L * tb                                   # rows of real (position, batch) pairs

    # Zero the 2-position borders of the activation scratch once per step; conv
    # taps that fall outside [0, L) read these rows (== Conv1d zero padding).
    zb = jnp.zeros((PAD * tb, C), jnp.bfloat16)
    hbuf[pl.ds(0, PAD * tb), :] = zb
    hbuf[pl.ds((L + PAD) * tb, PAD * tb), :] = zb

    # ---- layer 1: Conv1d(1->128, k=5) + BN + ReLU (taps pre-packed in 8 lanes) ----
    x2d = x_ref[...].reshape(n, 8)                               # bf16, row = pos*tb + b
    y1 = jnp.dot(x2d, w1_ref[...], preferred_element_type=jnp.float32)
    h = jnp.maximum(y1 + b1_ref[...], 0.0)                       # (n, C) f32, no residual

    # ---- layers 2/3: 5-tap conv as 5 accumulated MXU matmuls whose LHS are
    #      static slices of the zero-bordered scratch (no shifted copies). ----
    def conv_bn_relu_res(h_f32, w_ref, b_ref):
        hbuf[pl.ds(PAD * tb, n), :] = h_f32.astype(jnp.bfloat16)
        y = jnp.dot(hbuf[pl.ds(0, n), :], w_ref[0],
                    preferred_element_type=jnp.float32)
        for k in range(1, K):
            y = y + jnp.dot(hbuf[pl.ds(k * tb, n), :], w_ref[k],
                            preferred_element_type=jnp.float32)
        return h_f32 + jnp.maximum(y + b_ref[...], 0.0)          # residual: 128 == 128

    h = conv_bn_relu_res(h, w2_ref, b2_ref)
    h = conv_bn_relu_res(h, w3_ref, b3_ref)

    # ---- final_layer[0]: ResFCLayer(2688, 128) == Linear -> BN -> ReLU (eval) ----
    # Position reduction happens inside the MXU f32 accumulator (21 real
    # positions only; no padded-position matmuls, no (LP,tb,C) intermediate).
    # TODO(synk): ResFCLayer source was not provided; assumed the FC analogue of
    # ResCNN1DLayer (no residual since 2688 != 128; Dropout is identity in eval).
    hbuf[pl.ds(PAD * tb, n), :] = h.astype(jnp.bfloat16)
    z = jnp.dot(hbuf[pl.ds(PAD * tb, tb), :], wfc1_ref[0],
                preferred_element_type=jnp.float32)
    for l in range(1, L):
        z = z + jnp.dot(hbuf[pl.ds((PAD + l) * tb, tb), :], wfc1_ref[l],
                        preferred_element_type=jnp.float32)
    z = jnp.maximum(z + bfc1_ref[...], 0.0)                      # (tb, C)

    # ---- final_layer[1]: Linear(128, 1) + exact sigmoid, minimal writeback ----
    logit = jnp.sum(z * fc2w_ref[...], axis=1, keepdims=True) + fc2b_ref[0]
    out_ref[...] = 1.0 / (1.0 + jnp.exp(-logit))                 # (tb, 1) f32


# ----------------------------- parameters ------------------------------------

def init_params(key):
    ks = jax.random.split(key, 16)

    def conv_w(k, cout, cin):
        std = (2.0 / (cin * K)) ** 0.5
        return std * jax.random.normal(k, (cout, cin, K), jnp.float32)

    def bn(k, nfeat):
        k1, k2, k3, k4 = jax.random.split(k, 4)
        return dict(gamma=1.0 + 0.1 * jax.random.normal(k1, (nfeat,), jnp.float32),
                    beta=0.1 * jax.random.normal(k2, (nfeat,), jnp.float32),
                    mean=0.1 * jax.random.normal(k3, (nfeat,), jnp.float32),
                    var=jax.random.uniform(k4, (nfeat,), jnp.float32, 0.8, 1.2))

    p = {
        "conv1_w": conv_w(ks[0], C, 1),
        "conv1_b": 0.02 * jax.random.normal(ks[1], (C,), jnp.float32),
        "conv2_w": conv_w(ks[2], C, C),
        "conv2_b": 0.02 * jax.random.normal(ks[3], (C,), jnp.float32),
        "conv3_w": conv_w(ks[4], C, C),
        "conv3_b": 0.02 * jax.random.normal(ks[5], (C,), jnp.float32),
        "bn1": bn(ks[6], C), "bn2": bn(ks[7], C), "bn3": bn(ks[8], C),
        "fc1_w": ((2.0 / (C * L)) ** 0.5)
                 * jax.random.normal(ks[9], (C, C * L), jnp.float32),
        "fc1_b": 0.02 * jax.random.normal(ks[10], (C,), jnp.float32),
        "bn_fc": bn(ks[11], C),
        "fc2_w": ((1.0 / C) ** 0.5) * jax.random.normal(ks[12], (1, C), jnp.float32),
        "fc2_b": 0.02 * jax.random.normal(ks[13], (1,), jnp.float32),
    }
    return p


def bn_scale_shift(b):
    scale = b["gamma"] / jnp.sqrt(b["var"] + BN_EPS)
    shift = b["beta"] - b["mean"] * scale
    return scale.reshape(1, -1), shift.reshape(1, -1)


# ----------------------------- wrapper ----------------------------------------

def cnn_forward(x, p, max_tile_b=128):
    """max_tile_b: batch tile (multiple of 16). 128 is a good default everywhere;
    on v7x keep it <= 256 and prefer batches that give >= 2 tiles so the
    'parallel' grid axis shards across both TensorCores."""
    B = x.shape[0]
    tile_b = min(max_tile_b, ((B + 15) // 16) * 16)   # small B -> single grid step
    Bp = ((B + tile_b - 1) // tile_b) * tile_b
    ntiles = Bp // tile_b

    # input: pack the 5 conv taps of the scalar signal into 8 bf16 lanes, laid
    # out (position, batch, tap) so layer-1 conv is a single matmul in-kernel.
    xp = jnp.pad(x.astype(jnp.float32), ((0, Bp - B), (PAD, PAD)))       # (Bp, L+4)
    taps = jnp.stack([xp[:, k:k + L] for k in range(K)], axis=-1)        # (Bp, L, K)
    x_taps = jnp.pad(jnp.transpose(taps, (1, 0, 2)),
                     ((0, 0), (0, 0), (0, 8 - K))).astype(jnp.bfloat16)  # (L, Bp, 8)

    def fold_conv(w, b, bnp):
        # (Cout, Cin, K) conv weight -> (K, Cin, Cout) with conv bias + eval-BN folded.
        s, t = bn_scale_shift(bnp)
        wk = jnp.transpose(w, (2, 1, 0)) * s[None]
        bias = b.reshape(1, -1) * s + t
        return wk.astype(jnp.bfloat16), bias.astype(jnp.float32)

    w1, b1 = fold_conv(p["conv1_w"], p["conv1_b"], p["bn1"])             # (K,1,C)
    w1 = jnp.pad(w1.reshape(K, C), ((0, 8 - K), (0, 0)))                 # (8, C)
    w2, b2 = fold_conv(p["conv2_w"], p["conv2_b"], p["bn2"])             # (K,C,C)
    w3, b3 = fold_conv(p["conv3_w"], p["conv3_b"], p["bn3"])             # (K,C,C)

    # FC1: torch.flatten of (B, C, L) uses index c*L + l -> per-position (L, Cin, Cout),
    # eval-BN folded into weights/bias (only the 21 real positions kept).
    sfc, tfc = bn_scale_shift(p["bn_fc"])
    wfc1 = (jnp.transpose(p["fc1_w"].reshape(C, C, L), (2, 1, 0))
            * sfc[None]).astype(jnp.bfloat16)                            # (L, C, C)
    bfc1 = (p["fc1_b"].reshape(1, C) * sfc + tfc).astype(jnp.float32)

    fc2w = p["fc2_w"].reshape(1, C).astype(jnp.float32)
    fc2b = p["fc2_b"].reshape(1).astype(jnp.float32)

    out = pl.pallas_call(
        cnn_kernel,
        out_shape=jax.ShapeDtypeStruct((Bp, 1), jnp.float32),
        grid=(ntiles,),
        in_specs=[
            pl.BlockSpec((L, tile_b, 8), lambda i: (0, i, 0)),           # x taps (tiled)
            pl.BlockSpec((8, C), lambda i: (0, 0)),                      # w1 (resident)
            pl.BlockSpec((1, C), lambda i: (0, 0)),                      # b1
            pl.BlockSpec((K, C, C), lambda i: (0, 0, 0)),                # w2
            pl.BlockSpec((1, C), lambda i: (0, 0)),                      # b2
            pl.BlockSpec((K, C, C), lambda i: (0, 0, 0)),                # w3
            pl.BlockSpec((1, C), lambda i: (0, 0)),                      # b3
            pl.BlockSpec((L, C, C), lambda i: (0, 0, 0)),                # fc1 w
            pl.BlockSpec((1, C), lambda i: (0, 0)),                      # fc1 b
            pl.BlockSpec((1, C), lambda i: (0, 0)),                      # fc2 w
            pl.BlockSpec(memory_space=pltpu.MemorySpace.SMEM),           # fc2 b (scalar)
        ],
        out_specs=pl.BlockSpec((tile_b, 1), lambda i: (i, 0)),
        scratch_shapes=[pltpu.VMEM(((L + 2 * PAD) * tile_b, C), jnp.bfloat16)],
        compiler_params=pltpu.CompilerParams(
            dimension_semantics=("parallel",),
            vmem_limit_bytes=32 * 1024 * 1024),
    )(x_taps, w1, b1, w2, b2, w3, b3, wfc1, bfc1, fc2w, fc2b)

    return out[:B]                                                        # (B, 1)


# ----------------------------- pure-JAX reference ------------------------------

def reference_forward(x, p):
    B = x.shape[0]
    h = x[:, None, :]                                                 # (B, 1, L)
    specs = [("conv1_w", "conv1_b", "bn1", False),
             ("conv2_w", "conv2_b", "bn2", True),
             ("conv3_w", "conv3_b", "bn3", True)]
    for wn, bnm, bnn, res in specs:
        w, b = p[wn], p[bnm]
        hp = jnp.pad(h, ((0, 0), (0, 0), (PAD, PAD)))
        y = jnp.zeros((B, w.shape[0], L), jnp.float32)
        for k in range(K):
            y = y + jnp.einsum("bcl,oc->bol", hp[:, :, k:k + L], w[:, :, k],
                               precision="highest")
        y = y + b[None, :, None]
        s, t = bn_scale_shift(p[bnn])
        y = jnp.maximum(y * s[0][None, :, None] + t[0][None, :, None], 0.0)
        h = h + y if res else y
    flat = h.reshape(B, -1)                                           # torch flatten order
    z = jnp.dot(flat, p["fc1_w"].T, precision="highest") + p["fc1_b"]
    sfc, tfc = bn_scale_shift(p["bn_fc"])
    z = jnp.maximum(z * sfc + tfc, 0.0)
    y2 = jnp.dot(z, p["fc2_w"].T, precision="highest") + p["fc2_b"]
    return jax.nn.sigmoid(y2)


if __name__ == "__main__":
    key = jax.random.PRNGKey(0)
    pkey, xkey = jax.random.split(key)
    params = init_params(pkey)

    B = 16
    x = jax.random.normal(xkey, (B, L), jnp.float32)                  # input: (batch, 21)

    out = jax.block_until_ready(cnn_forward(x, params))
    ref = reference_forward(x, params)

    assert out.shape == (B, 1) and out.dtype == jnp.float32
    err = float(jnp.max(jnp.abs(out - ref)))
    # bf16 MXU inputs with f32 accumulation -> relaxed tolerance.
    if err > 2e-2:
        raise AssertionError(f"kernel/reference mismatch: max abs err = {err}")
    print("KERNEL_OK")
</pallas_src>

<mosaic_0001>
module attributes {stable_mosaic.version = 11 : i64} {
  func.func @cnn_kernel(%arg0: i32, %arg1: memref<21x16x8xbf16, #tpu.memory_space<vmem>>, %arg2: memref<8x128xbf16, #tpu.memory_space<vmem>>, %arg3: memref<1x128xf32, #tpu.memory_space<vmem>>, %arg4: memref<5x128x128xbf16, #tpu.memory_space<vmem>>, %arg5: memref<1x128xf32, #tpu.memory_space<vmem>>, %arg6: memref<5x128x128xbf16, #tpu.memory_space<vmem>>, %arg7: memref<1x128xf32, #tpu.memory_space<vmem>>, %arg8: memref<21x128x128xbf16, #tpu.memory_space<vmem>>, %arg9: memref<1x128xf32, #tpu.memory_space<vmem>>, %arg10: memref<1x128xf32, #tpu.memory_space<vmem>>, %arg11: memref<1xf32, #tpu.memory_space<smem>>, %arg12: memref<16x1xf32, #tpu.memory_space<vmem>>, %arg13: memref<400x128xbf16, #tpu.memory_space<vmem>>) attributes {dimension_semantics = [#tpu.dimension_semantics<parallel>], iteration_bounds = array<i64: 1>, scalar_prefetch = 0 : i64, scratch_operands = 1 : i64, tpu.core_type = #tpu.core_type<tc>, window_params = [{transform_indices = @transform_0, window_bounds = array<i64: 21, 16, 8>}, {pipeline_mode = #tpu.pipeline_mode<synchronous>, transform_indices = @transform_1, window_bounds = array<i64: 8, 128>}, {pipeline_mode = #tpu.pipeline_mode<synchronous>, transform_indices = @transform_2, window_bounds = array<i64: 1, 128>}, {pipeline_mode = #tpu.pipeline_mode<synchronous>, transform_indices = @transform_3, window_bounds = array<i64: 5, 128, 128>}, {pipeline_mode = #tpu.pipeline_mode<synchronous>, transform_indices = @transform_4, window_bounds = array<i64: 1, 128>}, {pipeline_mode = #tpu.pipeline_mode<synchronous>, transform_indices = @transform_5, window_bounds = array<i64: 5, 128, 128>}, {pipeline_mode = #tpu.pipeline_mode<synchronous>, transform_indices = @transform_6, window_bounds = array<i64: 1, 128>}, {pipeline_mode = #tpu.pipeline_mode<synchronous>, transform_indices = @transform_7, window_bounds = array<i64: 21, 128, 128>}, {pipeline_mode = #tpu.pipeline_mode<synchronous>, transform_indices = @transform_8, window_bounds = array<i64: 1, 128>}, {pipeline_mode = #tpu.pipeline_mode<synchronous>, transform_indices = @transform_9, window_bounds = array<i64: 1, 128>}, {transform_indices = @transform_10, window_bounds = array<i64: 1>}, {transform_indices = @transform_11, window_bounds = array<i64: 16, 1>}]} {
    %cst = arith.constant 0.000000e+00 : bf16
    %0 = vector.broadcast %cst : bf16 to vector<32x128xbf16>
    %c0 = arith.constant 0 : index
    %c0_0 = arith.constant 0 : index
    %1 = vector.load %arg13[%c0, %c0_0] : memref<400x128xbf16, #tpu.memory_space<vmem>>, vector<32x128xbf16>
    tpu.vector_store %arg13[%c0, %c0_0], %0 {strides = array<i32>} : memref<400x128xbf16, #tpu.memory_space<vmem>>, vector<32x128xbf16>,
    %c368 = arith.constant 368 : index
    %c0_1 = arith.constant 0 : index
    %2 = vector.load %arg13[%c368, %c0_1] : memref<400x128xbf16, #tpu.memory_space<vmem>>, vector<32x128xbf16>
    tpu.vector_store %arg13[%c368, %c0_1], %0 {strides = array<i32>} : memref<400x128xbf16, #tpu.memory_space<vmem>>, vector<32x128xbf16>,
    %c0_2 = arith.constant 0 : index
    %c0_3 = arith.constant 0 : index
    %c0_4 = arith.constant 0 : index
    %3 = vector.load %arg1[%c0_2, %c0_3, %c0_4] : memref<21x16x8xbf16, #tpu.memory_space<vmem>>, vector<21x16x8xbf16>
    %4 = vector.shape_cast %3 : vector<21x16x8xbf16> to vector<336x8xbf16>
    %c0_5 = arith.constant 0 : index
    %c0_6 = arith.constant 0 : index
    %5 = vector.load %arg2[%c0_5, %c0_6] : memref<8x128xbf16, #tpu.memory_space<vmem>>, vector<8x128xbf16>
    %cst_7 = arith.constant dense<0.000000e+00> : vector<336x128xf32>
    %6 = tpu.matmul %4, %5, %cst_7 {dimension_numbers = #tpu.dot_dimension_numbers<[1], [0], [0], [1], [0, 0, 1, 1], [], []>} : vector<336x8xbf16>, vector<8x128xbf16>, vector<336x128xf32> -> vector<336x128xf32>
    %c0_8 = arith.constant 0 : index
    %c0_9 = arith.constant 0 : index
    %7 = vector.load %arg3[%c0_8, %c0_9] : memref<1x128xf32, #tpu.memory_space<vmem>>, vector<1x128xf32>
    %8 = vector.broadcast %7 : vector<1x128xf32> to vector<336x128xf32>
    %9 = arith.addf %6, %8 : vector<336x128xf32>
    %cst_10 = arith.constant 0.000000e+00 : f32
    %10 = vector.broadcast %cst_10 : f32 to vector<336x128xf32>
    %11 = arith.maximumf %9, %10 : vector<336x128xf32>
    %12 = arith.truncf %11 : vector<336x128xf32> to vector<336x128xbf16>
    %c32 = arith.constant 32 : index
    %c0_11 = arith.constant 0 : index
    %13 = vector.load %arg13[%c32, %c0_11] : memref<400x128xbf16, #tpu.memory_space<vmem>>, vector<336x128xbf16>
    tpu.vector_store %arg13[%c32, %c0_11], %12 {strides = array<i32>} : memref<400x128xbf16, #tpu.memory_space<vmem>>, vector<336x128xbf16>,
    %c0_12 = arith.constant 0 : index
    %c0_13 = arith.constant 0 : index
    %14 = vector.load %arg13[%c0_12, %c0_13] : memref<400x128xbf16, #tpu.memory_space<vmem>>, vector<336x128xbf16>
    %c0_14 = arith.constant 0 : index
    %c0_15 = arith.constant 0 : index
    %c0_16 = arith.constant 0 : index
    %15 = vector.load %arg4[%c0_14, %c0_15, %c0_16] : memref<5x128x128xbf16, #tpu.memory_space<vmem>>, vector<1x128x128xbf16>
    %16 = vector.shape_cast %15 : vector<1x128x128xbf16> to vector<128x128xbf16>
    %cst_17 = arith.constant dense<0.000000e+00> : vector<336x128xf32>
    %17 = tpu.matmul %14, %16, %cst_17 {dimension_numbers = #tpu.dot_dimension_numbers<[1], [0], [0], [1], [0, 0, 1, 1], [], []>} : vector<336x128xbf16>, vector<128x128xbf16>, vector<336x128xf32> -> vector<336x128xf32>
    %c16 = arith.constant 16 : index
    %c0_18 = arith.constant 0 : index
    %18 = vector.load %arg13[%c16, %c0_18] : memref<400x128xbf16, #tpu.memory_space<vmem>>, vector<336x128xbf16>
    %c1 = arith.constant 1 : index
    %c0_19 = arith.constant 0 : index
    %c0_20 = arith.constant 0 : index
    %19 = vector.load %arg4[%c1, %c0_19, %c0_20] : memref<5x128x128xbf16, #tpu.memory_space<vmem>>, vector<1x128x128xbf16>
    %20 = vector.shape_cast %19 : vector<1x128x128xbf16> to vector<128x128xbf16>
    %cst_21 = arith.constant dense<0.000000e+00> : vector<336x128xf32>
    %21 = tpu.matmul %18, %20, %cst_21 {dimension_numbers = #tpu.dot_dimension_numbers<[1], [0], [0], [1], [0, 0, 1, 1], [], []>} : vector<336x128xbf16>, vector<128x128xbf16>, vector<336x128xf32> -> vector<336x128xf32>
    %22 = arith.addf %17, %21 : vector<336x128xf32>
    %c32_22 = arith.constant 32 : index
    %c0_23 = arith.constant 0 : index
    %23 = vector.load %arg13[%c32_22, %c0_23] : memref<400x128xbf16, #tpu.memory_space<vmem>>, vector<336x128xbf16>
    %c2 = arith.constant 2 : index
    %c0_24 = arith.constant 0 : index
    %c0_25 = arith.constant 0 : index
    %24 = vector.load %arg4[%c2, %c0_24, %c0_25] : memref<5x128x128xbf16, #tpu.memory_space<vmem>>, vector<1x128x128xbf16>
    %25 = vector.shape_cast %24 : vector<1x128x128xbf16> to vector<128x128xbf16>
    %cst_26 = arith.constant dense<0.000000e+00> : vector<336x128xf32>
    %26 = tpu.matmul %23, %25, %cst_26 {dimension_numbers = #tpu.dot_dimension_numbers<[1], [0], [0], [1], [0, 0, 1, 1], [], []>} : vector<336x128xbf16>, vector<128x128xbf16>, vector<336x128xf32> -> vector<336x128xf32>
    %27 = arith.addf %22, %26 : vector<336x128xf32>
    %c48 = arith.constant 48 : index
    %c0_27 = arith.constant 0 : index
    %28 = vector.load %arg13[%c48, %c0_27] : memref<400x128xbf16, #tpu.memory_space<vmem>>, vector<336x128xbf16>
    %c3 = arith.constant 3 : index
    %c0_28 = arith.constant 0 : index
    %c0_29 = arith.constant 0 : index
    %29 = vector.load %arg4[%c3, %c0_28, %c0_29] : memref<5x128x128xbf16, #tpu.memory_space<vmem>>, vector<1x128x128xbf16>
    %30 = vector.shape_cast %29 : vector<1x128x128xbf16> to vector<128x128xbf16>
    %cst_30 = arith.constant dense<0.000000e+00> : vector<336x128xf32>
    %31 = tpu.matmul %28, %30, %cst_30 {dimension_numbers = #tpu.dot_dimension_numbers<[1], [0], [0], [1], [0, 0, 1, 1], [], []>} : vector<336x128xbf16>, vector<128x128xbf16>, vector<336x128xf32> -> vector<336x128xf32>
    %32 = arith.addf %27, %31 : vector<336x128xf32>
    %c64 = arith.constant 64 : index
    %c0_31 = arith.constant 0 : index
    %33 = vector.load %arg13[%c64, %c0_31] : memref<400x128xbf16, #tpu.memory_space<vmem>>, vector<336x128xbf16>
    %c4 = arith.constant 4 : index
    %c0_32 = arith.constant 0 : index
    %c0_33 = arith.constant 0 : index
    %34 = vector.load %arg4[%c4, %c0_32, %c0_33] : memref<5x128x128xbf16, #tpu.memory_space<vmem>>, vector<1x128x128xbf16>
    %35 = vector.shape_cast %34 : vector<1x128x128xbf16> to vector<128x128xbf16>
    %cst_34 = arith.constant dense<0.000000e+00> : vector<336x128xf32>
    %36 = tpu.matmul %33, %35, %cst_34 {dimension_numbers = #tpu.dot_dimension_numbers<[1], [0], [0], [1], [0, 0, 1, 1], [], []>} : vector<336x128xbf16>, vector<128x128xbf16>, vector<336x128xf32> -> vector<336x128xf32>
    %37 = arith.addf %32, %36 : vector<336x128xf32>
    %c0_35 = arith.constant 0 : index
    %c0_36 = arith.constant 0 : index
    %38 = vector.load %arg5[%c0_35, %c0_36] : memref<1x128xf32, #tpu.memory_space<vmem>>, vector<1x128xf32>
    %39 = vector.broadcast %38 : vector<1x128xf32> to vector<336x128xf32>
    %40 = arith.addf %37, %39 : vector<336x128xf32>
    %cst_37 = arith.constant 0.000000e+00 : f32
    %41 = vector.broadcast %cst_37 : f32 to vector<336x128xf32>
    %42 = arith.maximumf %40, %41 : vector<336x128xf32>
    %43 = arith.addf %11, %42 : vector<336x128xf32>
    %44 = arith.truncf %43 : vector<336x128xf32> to vector<336x128xbf16>
    %c32_38 = arith.constant 32 : index
    %c0_39 = arith.constant 0 : index
    %45 = vector.load %arg13[%c32_38, %c0_39] : memref<400x128xbf16, #tpu.memory_space<vmem>>, vector<336x128xbf16>
    tpu.vector_store %arg13[%c32_38, %c0_39], %44 {strides = array<i32>} : memref<400x128xbf16, #tpu.memory_space<vmem>>, vector<336x128xbf16>,
    %c0_40 = arith.constant 0 : index
    %c0_41 = arith.constant 0 : index
    %46 = vector.load %arg13[%c0_40, %c0_41] : memref<400x128xbf16, #tpu.memory_space<vmem>>, vector<336x128xbf16>
    %c0_42 = arith.constant 0 : index
    %c0_43 = arith.constant 0 : index
    %c0_44 = arith.constant 0 : index
    %47 = vector.load %arg6[%c0_42, %c0_43, %c0_44] : memref<5x128x128xbf16, #tpu.memory_space<vmem>>, vector<1x128x128xbf16>
    %48 = vector.shape_cast %47 : vector<1x128x128xbf16> to vector<128x128xbf16>
    %cst_45 = arith.constant dense<0.000000e+00> : vector<336x128xf32>
    %49 = tpu.matmul %46, %48, %cst_45 {dimension_numbers = #tpu.dot_dimension_numbers<[1], [0], [0], [1], [0, 0, 1, 1], [], []>} : vector<336x128xbf16>, vector<128x128xbf16>, vector<336x128xf32> -> vector<336x128xf32>
    %c16_46 = arith.constant 16 : index
    %c0_47 = arith.constant 0 : index
    %50 = vector.load %arg13[%c16_46, %c0_47] : memref<400x128xbf16, #tpu.memory_space<vmem>>, vector<336x128xbf16>
    %c1_48 = arith.constant 1 : index
    %c0_49 = arith.constant 0 : index
    %c0_50 = arith.constant 0 : index
    %51 = vector.load %arg6[%c1_48, %c0_49, %c0_50] : memref<5x128x128xbf16, #tpu.memory_space<vmem>>, vector<1x128x128xbf16>
    %52 = vector.shape_cast %51 : vector<1x128x128xbf16> to vector<128x128xbf16>
    %cst_51 = arith.constant dense<0.000000e+00> : vector<336x128xf32>
    %53 = tpu.matmul %50, %52, %cst_51 {dimension_numbers = #tpu.dot_dimension_numbers<[1], [0], [0], [1], [0, 0, 1, 1], [], []>} : vector<336x128xbf16>, vector<128x128xbf16>, vector<336x128xf32> -> vector<336x128xf32>
    %54 = arith.addf %49, %53 : vector<336x128xf32>
    %c32_52 = arith.constant 32 : index
    %c0_53 = arith.constant 0 : index
    %55 = vector.load %arg13[%c32_52, %c0_53] : memref<400x128xbf16, #tpu.memory_space<vmem>>, vector<336x128xbf16>
    %c2_54 = arith.constant 2 : index
    %c0_55 = arith.constant 0 : index
    %c0_56 = arith.constant 0 : index
    %56 = vector.load %arg6[%c2_54, %c0_55, %c0_56] : memref<5x128x128xbf16, #tpu.memory_space<vmem>>, vector<1x128x128xbf16>
    %57 = vector.shape_cast %56 : vector<1x128x128xbf16> to vector<128x128xbf16>
    %cst_57 = arith.constant dense<0.000000e+00> : vector<336x128xf32>
    %58 = tpu.matmul %55, %57, %cst_57 {dimension_numbers = #tpu.dot_dimension_numbers<[1], [0], [0], [1], [0, 0, 1, 1], [], []>} : vector<336x128xbf16>, vector<128x128xbf16>, vector<336x128xf32> -> vector<336x128xf32>
    %59 = arith.addf %54, %58 : vector<336x128xf32>
    %c48_58 = arith.constant 48 : index
    %c0_59 = arith.constant 0 : index
    %60 = vector.load %arg13[%c48_58, %c0_59] : memref<400x128xbf16, #tpu.memory_space<vmem>>, vector<336x128xbf16>
    %c3_60 = arith.constant 3 : index
    %c0_61 = arith.constant 0 : index
    %c0_62 = arith.constant 0 : index
    %61 = vector.load %arg6[%c3_60, %c0_61, %c0_62] : memref<5x128x128xbf16, #tpu.memory_space<vmem>>, vector<1x128x128xbf16>
    %62 = vector.shape_cast %61 : vector<1x128x128xbf16> to vector<128x128xbf16>
    %cst_63 = arith.constant dense<0.000000e+00> : vector<336x128xf32>
    %63 = tpu.matmul %60, %62, %cst_63 {dimension_numbers = #tpu.dot_dimension_numbers<[1], [0], [0], [1], [0, 0, 1, 1], [], []>} : vector<336x128xbf16>, vector<128x128xbf16>, vector<336x128xf32> -> vector<336x128xf32>
    %64 = arith.addf %59, %63 : vector<336x128xf32>
    %c64_64 = arith.constant 64 : index
    %c0_65 = arith.constant 0 : index
    %65 = vector.load %arg13[%c64_64, %c0_65] : memref<400x128xbf16, #tpu.memory_space<vmem>>, vector<336x128xbf16>
    %c4_66 = arith.constant 4 : index
    %c0_67 = arith.constant 0 : index
    %c0_68 = arith.constant 0 : index
    %66 = vector.load %arg6[%c4_66, %c0_67, %c0_68] : memref<5x128x128xbf16, #tpu.memory_space<vmem>>, vector<1x128x128xbf16>
    %67 = vector.shape_cast %66 : vector<1x128x128xbf16> to vector<128x128xbf16>
    %cst_69 = arith.constant dense<0.000000e+00> : vector<336x128xf32>
    %68 = tpu.matmul %65, %67, %cst_69 {dimension_numbers = #tpu.dot_dimension_numbers<[1], [0], [0], [1], [0, 0, 1, 1], [], []>} : vector<336x128xbf16>, vector<128x128xbf16>, vector<336x128xf32> -> vector<336x128xf32>
    %69 = arith.addf %64, %68 : vector<336x128xf32>
    %c0_70 = arith.constant 0 : index
    %c0_71 = arith.constant 0 : index
    %70 = vector.load %arg7[%c0_70, %c0_71] : memref<1x128xf32, #tpu.memory_space<vmem>>, vector<1x128xf32>
    %71 = vector.broadcast %70 : vector<1x128xf32> to vector<336x128xf32>
    %72 = arith.addf %69, %71 : vector<336x128xf32>
    %cst_72 = arith.constant 0.000000e+00 : f32
    %73 = vector.broadcast %cst_72 : f32 to vector<336x128xf32>
    %74 = arith.maximumf %72, %73 : vector<336x128xf32>
    %75 = arith.addf %43, %74 : vector<336x128xf32>
    %76 = arith.truncf %75 : vector<336x128xf32> to vector<336x128xbf16>
    %c32_73 = arith.constant 32 : index
    %c0_74 = arith.constant 0 : index
    %77 = vector.load %arg13[%c32_73, %c0_74] : memref<400x128xbf16, #tpu.memory_space<vmem>>, vector<336x128xbf16>
    tpu.vector_store %arg13[%c32_73, %c0_74], %76 {strides = array<i32>} : memref<400x128xbf16, #tpu.memory_space<vmem>>, vector<336x128xbf16>,
    %c32_75 = arith.constant 32 : index
    %c0_76 = arith.constant 0 : index
    %78 = vector.load %arg13[%c32_75, %c0_76] : memref<400x128xbf16, #tpu.memory_space<vmem>>, vector<16x128xbf16>
    %c0_77 = arith.constant 0 : index
    %c0_78 = arith.constant 0 : index
    %c0_79 = arith.constant 0 : index
    %79 = vector.load %arg8[%c0_77, %c0_78, %c0_79] : memref<21x128x128xbf16, #tpu.memory_space<vmem>>, vector<1x128x128xbf16>
    %80 = vector.shape_cast %79 : vector<1x128x128xbf16> to vector<128x128xbf16>
    %cst_80 = arith.constant dense<0.000000e+00> : vector<16x128xf32>
    %81 = tpu.matmul %78, %80, %cst_80 {dimension_numbers = #tpu.dot_dimension_numbers<[1], [0], [0], [1], [0, 0, 1, 1], [], []>} : vector<16x128xbf16>, vector<128x128xbf16>, vector<16x128xf32> -> vector<16x128xf32>
    %c48_81 = arith.constant 48 : index
    %c0_82 = arith.constant 0 : index
    %82 = vector.load %arg13[%c48_81, %c0_82] : memref<400x128xbf16, #tpu.memory_space<vmem>>, vector<16x128xbf16>
    %c1_83 = arith.constant 1 : index
    %c0_84 = arith.constant 0 : index
    %c0_85 = arith.constant 0 : index
    %83 = vector.load %arg8[%c1_83, %c0_84, %c0_85] : memref<21x128x128xbf16, #tpu.memory_space<vmem>>, vector<1x128x128xbf16>
    %84 = vector.shape_cast %83 : vector<1x128x128xbf16> to vector<128x128xbf16>
    %cst_86 = arith.constant dense<0.000000e+00> : vector<16x128xf32>
    %85 = tpu.matmul %82, %84, %cst_86 {dimension_numbers = #tpu.dot_dimension_numbers<[1], [0], [0], [1], [0, 0, 1, 1], [], []>} : vector<16x128xbf16>, vector<128x128xbf16>, vector<16x128xf32> -> vector<16x128xf32>
    %86 = arith.addf %81, %85 : vector<16x128xf32>
    %c64_87 = arith.constant 64 : index
    %c0_88 = arith.constant 0 : index
    %87 = vector.load %arg13[%c64_87, %c0_88] : memref<400x128xbf16, #tpu.memory_space<vmem>>, vector<16x128xbf16>
    %c2_89 = arith.constant 2 : index
    %c0_90 = arith.constant 0 : index
    %c0_91 = arith.constant 0 : index
    %88 = vector.load %arg8[%c2_89, %c0_90, %c0_91] : memref<21x128x128xbf16, #tpu.memory_space<vmem>>, vector<1x128x128xbf16>
    %89 = vector.shape_cast %88 : vector<1x128x128xbf16> to vector<128x128xbf16>
    %cst_92 = arith.constant dense<0.000000e+00> : vector<16x128xf32>
    %90 = tpu.matmul %87, %89, %cst_92 {dimension_numbers = #tpu.dot_dimension_numbers<[1], [0], [0], [1], [0, 0, 1, 1], [], []>} : vector<16x128xbf16>, vector<128x128xbf16>, vector<16x128xf32> -> vector<16x128xf32>
    %91 = arith.addf %86, %90 : vector<16x128xf32>
    %c80 = arith.constant 80 : index
    %c0_93 = arith.constant 0 : index
    %92 = vector.load %arg13[%c80, %c0_93] : memref<400x128xbf16, #tpu.memory_space<vmem>>, vector<16x128xbf16>
    %c3_94 = arith.constant 3 : index
    %c0_95 = arith.constant 0 : index
    %c0_96 = arith.constant 0 : index
    %93 = vector.load %arg8[%c3_94, %c0_95, %c0_96] : memref<21x128x128xbf16, #tpu.memory_space<vmem>>, vector<1x128x128xbf16>
    %94 = vector.shape_cast %93 : vector<1x128x128xbf16> to vector<128x128xbf16>
    %cst_97 = arith.constant dense<0.000000e+00> : vector<16x128xf32>
    %95 = tpu.matmul %92, %94, %cst_97 {dimension_numbers = #tpu.dot_dimension_numbers<[1], [0], [0], [1], [0, 0, 1, 1], [], []>} : vector<16x128xbf16>, vector<128x128xbf16>, vector<16x128xf32> -> vector<16x128xf32>
    %96 = arith.addf %91, %95 : vector<16x128xf32>
    %c96 = arith.constant 96 : index
    %c0_98 = arith.constant 0 : index
    %97 = vector.load %arg13[%c96, %c0_98] : memref<400x128xbf16, #tpu.memory_space<vmem>>, vector<16x128xbf16>
    %c4_99 = arith.constant 4 : index
    %c0_100 = arith.constant 0 : index
    %c0_101 = arith.constant 0 : index
    %98 = vector.load %arg8[%c4_99, %c0_100, %c0_101] : memref<21x128x128xbf16, #tpu.memory_space<vmem>>, vector<1x128x128xbf16>
    %99 = vector.shape_cast %98 : vector<1x128x128xbf16> to vector<128x128xbf16>
    %cst_102 = arith.constant dense<0.000000e+00> : vector<16x128xf32>
    %100 = tpu.matmul %97, %99, %cst_102 {dimension_numbers = #tpu.dot_dimension_numbers<[1], [0], [0], [1], [0, 0, 1, 1], [], []>} : vector<16x128xbf16>, vector<128x128xbf16>, vector<16x128xf32> -> vector<16x128xf32>
    %101 = arith.addf %96, %100 : vector<16x128xf32>
    %c112 = arith.constant 112 : index
    %c0_103 = arith.constant 0 : index
    %102 = vector.load %arg13[%c112, %c0_103] : memref<400x128xbf16, #tpu.memory_space<vmem>>, vector<16x128xbf16>
    %c5 = arith.constant 5 : index
    %c0_104 = arith.constant 0 : index
    %c0_105 = arith.constant 0 : index
    %103 = vector.load %arg8[%c5, %c0_104, %c0_105] : memref<21x128x128xbf16, #tpu.memory_space<vmem>>, vector<1x128x128xbf16>
    %104 = vector.shape_cast %103 : vector<1x128x128xbf16> to vector<128x128xbf16>
    %cst_106 = arith.constant dense<0.000000e+00> : vector<16x128xf32>
    %105 = tpu.matmul %102, %104, %cst_106 {dimension_numbers = #tpu.dot_dimension_numbers<[1], [0], [0], [1], [0, 0, 1, 1], [], []>} : vector<16x128xbf16>, vector<128x128xbf16>, vector<16x128xf32> -> vector<16x128xf32>
    %106 = arith.addf %101, %105 : vector<16x128xf32>
    %c128 = arith.constant 128 : index
    %c0_107 = arith.constant 0 : index
    %107 = vector.load %arg13[%c128, %c0_107] : memref<400x128xbf16, #tpu.memory_space<vmem>>, vector<16x128xbf16>
    %c6 = arith.constant 6 : index
    %c0_108 = arith.constant 0 : index
    %c0_109 = arith.constant 0 : index
    %108 = vector.load %arg8[%c6, %c0_108, %c0_109] : memref<21x128x128xbf16, #tpu.memory_space<vmem>>, vector<1x128x128xbf16>
    %109 = vector.shape_cast %108 : vector<1x128x128xbf16> to vector<128x128xbf16>
    %cst_110 = arith.constant dense<0.000000e+00> : vector<16x128xf32>
    %110 = tpu.matmul %107, %109, %cst_110 {dimension_numbers = #tpu.dot_dimension_numbers<[1], [0], [0], [1], [0, 0, 1, 1], [], []>} : vector<16x128xbf16>, vector<128x128xbf16>, vector<16x128xf32> -> vector<16x128xf32>
    %111 = arith.addf %106, %110 : vector<16x128xf32>
    %c144 = arith.constant 144 : index
    %c0_111 = arith.constant 0 : index
    %112 = vector.load %arg13[%c144, %c0_111] : memref<400x128xbf16, #tpu.memory_space<vmem>>, vector<16x128xbf16>
    %c7 = arith.constant 7 : index
    %c0_112 = arith.constant 0 : index
    %c0_113 = arith.constant 0 : index
    %113 = vector.load %arg8[%c7, %c0_112, %c0_113] : memref<21x128x128xbf16, #tpu.memory_space<vmem>>, vector<1x128x128xbf16>
    %114 = vector.shape_cast %113 : vector<1x128x128xbf16> to vector<128x128xbf16>
    %cst_114 = arith.constant dense<0.000000e+00> : vector<16x128xf32>
    %115 = tpu.matmul %112, %114, %cst_114 {dimension_numbers = #tpu.dot_dimension_numbers<[1], [0], [0], [1], [0, 0, 1, 1], [], []>} : vector<16x128xbf16>, vector<128x128xbf16>, vector<16x128xf32> -> vector<16x128xf32>
    %116 = arith.addf %111, %115 : vector<16x128xf32>
    %c160 = arith.constant 160 : index
    %c0_115 = arith.constant 0 : index
    %117 = vector.load %arg13[%c160, %c0_115] : memref<400x128xbf16, #tpu.memory_space<vmem>>, vector<16x128xbf16>
    %c8 = arith.constant 8 : index
    %c0_116 = arith.constant 0 : index
    %c0_117 = arith.constant 0 : index
    %118 = vector.load %arg8[%c8, %c0_116, %c0_117] : memref<21x128x128xbf16, #tpu.memory_space<vmem>>, vector<1x128x128xbf16>
    %119 = vector.shape_cast %118 : vector<1x128x128xbf16> to vector<128x128xbf16>
    %cst_118 = arith.constant dense<0.000000e+00> : vector<16x128xf32>
    %120 = tpu.matmul %117, %119, %cst_118 {dimension_numbers = #tpu.dot_dimension_numbers<[1], [0], [0], [1], [0, 0, 1, 1], [], []>} : vector<16x128xbf16>, vector<128x128xbf16>, vector<16x128xf32> -> vector<16x128xf32>
    %121 = arith.addf %116, %120 : vector<16x128xf32>
    %c176 = arith.constant 176 : index
    %c0_119 = arith.constant 0 : index
    %122 = vector.load %arg13[%c176, %c0_119] : memref<400x128xbf16, #tpu.memory_space<vmem>>, vector<16x128xbf16>
    %c9 = arith.constant 9 : index
    %c0_120 = arith.constant 0 : index
    %c0_121 = arith.constant 0 : index
    %123 = vector.load %arg8[%c9, %c0_120, %c0_121] : memref<21x128x128xbf16, #tpu.memory_space<vmem>>, vector<1x128x128xbf16>
    %124 = vector.shape_cast %123 : vector<1x128x128xbf16> to vector<128x128xbf16>
    %cst_122 = arith.constant dense<0.000000e+00> : vector<16x128xf32>
    %125 = tpu.matmul %122, %124, %cst_122 {dimension_numbers = #tpu.dot_dimension_numbers<[1], [0], [0], [1], [0, 0, 1, 1], [], []>} : vector<16x128xbf16>, vector<128x128xbf16>, vector<16x128xf32> -> vector<16x128xf32>
    %126 = arith.addf %121, %125 : vector<16x128xf32>
    %c192 = arith.constant 192 : index
    %c0_123 = arith.constant 0 : index
    %127 = vector.load %arg13[%c192, %c0_123] : memref<400x128xbf16, #tpu.memory_space<vmem>>, vector<16x128xbf16>
    %c10 = arith.constant 10 : index
    %c0_124 = arith.constant 0 : index
    %c0_125 = arith.constant 0 : index
    %128 = vector.load %arg8[%c10, %c0_124, %c0_125] : memref<21x128x128xbf16, #tpu.memory_space<vmem>>, vector<1x128x128xbf16>
    %129 = vector.shape_cast %128 : vector<1x128x128xbf16> to vector<128x128xbf16>
    %cst_126 = arith.constant dense<0.000000e+00> : vector<16x128xf32>
    %130 = tpu.matmul %127, %129, %cst_126 {dimension_numbers = #tpu.dot_dimension_numbers<[1], [0], [0], [1], [0, 0, 1, 1], [], []>} : vector<16x128xbf16>, vector<128x128xbf16>, vector<16x128xf32> -> vector<16x128xf32>
    %131 = arith.addf %126, %130 : vector<16x128xf32>
    %c208 = arith.constant 208 : index
    %c0_127 = arith.constant 0 : index
    %132 = vector.load %arg13[%c208, %c0_127] : memref<400x128xbf16, #tpu.memory_space<vmem>>, vector<16x128xbf16>
    %c11 = arith.constant 11 : index
    %c0_128 = arith.constant 0 : index
    %c0_129 = arith.constant 0 : index
    %133 = vector.load %arg8[%c11, %c0_128, %c0_129] : memref<21x128x128xbf16, #tpu.memory_space<vmem>>, vector<1x128x128xbf16>
    %134 = vector.shape_cast %133 : vector<1x128x128xbf16> to vector<128x128xbf16>
    %cst_130 = arith.constant dense<0.000000e+00> : vector<16x128xf32>
    %135 = tpu.matmul %132, %134, %cst_130 {dimension_numbers = #tpu.dot_dimension_numbers<[1], [0], [0], [1], [0, 0, 1, 1], [], []>} : vector<16x128xbf16>, vector<128x128xbf16>, vector<16x128xf32> -> vector<16x128xf32>
    %136 = arith.addf %131, %135 : vector<16x128xf32>
    %c224 = arith.constant 224 : index
    %c0_131 = arith.constant 0 : index
    %137 = vector.load %arg13[%c224, %c0_131] : memref<400x128xbf16, #tpu.memory_space<vmem>>, vector<16x128xbf16>
    %c12 = arith.constant 12 : index
    %c0_132 = arith.constant 0 : index
    %c0_133 = arith.constant 0 : index
    %138 = vector.load %arg8[%c12, %c0_132, %c0_133] : memref<21x128x128xbf16, #tpu.memory_space<vmem>>, vector<1x128x128xbf16>
    %139 = vector.shape_cast %138 : vector<1x128x128xbf16> to vector<128x128xbf16>
    %cst_134 = arith.constant dense<0.000000e+00> : vector<16x128xf32>
    %140 = tpu.matmul %137, %139, %cst_134 {dimension_numbers = #tpu.dot_dimension_numbers<[1], [0], [0], [1], [0, 0, 1, 1], [], []>} : vector<16x128xbf16>, vector<128x128xbf16>, vector<16x128xf32> -> vector<16x128xf32>
    %141 = arith.addf %136, %140 : vector<16x128xf32>
    %c240 = arith.constant 240 : index
    %c0_135 = arith.constant 0 : index
    %142 = vector.load %arg13[%c240, %c0_135] : memref<400x128xbf16, #tpu.memory_space<vmem>>, vector<16x128xbf16>
    %c13 = arith.constant 13 : index
    %c0_136 = arith.constant 0 : index
    %c0_137 = arith.constant 0 : index
    %143 = vector.load %arg8[%c13, %c0_136, %c0_137] : memref<21x128x128xbf16, #tpu.memory_space<vmem>>, vector<1x128x128xbf16>
    %144 = vector.shape_cast %143 : vector<1x128x128xbf16> to vector<128x128xbf16>
    %cst_138 = arith.constant dense<0.000000e+00> : vector<16x128xf32>
    %145 = tpu.matmul %142, %144, %cst_138 {dimension_numbers = #tpu.dot_dimension_numbers<[1], [0], [0], [1], [0, 0, 1, 1], [], []>} : vector<16x128xbf16>, vector<128x128xbf16>, vector<16x128xf32> -> vector<16x128xf32>
    %146 = arith.addf %141, %145 : vector<16x128xf32>
    %c256 = arith.constant 256 : index
    %c0_139 = arith.constant 0 : index
    %147 = vector.load %arg13[%c256, %c0_139] : memref<400x128xbf16, #tpu.memory_space<vmem>>, vector<16x128xbf16>
    %c14 = arith.constant 14 : index
    %c0_140 = arith.constant 0 : index
    %c0_141 = arith.constant 0 : index
    %148 = vector.load %arg8[%c14, %c0_140, %c0_141] : memref<21x128x128xbf16, #tpu.memory_space<vmem>>, vector<1x128x128xbf16>
    %149 = vector.shape_cast %148 : vector<1x128x128xbf16> to vector<128x128xbf16>
    %cst_142 = arith.constant dense<0.000000e+00> : vector<16x128xf32>
    %150 = tpu.matmul %147, %149, %cst_142 {dimension_numbers = #tpu.dot_dimension_numbers<[1], [0], [0], [1], [0, 0, 1, 1], [], []>} : vector<16x128xbf16>, vector<128x128xbf16>, vector<16x128xf32> -> vector<16x128xf32>
    %151 = arith.addf %146, %150 : vector<16x128xf32>
    %c272 = arith.constant 272 : index
    %c0_143 = arith.constant 0 : index
    %152 = vector.load %arg13[%c272, %c0_143] : memref<400x128xbf16, #tpu.memory_space<vmem>>, vector<16x128xbf16>
    %c15 = arith.constant 15 : index
    %c0_144 = arith.constant 0 : index
    %c0_145 = arith.constant 0 : index
    %153 = vector.load %arg8[%c15, %c0_144, %c0_145] : memref<21x128x128xbf16, #tpu.memory_space<vmem>>, vector<1x128x128xbf16>
    %154 = vector.shape_cast %153 : vector<1x128x128xbf16> to vector<128x128xbf16>
    %cst_146 = arith.constant dense<0.000000e+00> : vector<16x128xf32>
    %155 = tpu.matmul %152, %154, %cst_146 {dimension_numbers = #tpu.dot_dimension_numbers<[1], [0], [0], [1], [0, 0, 1, 1], [], []>} : vector<16x128xbf16>, vector<128x128xbf16>, vector<16x128xf32> -> vector<16x128xf32>
    %156 = arith.addf %151, %155 : vector<16x128xf32>
    %c288 = arith.constant 288 : index
    %c0_147 = arith.constant 0 : index
    %157 = vector.load %arg13[%c288, %c0_147] : memref<400x128xbf16, #tpu.memory_space<vmem>>, vector<16x128xbf16>
    %c16_148 = arith.constant 16 : index
    %c0_149 = arith.constant 0 : index
    %c0_150 = arith.constant 0 : index
    %158 = vector.load %arg8[%c16_148, %c0_149, %c0_150] : memref<21x128x128xbf16, #tpu.memory_space<vmem>>, vector<1x128x128xbf16>
    %159 = vector.shape_cast %158 : vector<1x128x128xbf16> to vector<128x128xbf16>
    %cst_151 = arith.constant dense<0.000000e+00> : vector<16x128xf32>
    %160 = tpu.matmul %157, %159, %cst_151 {dimension_numbers = #tpu.dot_dimension_numbers<[1], [0], [0], [1], [0, 0, 1, 1], [], []>} : vector<16x128xbf16>, vector<128x128xbf16>, vector<16x128xf32> -> vector<16x128xf32>
    %161 = arith.addf %156, %160 : vector<16x128xf32>
    %c304 = arith.constant 304 : index
    %c0_152 = arith.constant 0 : index
    %162 = vector.load %arg13[%c304, %c0_152] : memref<400x128xbf16, #tpu.memory_space<vmem>>, vector<16x128xbf16>
    %c17 = arith.constant 17 : index
    %c0_153 = arith.constant 0 : index
    %c0_154 = arith.constant 0 : index
    %163 = vector.load %arg8[%c17, %c0_153, %c0_154] : memref<21x128x128xbf16, #tpu.memory_space<vmem>>, vector<1x128x128xbf16>
    %164 = vector.shape_cast %163 : vector<1x128x128xbf16> to vector<128x128xbf16>
    %cst_155 = arith.constant dense<0.000000e+00> : vector<16x128xf32>
    %165 = tpu.matmul %162, %164, %cst_155 {dimension_numbers = #tpu.dot_dimension_numbers<[1], [0], [0], [1], [0, 0, 1, 1], [], []>} : vector<16x128xbf16>, vector<128x128xbf16>, vector<16x128xf32> -> vector<16x128xf32>
    %166 = arith.addf %161, %165 : vector<16x128xf32>
    %c320 = arith.constant 320 : index
    %c0_156 = arith.constant 0 : index
    %167 = vector.load %arg13[%c320, %c0_156] : memref<400x128xbf16, #tpu.memory_space<vmem>>, vector<16x128xbf16>
    %c18 = arith.constant 18 : index
    %c0_157 = arith.constant 0 : index
    %c0_158 = arith.constant 0 : index
    %168 = vector.load %arg8[%c18, %c0_157, %c0_158] : memref<21x128x128xbf16, #tpu.memory_space<vmem>>, vector<1x128x128xbf16>
    %169 = vector.shape_cast %168 : vector<1x128x128xbf16> to vector<128x128xbf16>
    %cst_159 = arith.constant dense<0.000000e+00> : vector<16x128xf32>
    %170 = tpu.matmul %167, %169, %cst_159 {dimension_numbers = #tpu.dot_dimension_numbers<[1], [0], [0], [1], [0, 0, 1, 1], [], []>} : vector<16x128xbf16>, vector<128x128xbf16>, vector<16x128xf32> -> vector<16x128xf32>
    %171 = arith.addf %166, %170 : vector<16x128xf32>
    %c336 = arith.constant 336 : index
    %c0_160 = arith.constant 0 : index
    %172 = vector.load %arg13[%c336, %c0_160] : memref<400x128xbf16, #tpu.memory_space<vmem>>, vector<16x128xbf16>
    %c19 = arith.constant 19 : index
    %c0_161 = arith.constant 0 : index
    %c0_162 = arith.constant 0 : index
    %173 = vector.load %arg8[%c19, %c0_161, %c0_162] : memref<21x128x128xbf16, #tpu.memory_space<vmem>>, vector<1x128x128xbf16>
    %174 = vector.shape_cast %173 : vector<1x128x128xbf16> to vector<128x128xbf16>
    %cst_163 = arith.constant dense<0.000000e+00> : vector<16x128xf32>
    %175 = tpu.matmul %172, %174, %cst_163 {dimension_numbers = #tpu.dot_dimension_numbers<[1], [0], [0], [1], [0, 0, 1, 1], [], []>} : vector<16x128xbf16>, vector<128x128xbf16>, vector<16x128xf32> -> vector<16x128xf32>
    %176 = arith.addf %171, %175 : vector<16x128xf32>
    %c352 = arith.constant 352 : index
    %c0_164 = arith.constant 0 : index
    %177 = vector.load %arg13[%c352, %c0_164] : memref<400x128xbf16, #tpu.memory_space<vmem>>, vector<16x128xbf16>
    %c20 = arith.constant 20 : index
    %c0_165 = arith.constant 0 : index
    %c0_166 = arith.constant 0 : index
    %178 = vector.load %arg8[%c20, %c0_165, %c0_166] : memref<21x128x128xbf16, #tpu.memory_space<vmem>>, vector<1x128x128xbf16>
    %179 = vector.shape_cast %178 : vector<1x128x128xbf16> to vector<128x128xbf16>
    %cst_167 = arith.constant dense<0.000000e+00> : vector<16x128xf32>
    %180 = tpu.matmul %177, %179, %cst_167 {dimension_numbers = #tpu.dot_dimension_numbers<[1], [0], [0], [1], [0, 0, 1, 1], [], []>} : vector<16x128xbf16>, vector<128x128xbf16>, vector<16x128xf32> -> vector<16x128xf32>
    %181 = arith.addf %176, %180 : vector<16x128xf32>
    %c0_168 = arith.constant 0 : index
    %c0_169 = arith.constant 0 : index
    %182 = vector.load %arg9[%c0_168, %c0_169] : memref<1x128xf32, #tpu.memory_space<vmem>>, vector<1x128xf32>
    %183 = vector.broadcast %182 : vector<1x128xf32> to vector<16x128xf32>
    %184 = arith.addf %181, %183 : vector<16x128xf32>
    %cst_170 = arith.constant 0.000000e+00 : f32
    %185 = vector.broadcast %cst_170 : f32 to vector<16x128xf32>
    %186 = arith.maximumf %184, %185 : vector<16x128xf32>
    %c0_171 = arith.constant 0 : index
    %c0_172 = arith.constant 0 : index
    %187 = vector.load %arg10[%c0_171, %c0_172] : memref<1x128xf32, #tpu.memory_space<vmem>>, vector<1x128xf32>
    %188 = vector.broadcast %187 : vector<1x128xf32> to vector<16x128xf32>
    %189 = arith.mulf %186, %188 : vector<16x128xf32>
    %cst_173 = arith.constant dense<0.000000e+00> : vector<16xf32>
    %190 = vector.multi_reduction <add>, %189, %cst_173 [1] : vector<16x128xf32> to vector<16xf32>
    %191 = vector.shape_cast %190 : vector<16xf32> to vector<16x1xf32>
    %c0_174 = arith.constant 0 : index
    %192 = memref.load %arg11[%c0_174] : memref<1xf32, #tpu.memory_space<smem>>
    %193 = vector.broadcast %192 : f32 to vector<16x1xf32>
    %194 = arith.addf %191, %193 : vector<16x1xf32>
    %cst_175 = arith.constant 0.000000e+00 : f32
    %195 = vector.broadcast %cst_175 : f32 to vector<16x1xf32>
    %196 = arith.subf %195, %194 : vector<16x1xf32>
    %197 = math.exp %196 : vector<16x1xf32>
    %cst_176 = arith.constant 1.000000e+00 : f32
    %198 = vector.broadcast %cst_176 : f32 to vector<16x1xf32>
    %199 = arith.addf %198, %197 : vector<16x1xf32>
    %cst_177 = arith.constant 1.000000e+00 : f32
    %200 = vector.broadcast %cst_177 : f32 to vector<16x1xf32>
    %201 = arith.divf %200, %199 : vector<16x1xf32>
    %c0_178 = arith.constant 0 : index
    %c0_179 = arith.constant 0 : index
    %202 = vector.load %arg12[%c0_178, %c0_179] : memref<16x1xf32, #tpu.memory_space<vmem>>, vector<16x1xf32>
    tpu.vector_store %arg12[%c0_178, %c0_179], %201 {strides = array<i32>} : memref<16x1xf32, #tpu.memory_space<vmem>>, vector<16x1xf32>,
    return
  }
  func.func @transform_0(%arg0: i32) -> (i32, i32, i32) {
    %c0_i32 = arith.constant 0 : i32
    %c0_i32_0 = arith.constant 0 : i32
    %c0_i32_1 = arith.constant 0 : i32
    return %c0_i32, %arg0, %c0_i32_0 : i32, i32, i32
  }
  func.func @transform_1(%arg0: i32) -> (i32, i32) {
    %c0_i32 = arith.constant 0 : i32
    %c0_i32_0 = arith.constant 0 : i32
    %c0_i32_1 = arith.constant 0 : i32
    return %c0_i32, %c0_i32_0 : i32, i32
  }
  func.func @transform_2(%arg0: i32) -> (i32, i32) {
    %c0_i32 = arith.constant 0 : i32
    %c0_i32_0 = arith.constant 0 : i32
    %c0_i32_1 = arith.constant 0 : i32
    return %c0_i32, %c0_i32_0 : i32, i32
  }
  func.func @transform_3(%arg0: i32) -> (i32, i32, i32) {
    %c0_i32 = arith.constant 0 : i32
    %c0_i32_0 = arith.constant 0 : i32
    %c0_i32_1 = arith.constant 0 : i32
    %c0_i32_2 = arith.constant 0 : i32
    return %c0_i32, %c0_i32_0, %c0_i32_1 : i32, i32, i32
  }
  func.func @transform_4(%arg0: i32) -> (i32, i32) {
    %c0_i32 = arith.constant 0 : i32
    %c0_i32_0 = arith.constant 0 : i32
    %c0_i32_1 = arith.constant 0 : i32
    return %c0_i32, %c0_i32_0 : i32, i32
  }
  func.func @transform_5(%arg0: i32) -> (i32, i32, i32) {
    %c0_i32 = arith.constant 0 : i32
    %c0_i32_0 = arith.constant 0 : i32
    %c0_i32_1 = arith.constant 0 : i32
    %c0_i32_2 = arith.constant 0 : i32
    return %c0_i32, %c0_i32_0, %c0_i32_1 : i32, i32, i32
  }
  func.func @transform_6(%arg0: i32) -> (i32, i32) {
    %c0_i32 = arith.constant 0 : i32
    %c0_i32_0 = arith.constant 0 : i32
    %c0_i32_1 = arith.constant 0 : i32
    return %c0_i32, %c0_i32_0 : i32, i32
  }
  func.func @transform_7(%arg0: i32) -> (i32, i32, i32) {
    %c0_i32 = arith.constant 0 : i32
    %c0_i32_0 = arith.constant 0 : i32
    %c0_i32_1 = arith.constant 0 : i32
    %c0_i32_2 = arith.constant 0 : i32
    return %c0_i32, %c0_i32_0, %c0_i32_1 : i32, i32, i32
  }
  func.func @transform_8(%arg0: i32) -> (i32, i32) {
    %c0_i32 = arith.constant 0 : i32
    %c0_i32_0 = arith.constant 0 : i32
    %c0_i32_1 = arith.constant 0 : i32
    return %c0_i32, %c0_i32_0 : i32, i32
  }
  func.func @transform_9(%arg0: i32) -> (i32, i32) {
    %c0_i32 = arith.constant 0 : i32
    %c0_i32_0 = arith.constant 0 : i32
    %c0_i32_1 = arith.constant 0 : i32
    return %c0_i32, %c0_i32_0 : i32, i32
  }
  func.func @transform_10(%arg0: i32) -> i32 {
    %c0_i32 = arith.constant 0 : i32
    %c0_i32_0 = arith.constant 0 : i32
    return %c0_i32 : i32
  }
  func.func @transform_11(%arg0: i32) -> (i32, i32) {
    %c0_i32 = arith.constant 0 : i32
    %c0_i32_0 = arith.constant 0 : i32
    return %arg0, %c0_i32 : i32, i32
  }
}

</mosaic_0001>

<bundles_post_ra>
// kernel: tpu_custom_call.1
= control target key start
LH: loop header
LB: loop body
LE: loop exit
PB: predicated region body
PF: predicated region fallthrough
CT: control target
= control target key end

     0   :  { %17 = vsyncpa [#allocation5], 0  ;;  %s11612_s0 = inlined_call_operand.vmem [shape: bf16[21,16,8], index: 0, kind: input, shape index: {}]   ;;  %s11613_s1 = inlined_call_operand.vmem [shape: bf16[8,128], index: 1, kind: input, shape index: {}]   ;;  %s11614_s2 = inlined_call_operand.vmem [shape: f32[1,128], index: 2, kind: input, shape index: {}]   ;;  %s11615_s3 = inlined_call_operand.hbm [shape: bf16[5,128,128], index: 3, kind: input, shape index: {}]   ;;  %s11616_s4 = inlined_call_operand.vmem [shape: f32[1,128], index: 4, kind: input, shape index: {}]   ;;  %s11617_s5 = inlined_call_operand.hbm [shape: bf16[5,128,128], index: 5, kind: input, shape index: {}]   ;;  %s11618_s6 = inlined_call_operand.vmem [shape: f32[1,128], index: 6, kind: input, shape index: {}]   ;;  %s11619_s7 = inlined_call_operand.hbm [shape: bf16[21,128,128], index: 7, kind: input, shape index: {}]   ;;  %s11620_s8 = inlined_call_operand.vmem [shape: f32[1,128], index: 8, kind: input, shape index: {}]   ;;  %s11621_s9 = inlined_call_operand.vmem [shape: f32[1,128], index: 9, kind: input, shape index: {}]   ;;  %s11622_s10 = inlined_call_operand.<no memory space> [shape: f32[1], index: 10, kind: input, shape index: {}]   ;;  %s11623_s11 = inlined_call_operand.vmem [shape: f32[16,1], index: 11, kind: output, shape index: {}]  }
   0x1   :  { %18 = vsyncpa [#allocation7], 0  ;;  %s9015_s17 = smov [#allocation6]   ;;  %s9016_s19 = smov [#allocation4]  }
   0x2   :  { %s44_s18 = sshll.u32 %s9015_s17, 4  ;;  %s30_s20 = sshll.u32 %s9016_s19, 4  ;;  %s45_s18 = int_to_ptr.vmem [resolvable:$true] %s44_s18  ;;  %s9083_s20 = int_to_ptr.vmem [resolvable:$true] %s30_s20 }
   0x3   :  { %s8945_s23 = scalar_lea.hbm %s11617_s5, 5120 }
   0x4   :  { %p8946_p0 = scmp.ne.s32.totalorder %s11617_s5, %s8945_s23  ;;  %p8949_p1 = scmp.lt.u32.totalorder %s8945_s23, %s11617_s5 }
   0x6   :  { %p8951_p2 = pnand %p8949_p1, %p8946_p0 }
   0x8   :  { %8954 = shalt.err (!%p8951_p2)
}
   0x9   :  { %s8955_s28 = scalar_lea.vmem %s45_s18, 5120  ;;  %p8960_p4 = scmp.lt.s32.totalorder %s45_s18, %s45_s18 }
   0xa   :  { %p8956_p3 = scmp.ne.s32.totalorder %s45_s18, %s8955_s28  ;;  %p8961_p5 = scmp.lt.s32.totalorder %s8955_s28, %s8955_s28 }
   0xc   :  { %p8962_p6 = por %p8961_p5, %p8960_p4 }
   0xe   :  { %p8963_p7 = pnand %p8962_p6, %p8956_p3 }
  0x10   :  { %8966 = shalt.err (!%p8963_p7)
}
  0x11   :  { %s9017_s29 = smov 64   ;;  %s9018_s30 = smov 4  }
  0x12   :  { %50 = dma.hbm_to_vmem [thread:$0]  %s11617_s5, 5120, %s45_s18, [#allocation7], %s9017_s29, %s9017_s29, %s9018_s30  }
  0x13   :  { %s8967_s16 = scalar_lea.hbm %s11615_s3, 5120 }
  0x14   :  { %p8968_p8 = scmp.ne.s32.totalorder %s11615_s3, %s8967_s16  ;;  %p8971_p9 = scmp.lt.u32.totalorder %s8967_s16, %s11615_s3 }
  0x16   :  { %p8973_p10 = pnand %p8971_p9, %p8968_p8 }
  0x18   :  { %8976 = shalt.err (!%p8973_p10)
}
  0x19   :  { %s8977_s23 = scalar_lea.vmem %s9083_s20, 5120  ;;  %p8982_p12 = scmp.lt.s32.totalorder %s9083_s20, %s9083_s20 }
  0x1a   :  { %p8978_p11 = scmp.ne.s32.totalorder %s9083_s20, %s8977_s23  ;;  %p8983_p13 = scmp.lt.s32.totalorder %s8977_s23, %s8977_s23 }
  0x1c   :  { %p8984_p0 = por %p8983_p13, %p8982_p12 }
  0x1e   :  { %p8985_p1 = pnand %p8984_p0, %p8978_p11 }
  0x20   :  { %8988 = shalt.err (!%p8985_p1)
}
  0x21   :  { %36 = dma.hbm_to_vmem [thread:$0]  %s11615_s3, 5120, %s9083_s20, [#allocation5], %s9017_s29, %s9017_s29, %s9018_s30  }
  0x22   :  { %s9019_s24 = smov [#allocation8]   ;;  %s8989_s28 = scalar_lea.hbm %s11619_s7, 21504 }
  0x23   :  { %s58_s25 = sshll.u32 %s9019_s24, 4  ;;  %p8990_p2 = scmp.ne.s32.totalorder %s11619_s7, %s8989_s28  ;;  %s59_s25 = int_to_ptr.vmem [resolvable:$true] %s58_s25 }
  0x24   :  { %p8993_p3 = scmp.lt.u32.totalorder %s8989_s28, %s11619_s7 }
  0x26   :  { %p8995_p4 = pnand %p8993_p3, %p8990_p2 }
  0x28   :  { %8998 = shalt.err (!%p8995_p4)
}
  0x29   :  { %s8999_s16 = scalar_lea.vmem %s59_s25, 21504  ;;  %p9004_p6 = scmp.lt.s32.totalorder %s59_s25, %s59_s25 }
  0x2a   :  { %p9000_p5 = scmp.ne.s32.totalorder %s59_s25, %s8999_s16  ;;  %p9005_p7 = scmp.lt.s32.totalorder %s8999_s16, %s8999_s16 }
  0x2c   :  { %p9006_p8 = por %p9005_p7, %p9004_p6 }
  0x2e   :  { %p9007_p9 = pnand %p9006_p8, %p9000_p5 }
  0x30   :  { %9010 = shalt.err (!%p9007_p9)
}
  0x31   :  { %64 = dma.hbm_to_vmem [thread:$0]  %s11619_s7, 21504, %s59_s25, [#allocation7], %s9017_s29, %s9017_s29, %s9018_s30  }
  0x32   :  { %9011 = dma.done.wait [#allocation5], 5120  }
  0x33   :  { %9012 = vsyncadd [#allocation5], 4294962176 }
  0x34   :  { %9013 = dma.done.wait [#allocation7], 26624  }
  0x35   :  { %9014 = vsyncadd [#allocation7], 4294940672  ;;  %v11669_v0 = vmov 0.0   ;;  %vm9021_vm0 = vmmov 0   ;;  %vm304_vm1 = vcmask 1043456   ;;  %v8666_v3 = vld [vmem:[%s11612_s0] sm:$0xff]  }
  0x36   :  { %7152 = vmatprep.subr.bf16.mxu0 %v11669_v0  ;;  %7154 = vmatprep.mubr.msk.bf16.mxu0 %vm9021_vm0, %v11669_v0  ;;  %v127_v1 = vld [vmem:[%s11613_s1] sm:$0xf]  ;;  %vm240_vm2 = vcmask 64512   ;;  %v8667_v4 = vld [vmem:[%s11612_s0 + $0x8] sm:$0xff]   ;;  %v8668_v5 = vld [vmem:[%s11612_s0 + $0x10] sm:$0xff]   ;;  %v11658_v27 = vmov 0  }
  0x37   :  { %7238 = vmatprep.subr.bf16.mxu1 %v11669_v0  ;;  %7254 = vmatprep.mubr.msk.bf16.mxu1 %vm9021_vm0, %v11669_v0  ;;  %v306_v2 = vsel %vm304_vm1, %v127_v1, 0  ;;  %v8669_v6 = vld [vmem:[%s11612_s0 + $0x18] sm:$0xff]   ;;  %v8686_v7 = vld [vmem:[#allocation4] sm:$0xff]   ;;  %v8687_v9 = vld [vmem:[#allocation4 + $0x8] sm:$0xff]   ;;  %vm6347_vm3 = vcmask 7168  }
  0x38   :  { %7153 = vmatpush3.bf16.msra.mxu0 %v306_v2  ;;  %v8688_v8 = vld [vmem:[#allocation4 + $0x40] sm:$0xff]   ;;  %v8690_v10 = vld [vmem:[#allocation4 + $0x48] sm:$0xff]   ;;  %v8689_v12 = vld [vmem:[#allocation4 + $0x10] sm:$0xff]  }
  0x39   :  { %7338 = vmatprep.subr.bf16.mxu0 %v11669_v0  ;;  %7239 = vmatpush3.bf16.msra.mxu1 %v8688_v8  ;;  %v8670_v11 = vld [vmem:[%s11612_s0 + $0x20] sm:$0xff]   ;;  %v8692_v13 = vld [vmem:[#allocation4 + $0x50] sm:$0xff]   ;;  %v8691_v14 = vld [vmem:[#allocation4 + $0x18] sm:$0xff]  }
  0x3a   :  { %7240 = vmatprep.subr.bf16.mxu1 %v11669_v0  ;;  %v8694_v15 = vld [vmem:[#allocation4 + $0x58] sm:$0xff]   ;;  %v8671_v16 = vld [vmem:[%s11612_s0 + $0x28] sm:$0xff]   ;;  %v8693_v17 = vld [vmem:[#allocation4 + $0x20] sm:$0xff]  }
  0x3b   :  { %7155 = vmatmul.mubr.msk.bf16.vlgmr.msra.gmra.mrb[0].mxu0 %vm240_vm2, %v8666_v3  ;;  %v8696_v18 = vld [vmem:[#allocation4 + $0x60] sm:$0xff]   ;;  %v8695_v19 = vld [vmem:[#allocation4 + $0x28] sm:$0xff]   ;;  %v8672_v21 = vld [vmem:[%s11612_s0 + $0x30] sm:$0xff]  }
  0x3c   :  { %7158 = vmatprep.mubr.msk.bf16.mxu0 %vm9021_vm0, %v11669_v0  ;;  %7339 = vmatpush3.bf16.msra.mxu0 %v8686_v7  ;;  %v8699_v20 = vld [vmem:[#allocation4 + $0x68] sm:$0xff]   ;;  %v8698_v22 = vld [vmem:[#allocation4 + $0x30] sm:$0xff]   ;;  %v8700_v24 = vld [vmem:[#allocation4 + $0x38] sm:$0xff]  }
  0x3d   :  { %7340 = vmatprep.subr.bf16.mxu0 %v11669_v0  ;;  %7241 = vmatpush3.bf16.msra.mxu1 %v8690_v10  ;;  %v8701_v23 = vld [vmem:[#allocation4 + $0x70] sm:$0xff]   ;;  %v8702_v25 = vld [vmem:[#allocation4 + $0x78] sm:$0xff]   ;;  %v8674_v28 = vld [vmem:[%s11612_s0 + $0x40] sm:$0xff]  }
  0x3e   :  { %7242 = vmatprep.subr.bf16.mxu1 %v11669_v0  ;;  %v8673_v26 = vld [vmem:[%s11612_s0 + $0x38] sm:$0xff]   ;;  %v8675_v29 = vld [vmem:[%s11612_s0 + $0x48] sm:$0xff]   ;;  %v8676_v30 = vld [vmem:[%s11612_s0 + $0x50] sm:$0xff]  }
  0x3f   :  { %v8677_v31 = vld [vmem:[%s11612_s0 + $0x58] sm:$0xff]   ;;  %v8703_v32 = vld [vmem:[#allocation4 + $0x80] sm:$0xff]   ;;  %v8679_v34 = vld [vmem:[%s11612_s0 + $0x68] sm:$0xff]  }
  0x40   :  { %7341 = vmatpush3.bf16.msra.mxu0 %v8687_v9  ;;  %v8678_v33 = vld [vmem:[%s11612_s0 + $0x60] sm:$0xff]   ;;  %v8680_v35 = vld [vmem:[%s11612_s0 + $0x70] sm:$0xff]   ;;  %v8704_v36 = vld [vmem:[#allocation4 + $0x88] sm:$0xff]  }
  0x41   :  { %7342 = vmatprep.subr.bf16.mxu0 %v11669_v0  ;;  %7243 = vmatpush3.bf16.msra.mxu1 %v8692_v13  ;;  %v8681_v37 = vld [vmem:[%s11612_s0 + $0x78] sm:$0xff]   ;;  %v8682_v38 = vld [vmem:[%s11612_s0 + $0x80] sm:$0xff]   ;;  %v8683_v39 = vld [vmem:[%s11612_s0 + $0x88] sm:$0xff]  }
  0x42   :  { %7244 = vmatprep.subr.bf16.mxu1 %v11669_v0  ;;  %v8705_v40 = vld [vmem:[#allocation4 + $0x90] sm:$0xff]   ;;  %v8685_v42 = vld [vmem:[%s11612_s0 + $0x98] sm:$0xff]   ;;  %v8697_v44 = vld [vmem:[%s11612_s0 + $0xa0] sm:$0xff]  }
  0x43   :  { %7159 = vmatmul.mubr.msk.bf16.gmra.mrb[4].mxu0 %vm240_vm2, %v8667_v4  ;;  %v8684_v41 = vld [vmem:[%s11612_s0 + $0x90] sm:$0xff]   ;;  %v8706_v43 = vld [vmem:[#allocation4 + $0x98] sm:$0xff]   ;;  %v8707_v45 = vld [vmem:[#allocation4 + $0xa0] sm:$0xff]  }
  0x44   :  { %7162 = vmatprep.mubr.msk.bf16.mxu0 %vm9021_vm0, %v11669_v0  ;;  %7343 = vmatpush3.bf16.msra.mxu0 %v8689_v12  ;;  %v8708_v46 = vld [vmem:[#allocation4 + $0xa8] sm:$0xff]   ;;  %v9305_v47 = vld [vmem:[%s11614_s2] ss:$0 sm:$0xff]  ;;  %v8709_v48 = vld [vmem:[#allocation4 + $0xb0] sm:$0xff]  }
  0x45   :  { %7344 = vmatprep.subr.bf16.mxu0 %v11669_v0  ;;  %7245 = vmatpush3.bf16.msra.mxu1 %v8694_v15  ;;  %v8710_v50 = vld [vmem:[#allocation4 + $0xc0] sm:$0xff]   ;;  %v8711_v56 = vld [vmem:[#allocation4 + $0xc8] sm:$0xff]   ;;  %v8712_v61 = vld [vmem:[#allocation4 + $0xd0] sm:$0xff]  }
  0x46   :  { %7246 = vmatprep.subr.bf16.mxu1 %v11669_v0  ;;  %v8713_v4 = vld [vmem:[#allocation4 + $0xd8] sm:$0xff]   ;;  %v8714_v9 = vld [vmem:[#allocation4 + $0xe0] sm:$0xff]   ;;  %v8716_v15 = vld [vmem:[#allocation4 + $0xe8] sm:$0xff]  }
  0x48   :  { %7345 = vmatpush3.bf16.msra.mxu0 %v8691_v14 }
  0x49   :  { %7346 = vmatprep.subr.bf16.mxu0 %v11669_v0  ;;  %7247 = vmatpush3.bf16.msra.mxu1 %v8696_v18 }
  0x4a   :  { %7248 = vmatprep.subr.bf16.mxu1 %v11669_v0 }
  0x4b   :  { %7163 = vmatmul.mubr.msk.bf16.gmra.mrb[8].mxu0 %vm240_vm2, %v8668_v5 }
  0x4c   :  { %7166 = vmatprep.mubr.msk.bf16.mxu0 %vm9021_vm0, %v11669_v0  ;;  %7347 = vmatpush3.bf16.msra.mxu0 %v8693_v17 }
  0x4d   :  { %7348 = vmatprep.subr.bf16.mxu0 %v11669_v0  ;;  %7249 = vmatpush3.bf16.msra.mxu1 %v8699_v20 }
  0x4e   :  { %7250 = vmatprep.subr.bf16.mxu1 %v11669_v0 }
  0x50   :  { %7349 = vmatpush3.bf16.msra.mxu0 %v8695_v19  ;;  %v8715_v19 = vld [vmem:[#allocation4 + $0xb8] sm:$0xff]  }
  0x51   :  { %7350 = vmatprep.subr.bf16.mxu0 %v11669_v0  ;;  %7251 = vmatpush3.bf16.msra.mxu1 %v8701_v23 }
  0x52   :  { %7252 = vmatprep.subr.bf16.mxu1 %v11669_v0 }
  0x53   :  { %7167 = vmatmul.mubr.msk.bf16.gmra.mrb[12].mxu0 %vm240_vm2, %v8669_v6 }
  0x54   :  { %7170 = vmatprep.mubr.msk.bf16.mxu0 %vm9021_vm0, %v11669_v0  ;;  %7351 = vmatpush3.bf16.msra.mxu0 %v8698_v22 }
  0x55   :  { %7352 = vmatprep.subr.bf16.mxu0 %v11669_v0  ;;  %7253 = vmatpush3.bf16.msra.mxu1 %v8702_v25 }
  0x56   :  { %7438 = vmatprep.subr.bf16.mxu1 %v11669_v0 }
  0x58   :  { %7353 = vmatpush3.bf16.msra.mxu0 %v8700_v24  ;;  %7255 = vmatmul.mubr.bf16.vlgmr.msra.gmra.mrb[0].mxu1 %v11658_v27 }
  0x59   :  { %7538 = vmatprep.subr.bf16.mxu0 %v11669_v0  ;;  %7258 = vmatprep.mubr.msk.bf16.mxu1 %vm9021_vm0, %v11669_v0 }
  0x5a   :  { %7439 = vmatpush3.bf16.msra.mxu1 %v8703_v32 }
  0x5b   :  { %7171 = vmatmul.mubr.msk.bf16.gmra.mrb[16].mxu0 %vm240_vm2, %v8670_v11  ;;  %7440 = vmatprep.subr.bf16.mxu1 %v11669_v0 }
  0x5c   :  { %7174 = vmatprep.mubr.msk.bf16.mxu0 %vm9021_vm0, %v11669_v0 }
  0x5e   :  { %7441 = vmatpush3.bf16.msra.mxu1 %v8704_v36 }
  0x5f   :  { %7442 = vmatprep.subr.bf16.mxu1 %v11669_v0 }
  0x62   :  { %7443 = vmatpush3.bf16.msra.mxu1 %v8705_v40 }
  0x63   :  { %7175 = vmatmul.mubr.msk.bf16.gmra.mrb[20].mxu0 %vm240_vm2, %v8671_v16  ;;  %7444 = vmatprep.subr.bf16.mxu1 %v11669_v0 }
  0x64   :  { %7178 = vmatprep.mubr.msk.bf16.mxu0 %vm9021_vm0, %v11669_v0 }
  0x66   :  { %7445 = vmatpush3.bf16.msra.mxu1 %v8706_v43 }
  0x67   :  { %7446 = vmatprep.subr.bf16.mxu1 %v11669_v0 }
  0x6a   :  { %7447 = vmatpush3.bf16.msra.mxu1 %v8707_v45 }
  0x6b   :  { %7179 = vmatmul.mubr.msk.bf16.gmra.mrb[24].mxu0 %vm240_vm2, %v8672_v21  ;;  %7448 = vmatprep.subr.bf16.mxu1 %v11669_v0  ;;  %v8717_v21 = vld [vmem:[#allocation4 + $0xf0] sm:$0xff]  }
  0x6c   :  { %7182 = vmatprep.mubr.msk.bf16.mxu0 %vm9021_vm0, %v11669_v0 }
  0x6e   :  { %7449 = vmatpush3.bf16.msra.mxu1 %v8708_v46 }
  0x6f   :  { %7450 = vmatprep.subr.bf16.mxu1 %v11669_v0 }
  0x72   :  { %7451 = vmatpush3.bf16.msra.mxu1 %v8709_v48 }
  0x73   :  { %7183 = vmatmul.mubr.msk.bf16.gmra.mrb[28].mxu0 %vm240_vm2, %v8673_v26  ;;  %7452 = vmatprep.subr.bf16.mxu1 %v11669_v0 }
  0x74   :  { %7186 = vmatprep.mubr.msk.bf16.mxu0 %vm9021_vm0, %v11669_v0 }
  0x76   :  { %7453 = vmatpush3.bf16.msra.mxu1 %v8715_v19 }
  0x77   :  { %7638 = vmatprep.subr.bf16.mxu1 %v11669_v0 }
  0x7b   :  { %7187 = vmatmul.mubr.msk.bf16.gmra.mrb[32].mxu0 %vm240_vm2, %v8674_v28  ;;  %v8718_v28 = vld [vmem:[#allocation4 + $0xf8] sm:$0xff]  }
  0x7c   :  { %7190 = vmatprep.mubr.msk.bf16.mxu0 %vm9021_vm0, %v11669_v0 }
  0x83   :  { %7191 = vmatmul.mubr.msk.bf16.gmra.mrb[36].mxu0 %vm240_vm2, %v8675_v29 }
  0x84   :  { %7194 = vmatprep.mubr.msk.bf16.mxu0 %vm9021_vm0, %v11669_v0 }
  0x8b   :  { %7195 = vmatmul.mubr.msk.bf16.gmra.mrb[40].mxu0 %vm240_vm2, %v8676_v30 }
  0x8c   :  { %7198 = vmatprep.mubr.msk.bf16.mxu0 %vm9021_vm0, %v11669_v0 }
  0x93   :  { %7199 = vmatmul.mubr.msk.bf16.gmra.mrb[44].mxu0 %vm240_vm2, %v8677_v31 }
  0x94   :  { %7202 = vmatprep.mubr.msk.bf16.mxu0 %vm9021_vm0, %v11669_v0 }
  0x9b   :  { %7203 = vmatmul.mubr.msk.bf16.gmra.mrb[48].mxu0 %vm240_vm2, %v8678_v33 }
  0x9c   :  { %7206 = vmatprep.mubr.msk.bf16.mxu0 %vm9021_vm0, %v11669_v0 }
  0xa3   :  { %7207 = vmatmul.mubr.msk.bf16.gmra.mrb[52].mxu0 %vm240_vm2, %v8679_v34 }
  0xa4   :  { %7210 = vmatprep.mubr.msk.bf16.mxu0 %vm9021_vm0, %v11669_v0 }
  0xab   :  { %7211 = vmatmul.mubr.msk.bf16.gmra.mrb[56].mxu0 %vm240_vm2, %v8680_v35 }
  0xac   :  { %7214 = vmatprep.mubr.msk.bf16.mxu0 %vm9021_vm0, %v11669_v0 }
  0xb3   :  { %7215 = vmatmul.mubr.msk.bf16.gmra.mrb[60].mxu0 %vm240_vm2, %v8681_v37 }
  0xb4   :  { %7218 = vmatprep.mubr.msk.bf16.mxu0 %vm9021_vm0, %v11669_v0 }
  0xbb   :  { %7219 = vmatmul.mubr.msk.bf16.gmra.mrb[64].mxu0 %vm240_vm2, %v8682_v38 }
  0xbc   :  { %7222 = vmatprep.mubr.msk.bf16.mxu0 %vm9021_vm0, %v11669_v0 }
  0xc3   :  { %7223 = vmatmul.mubr.msk.bf16.gmra.mrb[68].mxu0 %vm240_vm2, %v8683_v39 }
  0xc4   :  { %7226 = vmatprep.mubr.msk.bf16.mxu0 %vm9021_vm0, %v11669_v0 }
  0xcb   :  { %7227 = vmatmul.mubr.msk.bf16.gmra.mrb[72].mxu0 %vm240_vm2, %v8684_v41 }
  0xcc   :  { %7230 = vmatprep.mubr.msk.bf16.mxu0 %vm9021_vm0, %v11669_v0 }
  0xd3   :  { %7231 = vmatmul.mubr.msk.bf16.gmra.mrb[76].mxu0 %vm240_vm2, %v8685_v42 }
  0xd4   :  { %7234 = vmatprep.mubr.msk.bf16.mxu0 %vm9021_vm0, %v11669_v0 }
  0xdb   :  { %7235 = vmatmul.mubr.msk.bf16.gmra.mrb[80].mxu0 %vm240_vm2, %v8697_v44 }
  0xdc   :  { %7354 = vmatprep.mubr.msk.bf16.mxu0 %vm9021_vm0, %v11669_v0 }
  0xe3   :  { %7355 = vmatmul.mubr.bf16.vlgmr.msra.gmra.mrb[84].mxu0 %v11658_v27 }
  0xe4   :  { %7358 = vmatprep.mubr.msk.bf16.mxu0 %vm9021_vm0, %v11669_v0  ;;  %7539 = vmatpush3.bf16.msra.mxu0 %v8710_v50 }
  0xe5   :  { %7540 = vmatprep.subr.bf16.mxu0 %v11669_v0 }
  0xe8   :  { %7541 = vmatpush3.bf16.msra.mxu0 %v8711_v56 }
  0xe9   :  { %7542 = vmatprep.subr.bf16.mxu0 %v11669_v0 }
  0xeb   :  { %7359 = vmatmul.mubr.bf16.gmra.mrb[88].mxu0 %v11658_v27 }
  0xec   :  { %7362 = vmatprep.mubr.msk.bf16.mxu0 %vm9021_vm0, %v11669_v0  ;;  %7543 = vmatpush3.bf16.msra.mxu0 %v8712_v61 }
  0xed   :  { %7544 = vmatprep.subr.bf16.mxu0 %v11669_v0 }
  0xf0   :  { %7545 = vmatpush3.bf16.msra.mxu0 %v8713_v4 }
  0xf1   :  { %7546 = vmatprep.subr.bf16.mxu0 %v11669_v0 }
  0xf4   :  { %7547 = vmatpush3.bf16.msra.mxu0 %v8714_v9 }
  0xf5   :  { %7548 = vmatprep.subr.bf16.mxu0 %v11669_v0 }
  0xf8   :  { %7549 = vmatpush3.bf16.msra.mxu0 %v8716_v15 }
  0xf9   :  { %7550 = vmatprep.subr.bf16.mxu0 %v11669_v0 }
  0xfc   :  { %7551 = vmatpush3.bf16.msra.mxu0 %v8717_v21 }
  0xfd   :  { %7552 = vmatprep.subr.bf16.mxu0 %v11669_v0 }
 0x100   :  { %7553 = vmatpush3.bf16.msra.mxu0 %v8718_v28 }
 0x101   :  { %7738 = vmatprep.subr.bf16.mxu0 %v11669_v0 }
 0x10e   :  { %v342_v49 = vpop.f32.mrb[0].mxu0 }
 0x10f   :  { %v9308_v51 = vadd.f32 %v9305_v47, %v342_v49  ;;  %v7156_v52 = vpop.f32.mrb[1].mxu0 }
 0x110   :  { %v345_v53 = vpop.f32.mrb[2].mxu0 }
 0x111   :  { %11755 = vst [vmem:[#allocation11_spill] sm:$0xff] %v9308_v51  ;;  %v9312_v54 = vadd.f32 %v9305_v47, %v345_v53  ;;  %v7157_v55 = vpop.f32.mrb[3].mxu0  ;;  %v11657_v57 = vmax.f32 %v9308_v51, 0.0 }
 0x113   :  { %11756 = vst [vmem:[#allocation12_spill] sm:$0xff] %v9312_v54  ;;  %v11654_v58 = vmax.f32 %v9312_v54, 0.0 }
 0x115   :  { %v9321_v59 = vpack.c.bf16 %v11654_v58, %v11657_v57 }
 0x116   :  { %v350_v60 = vpop.f32.mrb[4].mxu0 }
 0x117   :  { %v9325_v62 = vadd.f32 %v9305_v47, %v350_v60  ;;  %v7160_v63 = vpop.f32.mrb[5].mxu0  ;;  %7259 = vmatmul.mubr.bf16.gmra.mrb[4].mxu1 %v9321_v59  ;;  %7363 = vmatmul.mubr.bf16.gmra.mrb[92].mxu0 %v9321_v59 }
 0x118   :  { %v353_v1 = vpop.f32.mrb[6].mxu0  ;;  %7262 = vmatprep.mubr.msk.bf16.mxu1 %vm9021_vm0, %v11669_v0  ;;  %7366 = vmatprep.mubr.msk.bf16.mxu0 %vm9021_vm0, %v11669_v0 }
 0x119   :  { %11757 = vst [vmem:[#allocation13_spill] sm:$0xff] %v9325_v62  ;;  %v9334_v2 = vadd.f32 %v9305_v47, %v353_v1  ;;  %v7161_v3 = vpop.f32.mrb[7].mxu0  ;;  %v11653_v5 = vmax.f32 %v9325_v62, 0.0 }
 0x11b   :  { %11758 = vst [vmem:[#allocation14_spill] sm:$0xff] %v9334_v2  ;;  %v11652_v6 = vmax.f32 %v9334_v2, 0.0 }
 0x11d   :  { %v9343_v7 = vpack.c.bf16 %v11652_v6, %v11653_v5 }
 0x11e   :  { %v358_v8 = vpop.f32.mrb[8].mxu0 }
 0x11f   :  { %v9347_v10 = vadd.f32 %v9305_v47, %v358_v8  ;;  %v7164_v11 = vpop.f32.mrb[9].mxu0  ;;  %7263 = vmatmul.mubr.bf16.gmra.mrb[8].mxu1 %v9343_v7  ;;  %7367 = vmatmul.mubr.bf16.gmra.mrb[96].mxu0 %v9343_v7 }
 0x120   :  { %v361_v12 = vpop.f32.mrb[10].mxu0  ;;  %7266 = vmatprep.mubr.msk.bf16.mxu1 %vm9021_vm0, %v11669_v0  ;;  %7370 = vmatprep.mubr.msk.bf16.mxu0 %vm9021_vm0, %v11669_v0 }
 0x121   :  { %11759 = vst [vmem:[#allocation15_spill] sm:$0xff] %v9347_v10  ;;  %v9356_v13 = vadd.f32 %v9305_v47, %v361_v12  ;;  %v7165_v14 = vpop.f32.mrb[11].mxu0  ;;  %v11649_v16 = vmax.f32 %v9347_v10, 0.0 }
 0x123   :  { %11760 = vst [vmem:[#allocation16_spill] sm:$0xff] %v9356_v13  ;;  %v11648_v17 = vmax.f32 %v9356_v13, 0.0 }
 0x125   :  { %v9365_v18 = vpack.c.bf16 %v11648_v17, %v11649_v16 }
 0x126   :  { %v366_v20 = vpop.f32.mrb[12].mxu0 }
 0x127   :  { %v9369_v22 = vadd.f32 %v9305_v47, %v366_v20  ;;  %v7168_v23 = vpop.f32.mrb[13].mxu0  ;;  %7267 = vmatmul.mubr.bf16.gmra.mrb[12].mxu1 %v9365_v18  ;;  %7371 = vmatmul.mubr.bf16.gmra.mrb[100].mxu0 %v9365_v18 }
 0x128   :  { %v369_v24 = vpop.f32.mrb[14].mxu0  ;;  %7270 = vmatprep.mubr.msk.bf16.mxu1 %vm9021_vm0, %v11669_v0  ;;  %7374 = vmatprep.mubr.msk.bf16.mxu0 %vm9021_vm0, %v11669_v0 }
 0x129   :  { %11761 = vst [vmem:[#allocation17_spill] sm:$0xff] %v9369_v22  ;;  %v9378_v25 = vadd.f32 %v9305_v47, %v369_v24  ;;  %v7169_v26 = vpop.f32.mrb[15].mxu0  ;;  %v11647_v29 = vmax.f32 %v9369_v22, 0.0 }
 0x12b   :  { %11762 = vst [vmem:[#allocation18_spill] sm:$0xff] %v9378_v25  ;;  %v11644_v30 = vmax.f32 %v9378_v25, 0.0 }
 0x12d   :  { %v9388_v31 = vpack.c.bf16 %v11644_v30, %v11647_v29 }
 0x12e   :  { %v374_v32 = vpop.f32.mrb[16].mxu0 }
 0x12f   :  { %v9392_v33 = vadd.f32 %v9305_v47, %v374_v32  ;;  %v7172_v34 = vpop.f32.mrb[17].mxu0  ;;  %7271 = vmatmul.mubr.bf16.gmra.mrb[16].mxu1 %v9388_v31  ;;  %7375 = vmatmul.mubr.bf16.gmra.mrb[104].mxu0 %v9388_v31 }
 0x130   :  { %v377_v35 = vpop.f32.mrb[18].mxu0  ;;  %7274 = vmatprep.mubr.msk.bf16.mxu1 %vm9021_vm0, %v11669_v0  ;;  %7378 = vmatprep.mubr.msk.bf16.mxu0 %vm9021_vm0, %v11669_v0 }
 0x131   :  { %11763 = vst [vmem:[#allocation19_spill] sm:$0xff] %v9392_v33  ;;  %v9401_v36 = vadd.f32 %v9305_v47, %v377_v35  ;;  %v7173_v37 = vpop.f32.mrb[19].mxu0  ;;  %v11643_v38 = vmax.f32 %v9392_v33, 0.0 }
 0x133   :  { %11764 = vst [vmem:[#allocation20_spill] sm:$0xff] %v9401_v36  ;;  %v11642_v39 = vmax.f32 %v9401_v36, 0.0 }
 0x135   :  { %v9409_v40 = vpack.c.bf16 %v11642_v39, %v11643_v38 }
 0x136   :  { %v382_v41 = vpop.f32.mrb[20].mxu0 }
 0x137   :  { %v9412_v42 = vadd.f32 %v9305_v47, %v382_v41  ;;  %v7176_v43 = vpop.f32.mrb[21].mxu0  ;;  %7275 = vmatmul.mubr.bf16.gmra.mrb[20].mxu1 %v9409_v40  ;;  %7379 = vmatmul.mubr.bf16.gmra.mrb[108].mxu0 %v9409_v40 }
 0x138   :  { %v385_v44 = vpop.f32.mrb[22].mxu0  ;;  %7278 = vmatprep.mubr.msk.bf16.mxu1 %vm9021_vm0, %v11669_v0  ;;  %7382 = vmatprep.mubr.msk.bf16.mxu0 %vm9021_vm0, %v11669_v0 }
 0x139   :  { %11765 = vst [vmem:[#allocation21_spill] sm:$0xff] %v9412_v42  ;;  %v9421_v45 = vadd.f32 %v9305_v47, %v385_v44  ;;  %v7177_v46 = vpop.f32.mrb[23].mxu0  ;;  %v11639_v48 = vmax.f32 %v9412_v42, 0.0  ;;  %v8729_v42 = vld [vmem:[#allocation6 + $0x50] sm:$0xff]  }
 0x13b   :  { %11766 = vst [vmem:[#allocation22_spill] sm:$0xff] %v9421_v45  ;;  %v11638_v49 = vmax.f32 %v9421_v45, 0.0 }
 0x13d   :  { %v9429_v50 = vpack.c.bf16 %v11638_v49, %v11639_v48 }
 0x13e   :  { %v390_v52 = vpop.f32.mrb[24].mxu0 }
 0x13f   :  { %v9432_v53 = vadd.f32 %v9305_v47, %v390_v52  ;;  %v7180_v55 = vpop.f32.mrb[25].mxu0  ;;  %7279 = vmatmul.mubr.bf16.gmra.mrb[24].mxu1 %v9429_v50  ;;  %7383 = vmatmul.mubr.bf16.gmra.mrb[112].mxu0 %v9429_v50  ;;  %v9500_v52 = vpop.f32.mrb[0].mxu1 }
 0x140   :  { %v393_v56 = vpop.f32.mrb[26].mxu0  ;;  %7282 = vmatprep.mubr.msk.bf16.mxu1 %vm9021_vm0, %v11669_v0  ;;  %7386 = vmatprep.mubr.msk.bf16.mxu0 %vm9021_vm0, %v11669_v0 }
 0x141   :  { %11767 = vst [vmem:[#allocation23_spill] sm:$0xff] %v9432_v53  ;;  %v9441_v60 = vadd.f32 %v9305_v47, %v393_v56  ;;  %v7181_v61 = vpop.f32.mrb[27].mxu0  ;;  %v11637_v63 = vmax.f32 %v9432_v53, 0.0 }
 0x142   :  { %v7256_v61 = vpop.f32.mrb[1].mxu1 }
 0x143   :  { %11768 = vst [vmem:[#allocation24_spill] sm:$0xff] %v9441_v60  ;;  %v11634_v1 = vmax.f32 %v9441_v60, 0.0 }
 0x145   :  { %v9449_v3 = vpack.c.bf16 %v11634_v1, %v11637_v63 }
 0x146   :  { %v398_v4 = vpop.f32.mrb[28].mxu0 }
 0x147   :  { %v9452_v8 = vadd.f32 %v9305_v47, %v398_v4  ;;  %v7184_v9 = vpop.f32.mrb[29].mxu0  ;;  %7283 = vmatmul.mubr.bf16.gmra.mrb[28].mxu1 %v9449_v3  ;;  %7387 = vmatmul.mubr.bf16.gmra.mrb[116].mxu0 %v9449_v3 }
 0x148   :  { %v401_v11 = vpop.f32.mrb[30].mxu0  ;;  %7286 = vmatprep.mubr.msk.bf16.mxu1 %vm9021_vm0, %v11669_v0  ;;  %7390 = vmatprep.mubr.msk.bf16.mxu0 %vm9021_vm0, %v11669_v0 }
 0x149   :  { %11769 = vst [vmem:[#allocation25_spill] sm:$0xff] %v9452_v8  ;;  %v9461_v12 = vadd.f32 %v9305_v47, %v401_v11  ;;  %v7185_v14 = vpop.f32.mrb[31].mxu0  ;;  %v11633_v15 = vmax.f32 %v9452_v8, 0.0  ;;  %v8728_v8 = vld [vmem:[#allocation6 + $0x48] sm:$0xff]  }
 0x14b   :  { %11770 = vst [vmem:[#allocation26_spill] sm:$0xff] %v9461_v12  ;;  %v11632_v19 = vmax.f32 %v9461_v12, 0.0 }
 0x14d   :  { %v9469_v20 = vpack.c.bf16 %v11632_v19, %v11633_v15 }
 0x14e   :  { %v406_v21 = vpop.f32.mrb[32].mxu0 }
 0x14f   :  { %v9472_v23 = vadd.f32 %v9305_v47, %v406_v21  ;;  %v7188_v24 = vpop.f32.mrb[33].mxu0  ;;  %7287 = vmatmul.mubr.bf16.gmra.mrb[32].mxu1 %v9469_v20  ;;  %7391 = vmatmul.mubr.bf16.gmra.mrb[120].mxu0 %v9469_v20 }
 0x150   :  { %v409_v26 = vpop.f32.mrb[34].mxu0  ;;  %7290 = vmatprep.mubr.msk.bf16.mxu1 %vm9021_vm0, %v11669_v0  ;;  %7394 = vmatprep.mubr.msk.bf16.mxu0 %vm9021_vm0, %v11669_v0 }
 0x151   :  { %11771 = vst [vmem:[#allocation27_spill] sm:$0xff] %v9472_v23  ;;  %v9481_v28 = vadd.f32 %v9305_v47, %v409_v26  ;;  %v7189_v32 = vpop.f32.mrb[35].mxu0  ;;  %v11629_v34 = vmax.f32 %v9472_v23, 0.0  ;;  %v9518_v26 = vpop.f32.mrb[2].mxu1 }
 0x153   :  { %11772 = vst [vmem:[#allocation28_spill] sm:$0xff] %v9481_v28  ;;  %v11628_v35 = vmax.f32 %v9481_v28, 0.0 }
 0x155   :  { %v9489_v37 = vpack.c.bf16 %v11628_v35, %v11629_v34 }
 0x156   :  { %v414_v41 = vpop.f32.mrb[36].mxu0 }
 0x157   :  { %v9492_v43 = vadd.f32 %v9305_v47, %v414_v41  ;;  %v7192_v44 = vpop.f32.mrb[37].mxu0  ;;  %7291 = vmatmul.mubr.bf16.gmra.mrb[36].mxu1 %v9489_v37  ;;  %7395 = vmatmul.mubr.bf16.gmra.mrb[124].mxu0 %v9489_v37  ;;  %v7257_v41 = vpop.f32.mrb[3].mxu1 }
 0x158   :  { %v417_v46 = vpop.f32.mrb[38].mxu0  ;;  %7294 = vmatprep.mubr.msk.bf16.mxu1 %vm9021_vm0, %v11669_v0  ;;  %7398 = vmatprep.mubr.msk.bf16.mxu0 %vm9021_vm0, %v11669_v0 }
 0x159   :  { %11773 = vst [vmem:[#allocation29_spill] sm:$0xff] %v9492_v43  ;;  %v9503_v55 = vadd.f32 %v9305_v47, %v417_v46  ;;  %v7193_v56 = vpop.f32.mrb[39].mxu0  ;;  %v11625_v4 = vmax.f32 %v9492_v43, 0.0 }
 0x15b   :  { %11774 = vst [vmem:[#allocation30_spill] sm:$0xff] %v9503_v55  ;;  %v11624_v9 = vmax.f32 %v9503_v55, 0.0 }
 0x15d   :  { %v9511_v11 = vpack.c.bf16 %v11624_v9, %v11625_v4 }
 0x15e   :  { %v422_v14 = vpop.f32.mrb[40].mxu0 }
 0x15f   :  { %v9514_v21 = vadd.f32 %v9305_v47, %v422_v14  ;;  %v7196_v24 = vpop.f32.mrb[41].mxu0  ;;  %7295 = vmatmul.mubr.bf16.gmra.mrb[40].mxu1 %v9511_v11  ;;  %7399 = vmatmul.mubr.bf16.gmra.mrb[128].mxu0 %v9511_v11 }
 0x160   :  { %v425_v32 = vpop.f32.mrb[42].mxu0  ;;  %7298 = vmatprep.mubr.msk.bf16.mxu1 %vm9021_vm0, %v11669_v0  ;;  %7402 = vmatprep.mubr.msk.bf16.mxu0 %vm9021_vm0, %v11669_v0 }
 0x161   :  { %11775 = vst [vmem:[#allocation31_spill] sm:$0xff] %v9514_v21  ;;  %v9525_v44 = vadd.f32 %v9305_v47, %v425_v32  ;;  %v7197_v46 = vpop.f32.mrb[43].mxu0  ;;  %v11627_v56 = vmax.f32 %v9514_v21, 0.0  ;;  %v8727_v21 = vld [vmem:[#allocation6 + $0x40] sm:$0xff]  }
 0x163   :  { %11776 = vst [vmem:[#allocation32_spill] sm:$0xff] %v9525_v44  ;;  %v11626_v61 = vmax.f32 %v9525_v44, 0.0 }
 0x165   :  { %v9533_v14 = vpack.c.bf16 %v11626_v61, %v11627_v56 }
 0x166   :  { %v430_v24 = vpop.f32.mrb[44].mxu0 }
 0x167   :  { %v9536_v9 = vadd.f32 %v9305_v47, %v430_v24  ;;  %v7200_v4 = vpop.f32.mrb[45].mxu0  ;;  %7299 = vmatmul.mubr.bf16.gmra.mrb[44].mxu1 %v9533_v14  ;;  %7403 = vmatmul.mubr.bf16.gmra.mrb[132].mxu0 %v9533_v14 }
 0x168   :  { %v433_v32 = vpop.f32.mrb[46].mxu0  ;;  %7302 = vmatprep.mubr.msk.bf16.mxu1 %vm9021_vm0, %v11669_v0  ;;  %7406 = vmatprep.mubr.msk.bf16.mxu0 %vm9021_vm0, %v11669_v0 }
 0x169   :  { %11777 = vst [vmem:[#allocation33_spill] sm:$0xff] %v9536_v9  ;;  %v9545_v41 = vadd.f32 %v9305_v47, %v433_v32  ;;  %v7201_v46 = vpop.f32.mrb[47].mxu0  ;;  %v11631_v61 = vmax.f32 %v9536_v9, 0.0 }
 0x16b   :  { %11778 = vst [vmem:[#allocation34_spill] sm:$0xff] %v9545_v41  ;;  %v11630_v24 = vmax.f32 %v9545_v41, 0.0 }
 0x16d   :  { %v9553_v4 = vpack.c.bf16 %v11630_v24, %v11631_v61 }
 0x16e   :  { %v438_v56 = vpop.f32.mrb[48].mxu0 }
 0x16f   :  { %v9556_v35 = vadd.f32 %v9305_v47, %v438_v56  ;;  %v7204_v34 = vpop.f32.mrb[49].mxu0  ;;  %7303 = vmatmul.mubr.bf16.gmra.mrb[48].mxu1 %v9553_v4  ;;  %7407 = vmatmul.mubr.bf16.gmra.mrb[136].mxu0 %v9553_v4 }
 0x170   :  { %v441_v32 = vpop.f32.mrb[50].mxu0  ;;  %7306 = vmatprep.mubr.msk.bf16.mxu1 %vm9021_vm0, %v11669_v0  ;;  %7410 = vmatprep.mubr.msk.bf16.mxu0 %vm9021_vm0, %v11669_v0 }
 0x171   :  { %11779 = vst [vmem:[#allocation35_spill] sm:$0xff] %v9556_v35  ;;  %v9565_v46 = vadd.f32 %v9305_v47, %v441_v32  ;;  %v7205_v24 = vpop.f32.mrb[51].mxu0  ;;  %v11636_v61 = vmax.f32 %v9556_v35, 0.0 }
 0x173   :  { %11780 = vst [vmem:[#allocation36_spill] sm:$0xff] %v9565_v46  ;;  %v11635_v56 = vmax.f32 %v9565_v46, 0.0 }
 0x175   :  { %v9573_v34 = vpack.c.bf16 %v11635_v56, %v11636_v61 }
 0x176   :  { %v446_v19 = vpop.f32.mrb[52].mxu0 }
 0x177   :  { %v9576_v15 = vadd.f32 %v9305_v47, %v446_v19  ;;  %v7208_v1 = vpop.f32.mrb[53].mxu0  ;;  %7307 = vmatmul.mubr.bf16.gmra.mrb[52].mxu1 %v9573_v34  ;;  %7411 = vmatmul.mubr.bf16.gmra.mrb[140].mxu0 %v9573_v34 }
 0x178   :  { %v449_v24 = vpop.f32.mrb[54].mxu0  ;;  %7310 = vmatprep.mubr.msk.bf16.mxu1 %vm9021_vm0, %v11669_v0  ;;  %7414 = vmatprep.mubr.msk.bf16.mxu0 %vm9021_vm0, %v11669_v0 }
 0x179   :  { %11781 = vst [vmem:[#allocation37_spill] sm:$0xff] %v9576_v15  ;;  %v9585_v32 = vadd.f32 %v9305_v47, %v449_v24  ;;  %v7209_v56 = vpop.f32.mrb[55].mxu0  ;;  %v11641_v61 = vmax.f32 %v9576_v15, 0.0 }
 0x17b   :  { %11782 = vst [vmem:[#allocation38_spill] sm:$0xff] %v9585_v32  ;;  %v11640_v19 = vmax.f32 %v9585_v32, 0.0 }
 0x17d   :  { %v9593_v1 = vpack.c.bf16 %v11640_v19, %v11641_v61 }
 0x17e   :  { %v454_v63 = vpop.f32.mrb[56].mxu0 }
 0x17f   :  { %v9596_v49 = vadd.f32 %v9305_v47, %v454_v63  ;;  %v7212_v48 = vpop.f32.mrb[57].mxu0  ;;  %7311 = vmatmul.mubr.bf16.gmra.mrb[56].mxu1 %v9593_v1  ;;  %7415 = vmatmul.mubr.bf16.gmra.mrb[144].mxu0 %v9593_v1 }
 0x180   :  { %v457_v56 = vpop.f32.mrb[58].mxu0  ;;  %7314 = vmatprep.mubr.msk.bf16.mxu1 %vm9021_vm0, %v11669_v0  ;;  %7418 = vmatprep.mubr.msk.bf16.mxu0 %vm9021_vm0, %v11669_v0 }
 0x181   :  { %11783 = vst [vmem:[#allocation39_spill] sm:$0xff] %v9596_v49  ;;  %v9605_v24 = vadd.f32 %v9305_v47, %v457_v56  ;;  %v7213_v19 = vpop.f32.mrb[59].mxu0  ;;  %v11646_v61 = vmax.f32 %v9596_v49, 0.0 }
 0x183   :  { %11784 = vst [vmem:[#allocation40_spill] sm:$0xff] %v9605_v24  ;;  %v11645_v63 = vmax.f32 %v9605_v24, 0.0 }
 0x185   :  { %v9613_v48 = vpack.c.bf16 %v11645_v63, %v11646_v61 }
 0x186   :  { %v462_v39 = vpop.f32.mrb[60].mxu0 }
 0x187   :  { %v9616_v38 = vadd.f32 %v9305_v47, %v462_v39  ;;  %v7216_v30 = vpop.f32.mrb[61].mxu0  ;;  %7315 = vmatmul.mubr.bf16.gmra.mrb[60].mxu1 %v9613_v48  ;;  %7419 = vmatmul.mubr.bf16.gmra.mrb[148].mxu0 %v9613_v48 }
 0x188   :  { %v465_v19 = vpop.f32.mrb[62].mxu0  ;;  %7318 = vmatprep.mubr.msk.bf16.mxu1 %vm9021_vm0, %v11669_v0  ;;  %7422 = vmatprep.mubr.msk.bf16.mxu0 %vm9021_vm0, %v11669_v0 }
 0x189   :  { %11785 = vst [vmem:[#allocation41_spill] sm:$0xff] %v9616_v38  ;;  %v9625_v56 = vadd.f32 %v9305_v47, %v465_v19  ;;  %v7217_v63 = vpop.f32.mrb[63].mxu0  ;;  %v11651_v61 = vmax.f32 %v9616_v38, 0.0 }
 0x18b   :  { %11786 = vst [vmem:[#allocation42_spill] sm:$0xff] %v9625_v56  ;;  %v11650_v39 = vmax.f32 %v9625_v56, 0.0 }
 0x18d   :  { %v9633_v30 = vpack.c.bf16 %v11650_v39, %v11651_v61 }
 0x18e   :  { %v470_v29 = vpop.f32.mrb[64].mxu0 }
 0x18f   :  { %v9636_v17 = vadd.f32 %v9305_v47, %v470_v29  ;;  %v7220_v16 = vpop.f32.mrb[65].mxu0  ;;  %7319 = vmatmul.mubr.bf16.gmra.mrb[64].mxu1 %v9633_v30  ;;  %7423 = vmatmul.mubr.bf16.gmra.mrb[152].mxu0 %v9633_v30 }
 0x190   :  { %v473_v63 = vpop.f32.mrb[66].mxu0  ;;  %7322 = vmatprep.mubr.msk.bf16.mxu1 %vm9021_vm0, %v11669_v0  ;;  %7426 = vmatprep.mubr.msk.bf16.mxu0 %vm9021_vm0, %v11669_v0 }
 0x191   :  { %11787 = vst [vmem:[#allocation43_spill] sm:$0xff] %v9636_v17  ;;  %v9645_v19 = vadd.f32 %v9305_v47, %v473_v63  ;;  %v7221_v39 = vpop.f32.mrb[67].mxu0  ;;  %v11656_v61 = vmax.f32 %v9636_v17, 0.0 }
 0x193   :  { %11788 = vst [vmem:[#allocation44_spill] sm:$0xff] %v9645_v19  ;;  %v11655_v29 = vmax.f32 %v9645_v19, 0.0 }
 0x195   :  { %v9653_v16 = vpack.c.bf16 %v11655_v29, %v11656_v61 }
 0x196   :  { %v478_v6 = vpop.f32.mrb[68].mxu0 }
 0x197   :  { %v9656_v5 = vadd.f32 %v9305_v47, %v478_v6  ;;  %v7224_v58 = vpop.f32.mrb[69].mxu0  ;;  %7323 = vmatmul.mubr.bf16.gmra.mrb[68].mxu1 %v9653_v16  ;;  %7427 = vmatmul.mubr.bf16.gmra.mrb[156].mxu0 %v9653_v16 }
 0x198   :  { %v481_v39 = vpop.f32.mrb[70].mxu0  ;;  %7326 = vmatprep.mubr.msk.bf16.mxu1 %vm9021_vm0, %v11669_v0  ;;  %7430 = vmatprep.mubr.msk.bf16.mxu0 %vm9021_vm0, %v11669_v0 }
 0x199   :  { %11789 = vst [vmem:[#allocation45_spill] sm:$0xff] %v9656_v5  ;;  %v9665_v63 = vadd.f32 %v9305_v47, %v481_v39  ;;  %v7225_v29 = vpop.f32.mrb[71].mxu0  ;;  %v11662_v61 = vmax.f32 %v9656_v5, 0.0 }
 0x19b   :  { %11790 = vst [vmem:[#allocation46_spill] sm:$0xff] %v9665_v63  ;;  %v11661_v6 = vmax.f32 %v9665_v63, 0.0 }
 0x19d   :  { %v9673_v58 = vpack.c.bf16 %v11661_v6, %v11662_v61 }
 0x19e   :  { %v486_v57 = vpop.f32.mrb[72].mxu0 }
 0x19f   :  { %v9676_v27 = vadd.f32 %v9305_v47, %v486_v57  ;;  %v7228_v19 = vpop.f32.mrb[73].mxu0  ;;  %7327 = vmatmul.mubr.bf16.gmra.mrb[72].mxu1 %v9673_v58  ;;  %7431 = vmatmul.mubr.bf16.gmra.mrb[160].mxu0 %v9673_v58 }
 0x1a0   :  { %v489_v29 = vpop.f32.mrb[74].mxu0  ;;  %7330 = vmatprep.mubr.msk.bf16.mxu1 %vm9021_vm0, %v11669_v0  ;;  %7434 = vmatprep.mubr.msk.bf16.mxu0 %vm9021_vm0, %v11669_v0 }
 0x1a1   :  { %11791 = vst [vmem:[#allocation47_spill] sm:$0xff] %v9676_v27  ;;  %v9685_v39 = vadd.f32 %v9305_v47, %v489_v29  ;;  %v7229_v6 = vpop.f32.mrb[75].mxu0  ;;  %v11667_v61 = vmax.f32 %v9676_v27, 0.0 }
 0x1a3   :  { %11792 = vst [vmem:[#allocation48_spill] sm:$0xff] %v9685_v39  ;;  %v11666_v57 = vmax.f32 %v9685_v39, 0.0 }
 0x1a5   :  { %v9693_v19 = vpack.c.bf16 %v11666_v57, %v11667_v61 }
 0x1a6   :  { %v494_v63 = vpop.f32.mrb[76].mxu0 }
 0x1a7   :  { %v9696_v5 = vadd.f32 %v9305_v47, %v494_v63  ;;  %v7232_v17 = vpop.f32.mrb[77].mxu0  ;;  %7331 = vmatmul.mubr.bf16.gmra.mrb[76].mxu1 %v9693_v19  ;;  %7435 = vmatmul.mubr.bf16.gmra.mrb[164].mxu0 %v9693_v19 }
 0x1a8   :  { %v497_v6 = vpop.f32.mrb[78].mxu0  ;;  %7334 = vmatprep.mubr.msk.bf16.mxu1 %vm9021_vm0, %v11669_v0  ;;  %7554 = vmatprep.mubr.msk.bf16.mxu0 %vm9021_vm0, %v11669_v0 }
 0x1a9   :  { %11793 = vst [vmem:[#allocation49_spill] sm:$0xff] %v9696_v5  ;;  %v9705_v29 = vadd.f32 %v9305_v47, %v497_v6  ;;  %v7233_v57 = vpop.f32.mrb[79].mxu0  ;;  %v11674_v61 = vmax.f32 %v9696_v5, 0.0  ;;  %v11795_v47 = vmov 0.0   ;;  %v8719_v5 = vld [vmem:[#allocation4 + $0x100] sm:$0xff]  }
 0x1ab   :  { %11794 = vst [vmem:[#allocation50_spill] sm:$0xff] %v9705_v29  ;;  %v11673_v63 = vmax.f32 %v9705_v29, 0.0 }
 0x1ad   :  { %v9713_v17 = vpack.c.bf16 %v11673_v63, %v11674_v61 }
 0x1ae   :  { %v9715_v39 = vpop.f32.mrb[80].mxu0 }
 0x1af   :  { %7335 = vmatmul.mubr.bf16.gmra.mrb[80].mxu1 %v9713_v17  ;;  %7555 = vmatmul.mubr.bf16.vlgmr.msra.gmra.mrb[168].mxu0 %v9343_v7  ;;  %v7236_v0 = vpop.f32.mrb[81].mxu0 }
 0x1b0   :  { %7454 = vmatprep.mubr.msk.bf16.mxu1 %vm9021_vm0, %v11795_v47  ;;  %7558 = vmatprep.mubr.msk.bf16.mxu0 %vm9021_vm0, %v11795_v47  ;;  %v9723_v57 = vpop.f32.mrb[82].mxu0  ;;  %v8720_v0 = vld [vmem:[#allocation4 + $0x108] sm:$0xff]  }
 0x1b1   :  { %v7237_v6 = vpop.f32.mrb[83].mxu0  ;;  %7739 = vmatpush3.bf16.msra.mxu0 %v8727_v21 }
 0x1b2   :  { %7740 = vmatprep.subr.bf16.mxu0 %v11795_v47 }
 0x1b5   :  { %7741 = vmatpush3.bf16.msra.mxu0 %v8728_v8 }
 0x1b6   :  { %v979_v29 = vpop.f32.mrb[84].mxu0  ;;  %7742 = vmatprep.subr.bf16.mxu0 %v11795_v47 }
 0x1b7   :  { %7455 = vmatmul.mubr.bf16.vlgmr.msra.gmra.mrb[84].mxu1 %v9321_v59  ;;  %7559 = vmatmul.mubr.bf16.gmra.mrb[172].mxu0 %v9365_v18  ;;  %v9728_v63 = vadd.f32 %v979_v29, %v9500_v52  ;;  %v7356_v61 = vpop.f32.mrb[85].mxu0  ;;  %v8721_v52 = vld [vmem:[#allocation4 + $0x110] sm:$0xff]  }
 0x1b8   :  { %7639 = vmatpush3.bf16.msra.mxu1 %v8719_v5  ;;  %7458 = vmatprep.mubr.msk.bf16.mxu1 %vm9021_vm0, %v11795_v47  ;;  %v982_v27 = vpop.f32.mrb[86].mxu0 }
 0x1b9   :  { %7562 = vmatprep.mubr.msk.bf16.mxu0 %vm9021_vm0, %v11795_v47  ;;  %7640 = vmatprep.subr.bf16.mxu1 %v11795_v47  ;;  %v9736_v6 = vadd.f32 %v982_v27, %v9518_v26  ;;  %v7357_v59 = vpop.f32.mrb[87].mxu0  ;;  %v8722_v26 = vld [vmem:[#allocation4 + $0x118] sm:$0xff]  }
 0x1ba   :  { %v8725_v59 = vld [vmem:[#allocation4 + $0x130] sm:$0xff]   ;;  %7743 = vmatpush3.bf16.msra.mxu0 %v8729_v42 }
 0x1bb   :  { %7744 = vmatprep.subr.bf16.mxu0 %v11795_v47 }
 0x1bc   :  { %7641 = vmatpush3.bf16.msra.mxu1 %v8720_v0  ;;  %v8723_v0 = vld [vmem:[#allocation4 + $0x120] sm:$0xff]  }
 0x1bd   :  { %7642 = vmatprep.subr.bf16.mxu1 %v11795_v47 }
 0x1be   :  { %v987_v61 = vpop.f32.mrb[88].mxu0 }
 0x1bf   :  { %7459 = vmatmul.mubr.bf16.gmra.mrb[88].mxu1 %v9343_v7  ;;  %7563 = vmatmul.mubr.bf16.gmra.mrb[176].mxu0 %v9388_v31  ;;  %v7360_v5 = vpop.f32.mrb[89].mxu0  ;;  %v8724_v7 = vld [vmem:[#allocation4 + $0x128] sm:$0xff]  }
 0x1c0   :  { %7462 = vmatprep.mubr.msk.bf16.mxu1 %vm9021_vm0, %v11795_v47  ;;  %7566 = vmatprep.mubr.msk.bf16.mxu0 %vm9021_vm0, %v11795_v47  ;;  %v990_v29 = vpop.f32.mrb[90].mxu0 }
 0x1c1   :  { %7643 = vmatpush3.bf16.msra.mxu1 %v8721_v52  ;;  %v7361_v27 = vpop.f32.mrb[91].mxu0  ;;  %v8726_v52 = vld [vmem:[#allocation4 + $0x138] sm:$0xff]  }
 0x1c2   :  { %7644 = vmatprep.subr.bf16.mxu1 %v11795_v47 }
 0x1c5   :  { %7645 = vmatpush3.bf16.msra.mxu1 %v8722_v26 }
 0x1c6   :  { %7646 = vmatprep.subr.bf16.mxu1 %v11795_v47 }
 0x1c7   :  { %7463 = vmatmul.mubr.bf16.gmra.mrb[92].mxu1 %v9365_v18  ;;  %7567 = vmatmul.mubr.bf16.gmra.mrb[180].mxu0 %v9409_v40 }
 0x1c8   :  { %7466 = vmatprep.mubr.msk.bf16.mxu1 %vm9021_vm0, %v11795_v47  ;;  %7570 = vmatprep.mubr.msk.bf16.mxu0 %vm9021_vm0, %v11795_v47 }
 0x1c9   :  { %7647 = vmatpush3.bf16.msra.mxu1 %v8723_v0 }
 0x1ca   :  { %7648 = vmatprep.subr.bf16.mxu1 %v11795_v47 }
 0x1cd   :  { %7649 = vmatpush3.bf16.msra.mxu1 %v8724_v7 }
 0x1ce   :  { %7650 = vmatprep.subr.bf16.mxu1 %v11795_v47 }
 0x1cf   :  { %7467 = vmatmul.mubr.bf16.gmra.mrb[96].mxu1 %v9388_v31  ;;  %7571 = vmatmul.mubr.bf16.gmra.mrb[184].mxu0 %v9429_v50 }
 0x1d0   :  { %7470 = vmatprep.mubr.msk.bf16.mxu1 %vm9021_vm0, %v11795_v47  ;;  %7574 = vmatprep.mubr.msk.bf16.mxu0 %vm9021_vm0, %v11795_v47 }
 0x1d1   :  { %7651 = vmatpush3.bf16.msra.mxu1 %v8725_v59 }
 0x1d2   :  { %7652 = vmatprep.subr.bf16.mxu1 %v11795_v47 }
 0x1d5   :  { %7653 = vmatpush3.bf16.msra.mxu1 %v8726_v52 }
 0x1d6   :  { %7838 = vmatprep.subr.bf16.mxu1 %v11795_v47 }
 0x1d7   :  { %7471 = vmatmul.mubr.bf16.gmra.mrb[100].mxu1 %v9409_v40  ;;  %7575 = vmatmul.mubr.bf16.gmra.mrb[188].mxu0 %v9449_v3 }
 0x1d8   :  { %7474 = vmatprep.mubr.msk.bf16.mxu1 %vm9021_vm0, %v11795_v47  ;;  %7578 = vmatprep.mubr.msk.bf16.mxu0 %vm9021_vm0, %v11795_v47 }
 0x1df   :  { %7475 = vmatmul.mubr.bf16.gmra.mrb[104].mxu1 %v9429_v50  ;;  %7579 = vmatmul.mubr.bf16.gmra.mrb[192].mxu0 %v9469_v20 }
 0x1e0   :  { %7478 = vmatprep.mubr.msk.bf16.mxu1 %vm9021_vm0, %v11795_v47  ;;  %7582 = vmatprep.mubr.msk.bf16.mxu0 %vm9021_vm0, %v11795_v47 }
 0x1e7   :  { %7479 = vmatmul.mubr.bf16.gmra.mrb[108].mxu1 %v9449_v3  ;;  %7583 = vmatmul.mubr.bf16.gmra.mrb[196].mxu0 %v9489_v37 }
 0x1e8   :  { %7482 = vmatprep.mubr.msk.bf16.mxu1 %vm9021_vm0, %v11795_v47  ;;  %7586 = vmatprep.mubr.msk.bf16.mxu0 %vm9021_vm0, %v11795_v47 }
 0x1ea   :  { %v738_v5 = vpop.f32.mrb[4].mxu1  ;;  %v995_v27 = vpop.f32.mrb[92].mxu0 }
 0x1eb   :  { %v9781_v26 = vadd.f32 %v987_v61, %v738_v5  ;;  %v7260_v0 = vpop.f32.mrb[5].mxu1  ;;  %v7364_v7 = vpop.f32.mrb[93].mxu0 }
 0x1ec   :  { %v741_v59 = vpop.f32.mrb[6].mxu1  ;;  %v998_v52 = vpop.f32.mrb[94].mxu0 }
 0x1ed   :  { %v9783_v56 = vadd.f32 %v990_v29, %v741_v59  ;;  %v7261_v38 = vpop.f32.mrb[7].mxu1  ;;  %v7365_v24 = vpop.f32.mrb[95].mxu0 }
 0x1ef   :  { %7483 = vmatmul.mubr.bf16.gmra.mrb[112].mxu1 %v9469_v20  ;;  %7587 = vmatmul.mubr.bf16.gmra.mrb[200].mxu0 %v9511_v11 }
 0x1f0   :  { %7486 = vmatprep.mubr.msk.bf16.mxu1 %vm9021_vm0, %v11795_v47  ;;  %7590 = vmatprep.mubr.msk.bf16.mxu0 %vm9021_vm0, %v11795_v47 }
 0x1f2   :  { %v746_v61 = vpop.f32.mrb[8].mxu1  ;;  %v1003_v5 = vpop.f32.mrb[96].mxu0 }
 0x1f3   :  { %v9791_v0 = vadd.f32 %v995_v27, %v746_v61  ;;  %v7264_v7 = vpop.f32.mrb[9].mxu1  ;;  %v7368_v49 = vpop.f32.mrb[97].mxu0 }
 0x1f4   :  { %v749_v29 = vpop.f32.mrb[10].mxu1  ;;  %v1006_v59 = vpop.f32.mrb[98].mxu0 }
 0x1f5   :  { %v9793_v38 = vadd.f32 %v998_v52, %v749_v29  ;;  %v7265_v24 = vpop.f32.mrb[11].mxu1  ;;  %v7369_v32 = vpop.f32.mrb[99].mxu0 }
 0x1f7   :  { %7487 = vmatmul.mubr.bf16.gmra.mrb[116].mxu1 %v9489_v37  ;;  %7591 = vmatmul.mubr.bf16.gmra.mrb[204].mxu0 %v9533_v14 }
 0x1f8   :  { %7490 = vmatprep.mubr.msk.bf16.mxu1 %vm9021_vm0, %v11795_v47  ;;  %7594 = vmatprep.mubr.msk.bf16.mxu0 %vm9021_vm0, %v11795_v47 }
 0x1fa   :  { %v754_v27 = vpop.f32.mrb[12].mxu1  ;;  %v1011_v61 = vpop.f32.mrb[100].mxu0 }
 0x1fb   :  { %v9801_v7 = vadd.f32 %v1003_v5, %v754_v27  ;;  %v7268_v49 = vpop.f32.mrb[13].mxu1  ;;  %v7372_v15 = vpop.f32.mrb[101].mxu0 }
 0x1fc   :  { %v757_v52 = vpop.f32.mrb[14].mxu1  ;;  %v1014_v29 = vpop.f32.mrb[102].mxu0 }
 0x1fd   :  { %v9803_v24 = vadd.f32 %v1006_v59, %v757_v52  ;;  %v7269_v32 = vpop.f32.mrb[15].mxu1  ;;  %v7373_v46 = vpop.f32.mrb[103].mxu0 }
 0x1ff   :  { %7491 = vmatmul.mubr.bf16.gmra.mrb[120].mxu1 %v9511_v11  ;;  %7595 = vmatmul.mubr.bf16.gmra.mrb[208].mxu0 %v9553_v4 }
 0x200   :  { %7494 = vmatprep.mubr.msk.bf16.mxu1 %vm9021_vm0, %v11795_v47  ;;  %7598 = vmatprep.mubr.msk.bf16.mxu0 %vm9021_vm0, %v11795_v47 }
 0x202   :  { %v762_v5 = vpop.f32.mrb[16].mxu1  ;;  %v1019_v27 = vpop.f32.mrb[104].mxu0 }
 0x203   :  { %v9811_v49 = vadd.f32 %v1011_v61, %v762_v5  ;;  %v7272_v15 = vpop.f32.mrb[17].mxu1  ;;  %v7376_v35 = vpop.f32.mrb[105].mxu0 }
 0x204   :  { %v765_v59 = vpop.f32.mrb[18].mxu1  ;;  %v1022_v52 = vpop.f32.mrb[106].mxu0 }
 0x205   :  { %v9813_v32 = vadd.f32 %v1014_v29, %v765_v59  ;;  %v7273_v46 = vpop.f32.mrb[19].mxu1  ;;  %v7377_v41 = vpop.f32.mrb[107].mxu0 }
 0x207   :  { %7495 = vmatmul.mubr.bf16.gmra.mrb[124].mxu1 %v9533_v14  ;;  %7599 = vmatmul.mubr.bf16.gmra.mrb[212].mxu0 %v9573_v34 }
 0x208   :  { %7498 = vmatprep.mubr.msk.bf16.mxu1 %vm9021_vm0, %v11795_v47  ;;  %7602 = vmatprep.mubr.msk.bf16.mxu0 %vm9021_vm0, %v11795_v47 }
 0x20a   :  { %v770_v61 = vpop.f32.mrb[20].mxu1  ;;  %v1027_v5 = vpop.f32.mrb[108].mxu0 }
 0x20b   :  { %v9821_v15 = vadd.f32 %v1019_v27, %v770_v61  ;;  %v7276_v35 = vpop.f32.mrb[21].mxu1  ;;  %v7380_v9 = vpop.f32.mrb[109].mxu0 }
 0x20c   :  { %v773_v29 = vpop.f32.mrb[22].mxu1  ;;  %v1030_v59 = vpop.f32.mrb[110].mxu0 }
 0x20d   :  { %v9823_v46 = vadd.f32 %v1022_v52, %v773_v29  ;;  %v7277_v41 = vpop.f32.mrb[23].mxu1  ;;  %v7381_v44 = vpop.f32.mrb[111].mxu0 }
 0x20f   :  { %7499 = vmatmul.mubr.bf16.gmra.mrb[128].mxu1 %v9553_v4  ;;  %7603 = vmatmul.mubr.bf16.gmra.mrb[216].mxu0 %v9593_v1 }
 0x210   :  { %7502 = vmatprep.mubr.msk.bf16.mxu1 %vm9021_vm0, %v11795_v47  ;;  %7606 = vmatprep.mubr.msk.bf16.mxu0 %vm9021_vm0, %v11795_v47 }
 0x212   :  { %v778_v27 = vpop.f32.mrb[24].mxu1  ;;  %v1035_v9 = vpop.f32.mrb[112].mxu0 }
 0x213   :  { %v9832_v52 = vadd.f32 %v1027_v5, %v778_v27  ;;  %v7280_v61 = vpop.f32.mrb[25].mxu1  ;;  %v7384_v44 = vpop.f32.mrb[113].mxu0 }
 0x214   :  { %v781_v35 = vpop.f32.mrb[26].mxu1  ;;  %v1038_v29 = vpop.f32.mrb[114].mxu0 }
 0x215   :  { %v9834_v41 = vadd.f32 %v1030_v59, %v781_v35  ;;  %v7281_v55 = vpop.f32.mrb[27].mxu1  ;;  %v7385_v43 = vpop.f32.mrb[115].mxu0 }
 0x217   :  { %7503 = vmatmul.mubr.bf16.gmra.mrb[132].mxu1 %v9573_v34  ;;  %7607 = vmatmul.mubr.bf16.gmra.mrb[220].mxu0 %v9613_v48 }
 0x218   :  { %7506 = vmatprep.mubr.msk.bf16.mxu1 %vm9021_vm0, %v11795_v47  ;;  %7610 = vmatprep.mubr.msk.bf16.mxu0 %vm9021_vm0, %v11795_v47 }
 0x21a   :  { %v786_v21 = vpop.f32.mrb[28].mxu1  ;;  %v1043_v5 = vpop.f32.mrb[116].mxu0 }
 0x21b   :  { %v9842_v27 = vadd.f32 %v1035_v9, %v786_v21  ;;  %v7284_v61 = vpop.f32.mrb[29].mxu1  ;;  %v7388_v44 = vpop.f32.mrb[117].mxu0 }
 0x21c   :  { %v789_v59 = vpop.f32.mrb[30].mxu1  ;;  %v1046_v35 = vpop.f32.mrb[118].mxu0 }
 0x21d   :  { %v9844_v55 = vadd.f32 %v1038_v29, %v789_v59  ;;  %v7285_v43 = vpop.f32.mrb[31].mxu1  ;;  %v7389_v28 = vpop.f32.mrb[119].mxu0 }
 0x21f   :  { %7507 = vmatmul.mubr.bf16.gmra.mrb[136].mxu1 %v9593_v1  ;;  %7611 = vmatmul.mubr.bf16.gmra.mrb[224].mxu0 %v9633_v30 }
 0x220   :  { %7510 = vmatprep.mubr.msk.bf16.mxu1 %vm9021_vm0, %v11795_v47  ;;  %7614 = vmatprep.mubr.msk.bf16.mxu0 %vm9021_vm0, %v11795_v47 }
 0x222   :  { %v794_v9 = vpop.f32.mrb[32].mxu1  ;;  %v1051_v21 = vpop.f32.mrb[120].mxu0 }
 0x223   :  { %v9852_v61 = vadd.f32 %v1043_v5, %v794_v9  ;;  %v7288_v44 = vpop.f32.mrb[33].mxu1  ;;  %v7392_v23 = vpop.f32.mrb[121].mxu0 }
 0x224   :  { %v797_v29 = vpop.f32.mrb[34].mxu1  ;;  %v1054_v59 = vpop.f32.mrb[122].mxu0 }
 0x225   :  { %v9854_v43 = vadd.f32 %v1046_v35, %v797_v29  ;;  %v7289_v28 = vpop.f32.mrb[35].mxu1  ;;  %v7393_v12 = vpop.f32.mrb[123].mxu0 }
 0x227   :  { %7511 = vmatmul.mubr.bf16.gmra.mrb[140].mxu1 %v9613_v48  ;;  %7615 = vmatmul.mubr.bf16.gmra.mrb[228].mxu0 %v9653_v16 }
 0x228   :  { %7514 = vmatprep.mubr.msk.bf16.mxu1 %vm9021_vm0, %v11795_v47  ;;  %7618 = vmatprep.mubr.msk.bf16.mxu0 %vm9021_vm0, %v11795_v47 }
 0x22a   :  { %v802_v5 = vpop.f32.mrb[36].mxu1  ;;  %v1059_v23 = vpop.f32.mrb[124].mxu0 }
 0x22b   :  { %v9863_v35 = vadd.f32 %v1051_v21, %v802_v5  ;;  %v7292_v9 = vpop.f32.mrb[37].mxu1  ;;  %v7396_v12 = vpop.f32.mrb[125].mxu0 }
 0x22c   :  { %v805_v44 = vpop.f32.mrb[38].mxu1  ;;  %v1062_v29 = vpop.f32.mrb[126].mxu0 }
 0x22d   :  { %v9865_v28 = vadd.f32 %v1054_v59, %v805_v44  ;;  %v7293_v60 = vpop.f32.mrb[39].mxu1  ;;  %v7397_v53 = vpop.f32.mrb[127].mxu0 }
 0x22f   :  { %7515 = vmatmul.mubr.bf16.gmra.mrb[144].mxu1 %v9633_v30  ;;  %7619 = vmatmul.mubr.bf16.gmra.mrb[232].mxu0 %v9673_v58 }
 0x230   :  { %7518 = vmatprep.mubr.msk.bf16.mxu1 %vm9021_vm0, %v11795_v47  ;;  %7622 = vmatprep.mubr.msk.bf16.mxu0 %vm9021_vm0, %v11795_v47 }
 0x232   :  { %v810_v8 = vpop.f32.mrb[40].mxu1  ;;  %v1067_v21 = vpop.f32.mrb[128].mxu0 }
 0x233   :  { %v9873_v5 = vadd.f32 %v1059_v23, %v810_v8  ;;  %v7296_v9 = vpop.f32.mrb[41].mxu1  ;;  %v7400_v12 = vpop.f32.mrb[129].mxu0 }
 0x234   :  { %v813_v59 = vpop.f32.mrb[42].mxu1  ;;  %v1070_v44 = vpop.f32.mrb[130].mxu0 }
 0x235   :  { %v9875_v60 = vadd.f32 %v1062_v29, %v813_v59  ;;  %v7297_v53 = vpop.f32.mrb[43].mxu1  ;;  %v7401_v45 = vpop.f32.mrb[131].mxu0 }
 0x236   :  { %v8943_v45 = vld [vmem:[%s11614_s2] ss:$0 sm:$0xff] }
 0x237   :  { %7519 = vmatmul.mubr.bf16.gmra.mrb[148].mxu1 %v9653_v16  ;;  %7623 = vmatmul.mubr.bf16.gmra.mrb[236].mxu0 %v9693_v19  ;;  %v9888_v29 = vadd.f32 %v8943_v45, %v9715_v39  ;;  %v9891_v9 = vadd.f32 %v8943_v45, %v9723_v57 }
 0x238   :  { %7522 = vmatprep.mubr.msk.bf16.mxu1 %vm9021_vm0, %v11795_v47  ;;  %7626 = vmatprep.mubr.msk.bf16.mxu0 %vm9021_vm0, %v11795_v47 }
 0x239   :  { %11796 = vst [vmem:[#allocation51_spill] sm:$0xff] %v9888_v29  ;;  %11797 = vst [vmem:[#allocation52_spill] sm:$0xff] %v9891_v9  ;;  %v11704_v13 = vmax.f32 %v9888_v29, 0.0  ;;  %v11705_v10 = vmax.f32 %v9891_v9, 0.0  ;;  %v8730_v29 = vld [vmem:[#allocation6 + $0x58] sm:$0xff]   ;;  %v11799_v9 = vmov 0  }
 0x23a   :  { %v818_v23 = vpop.f32.mrb[44].mxu1  ;;  %v1075_v8 = vpop.f32.mrb[132].mxu0  ;;  %7745 = vmatpush3.bf16.msra.mxu0 %v8730_v29 }
 0x23b   :  { %v9893_v12 = vadd.f32 %v1067_v21, %v818_v23  ;;  %v7300_v59 = vpop.f32.mrb[45].mxu1  ;;  %v7404_v53 = vpop.f32.mrb[133].mxu0  ;;  %v9911_v21 = vpack.c.bf16 %v11705_v10, %v11704_v13  ;;  %7746 = vmatprep.subr.bf16.mxu0 %v11795_v47 }
 0x23c   :  { %v821_v36 = vpop.f32.mrb[46].mxu1  ;;  %v1078_v42 = vpop.f32.mrb[134].mxu0 }
 0x23d   :  { %v9895_v33 = vadd.f32 %v1070_v44, %v821_v36  ;;  %v7301_v25 = vpop.f32.mrb[47].mxu1  ;;  %v7405_v22 = vpop.f32.mrb[135].mxu0 }
 0x23f   :  { %7523 = vmatmul.mubr.bf16.gmra.mrb[152].mxu1 %v9673_v58  ;;  %7627 = vmatmul.mubr.bf16.gmra.mrb[240].mxu0 %v9713_v17 }
 0x240   :  { %7526 = vmatprep.mubr.msk.bf16.mxu1 %vm9021_vm0, %v11795_v47  ;;  %7630 = vmatprep.mubr.msk.bf16.mxu0 %vm9021_vm0, %v11795_v47 }
 0x242   :  { %v826_v39 = vpop.f32.mrb[48].mxu1  ;;  %v1083_v57 = vpop.f32.mrb[136].mxu0 }
 0x243   :  { %v9905_v36 = vadd.f32 %v1075_v8, %v826_v39  ;;  %v7304_v25 = vpop.f32.mrb[49].mxu1  ;;  %v7408_v22 = vpop.f32.mrb[137].mxu0 }
 0x244   :  { %v829_v44 = vpop.f32.mrb[50].mxu1  ;;  %v1086_v23 = vpop.f32.mrb[138].mxu0 }
 0x245   :  { %v9913_v45 = vadd.f32 %v1078_v42, %v829_v44  ;;  %v7305_v59 = vpop.f32.mrb[51].mxu1  ;;  %v7409_v53 = vpop.f32.mrb[139].mxu0 }
 0x247   :  { %7527 = vmatmul.mubr.bf16.gmra.mrb[156].mxu1 %v9693_v19  ;;  %7631 = vmatmul.mubr.bf16.gmra.mrb[244].mxu0 %v9911_v21 }
 0x248   :  { %7530 = vmatprep.mubr.msk.bf16.mxu1 %vm9021_vm0, %v11795_v47  ;;  %7634 = vmatprep.mubr.msk.bf16.mxu0 %vm9021_vm0, %v11795_v47 }
 0x24a   :  { %v834_v8 = vpop.f32.mrb[52].mxu1  ;;  %v1091_v39 = vpop.f32.mrb[140].mxu0 }
 0x24b   :  { %v9921_v25 = vadd.f32 %v1083_v57, %v834_v8  ;;  %v7308_v22 = vpop.f32.mrb[53].mxu1  ;;  %v7412_v13 = vpop.f32.mrb[141].mxu0 }
 0x24c   :  { %v837_v42 = vpop.f32.mrb[54].mxu1  ;;  %v1094_v44 = vpop.f32.mrb[142].mxu0 }
 0x24d   :  { %v9923_v59 = vadd.f32 %v1086_v23, %v837_v42  ;;  %v7309_v53 = vpop.f32.mrb[55].mxu1  ;;  %v7413_v10 = vpop.f32.mrb[143].mxu0 }
 0x24f   :  { %11798 = vst [vmem:[#allocation53_spill] sm:$0xff] %v9923_v59  ;;  %7531 = vmatmul.mubr.bf16.gmra.mrb[160].mxu1 %v9713_v17  ;;  %7635 = vmatmul.mubr.bf16.gmra.mrb[248].mxu0 %v11799_v9 }
 0x250   :  { %7534 = vmatprep.mubr.msk.bf16.mxu1 %vm9021_vm0, %v11795_v47  ;;  %7754 = vmatprep.mubr.msk.bf16.mxu0 %vm9021_vm0, %v11795_v47 }
 0x252   :  { %v842_v13 = vpop.f32.mrb[56].mxu1  ;;  %v1099_v57 = vpop.f32.mrb[144].mxu0 }
 0x253   :  { %v9932_v23 = vadd.f32 %v1091_v39, %v842_v13  ;;  %v7312_v8 = vpop.f32.mrb[57].mxu1  ;;  %v7416_v10 = vpop.f32.mrb[145].mxu0 }
 0x254   :  { %v845_v22 = vpop.f32.mrb[58].mxu1  ;;  %v1102_v42 = vpop.f32.mrb[146].mxu0 }
 0x255   :  { %11800 = vst [vmem:[#allocation54_spill] sm:$0xff] %v9932_v23  ;;  %v9934_v53 = vadd.f32 %v1094_v44, %v845_v22  ;;  %v7313_v2 = vpop.f32.mrb[59].mxu1  ;;  %v7417_v62 = vpop.f32.mrb[147].mxu0 }
 0x257   :  { %11801 = vst [vmem:[#allocation55_spill] sm:$0xff] %v9934_v53  ;;  %7535 = vmatmul.mubr.bf16.gmra.mrb[164].mxu1 %v9911_v21 }
 0x258   :  { %7654 = vmatprep.mubr.msk.bf16.mxu1 %vm9021_vm0, %v11795_v47 }
 0x25a   :  { %v850_v29 = vpop.f32.mrb[60].mxu1  ;;  %v1107_v54 = vpop.f32.mrb[148].mxu0 }
 0x25b   :  { %v9939_v51 = vadd.f32 %v1099_v57, %v850_v29  ;;  %v7316_v59 = vpop.f32.mrb[61].mxu1  ;;  %v7420_v39 = vpop.f32.mrb[149].mxu0  ;;  %v8731_v29 = vld [vmem:[#allocation6 + $0x60] sm:$0xff]  }
 0x25c   :  { %v853_v13 = vpop.f32.mrb[62].mxu1  ;;  %v1110_v8 = vpop.f32.mrb[150].mxu0  ;;  %7747 = vmatpush3.bf16.msra.mxu0 %v8731_v29 }
 0x25d   :  { %11802 = vst [vmem:[#allocation56_spill] sm:$0xff] %v9939_v51  ;;  %v9941_v10 = vadd.f32 %v1102_v42, %v853_v13  ;;  %v7317_v23 = vpop.f32.mrb[63].mxu1  ;;  %v7421_v44 = vpop.f32.mrb[151].mxu0  ;;  %7748 = vmatprep.subr.bf16.mxu0 %v11795_v47 }
 0x25f   :  { %7655 = vmatmul.mubr.bf16.vlgmr.msra.gmra.mrb[168].mxu1 %v9365_v18 }
 0x260   :  { %7658 = vmatprep.mubr.msk.bf16.mxu1 %vm9021_vm0, %v11795_v47 }
 0x262   :  { %v858_v62 = vpop.f32.mrb[64].mxu1  ;;  %v1115_v2 = vpop.f32.mrb[152].mxu0 }
 0x263   :  { %v9946_v22 = vadd.f32 %v1107_v54, %v858_v62  ;;  %v7320_v53 = vpop.f32.mrb[65].mxu1  ;;  %v7424_v57 = vpop.f32.mrb[153].mxu0 }
 0x264   :  { %v861_v59 = vpop.f32.mrb[66].mxu1  ;;  %v1118_v39 = vpop.f32.mrb[154].mxu0 }
 0x265   :  { %v9948_v51 = vadd.f32 %v1110_v8, %v861_v59  ;;  %v7321_v42 = vpop.f32.mrb[67].mxu1  ;;  %v7425_v13 = vpop.f32.mrb[155].mxu0 }
 0x267   :  { %11803 = vst [vmem:[#allocation57_spill] sm:$0xff] %v9948_v51  ;;  %7659 = vmatmul.mubr.bf16.gmra.mrb[172].mxu1 %v9388_v31 }
 0x268   :  { %7662 = vmatprep.mubr.msk.bf16.mxu1 %vm9021_vm0, %v11795_v47 }
 0x26a   :  { %v866_v18 = vpop.f32.mrb[68].mxu1  ;;  %v1123_v54 = vpop.f32.mrb[156].mxu0 }
 0x26b   :  { %v9954_v23 = vadd.f32 %v1115_v2, %v866_v18  ;;  %v7324_v53 = vpop.f32.mrb[69].mxu1  ;;  %v7428_v44 = vpop.f32.mrb[157].mxu0 }
 0x26c   :  { %v869_v62 = vpop.f32.mrb[70].mxu1  ;;  %v1126_v57 = vpop.f32.mrb[158].mxu0 }
 0x26d   :  { %11804 = vst [vmem:[#allocation58_spill] sm:$0xff] %v9954_v23  ;;  %v9956_v8 = vadd.f32 %v1118_v39, %v869_v62  ;;  %v7325_v59 = vpop.f32.mrb[71].mxu1  ;;  %v7429_v42 = vpop.f32.mrb[159].mxu0  ;;  %v8732_v62 = vld [vmem:[#allocation6 + $0x68] sm:$0xff]  }
 0x26e   :  { %7749 = vmatpush3.bf16.msra.mxu0 %v8732_v62 }
 0x26f   :  { %7663 = vmatmul.mubr.bf16.gmra.mrb[176].mxu1 %v9409_v40  ;;  %7750 = vmatprep.subr.bf16.mxu0 %v11795_v47 }
 0x270   :  { %7666 = vmatprep.mubr.msk.bf16.mxu1 %vm9021_vm0, %v11795_v47 }
 0x272   :  { %v874_v31 = vpop.f32.mrb[72].mxu1  ;;  %v1131_v29 = vpop.f32.mrb[160].mxu0 }
 0x273   :  { %v9961_v13 = vadd.f32 %v1123_v54, %v874_v31  ;;  %v7328_v51 = vpop.f32.mrb[73].mxu1  ;;  %v7432_v2 = vpop.f32.mrb[161].mxu0 }
 0x274   :  { %v877_v18 = vpop.f32.mrb[74].mxu1  ;;  %v1134_v53 = vpop.f32.mrb[162].mxu0 }
 0x275   :  { %v9963_v44 = vadd.f32 %v1126_v57, %v877_v18  ;;  %v7329_v23 = vpop.f32.mrb[75].mxu1  ;;  %v7433_v39 = vpop.f32.mrb[163].mxu0 }
 0x277   :  { %11805 = vst [vmem:[#allocation59_spill] sm:$0xff] %v9963_v44  ;;  %7667 = vmatmul.mubr.bf16.gmra.mrb[180].mxu1 %v9429_v50 }
 0x278   :  { %7670 = vmatprep.mubr.msk.bf16.mxu1 %vm9021_vm0, %v11795_v47 }
 0x27a   :  { %v882_v40 = vpop.f32.mrb[76].mxu1  ;;  %v1139_v59 = vpop.f32.mrb[164].mxu0 }
 0x27b   :  { %v9969_v54 = vadd.f32 %v1131_v29, %v882_v40  ;;  %v7332_v51 = vpop.f32.mrb[77].mxu1  ;;  %v7436_v42 = vpop.f32.mrb[165].mxu0 }
 0x27c   :  { %v885_v31 = vpop.f32.mrb[78].mxu1  ;;  %v1142_v57 = vpop.f32.mrb[166].mxu0 }
 0x27d   :  { %11806 = vst [vmem:[#allocation60_spill] sm:$0xff] %v9969_v54  ;;  %v9971_v2 = vadd.f32 %v1134_v53, %v885_v31  ;;  %v7333_v23 = vpop.f32.mrb[79].mxu1  ;;  %v7437_v18 = vpop.f32.mrb[167].mxu0 }
 0x27f   :  { %7671 = vmatmul.mubr.bf16.gmra.mrb[184].mxu1 %v9449_v3 }
 0x280   :  { %7674 = vmatprep.mubr.msk.bf16.mxu1 %vm9021_vm0, %v11795_v47 }
 0x282   :  { %v890_v50 = vpop.f32.mrb[80].mxu1  ;;  %v1595_v39 = vpop.f32.mrb[168].mxu0 }
 0x283   :  { %v9976_v62 = vadd.f32 %v1139_v59, %v890_v50  ;;  %v7336_v44 = vpop.f32.mrb[81].mxu1  ;;  %v7556_v29 = vpop.f32.mrb[169].mxu0 }
 0x284   :  { %v893_v40 = vpop.f32.mrb[82].mxu1  ;;  %v1598_v51 = vpop.f32.mrb[170].mxu0 }
 0x285   :  { %11807 = vst [vmem:[#allocation61_spill] sm:$0xff] %v9976_v62  ;;  %v9978_v42 = vadd.f32 %v1142_v57, %v893_v40  ;;  %v7337_v54 = vpop.f32.mrb[83].mxu1  ;;  %v7557_v53 = vpop.f32.mrb[171].mxu0  ;;  %v8733_v40 = vld [vmem:[#allocation6 + $0x70] sm:$0xff]  }
 0x286   :  { %v8734_v54 = vld [vmem:[#allocation6] sm:$0xff]   ;;  %7751 = vmatpush3.bf16.msra.mxu0 %v8733_v40 }
 0x287   :  { %7675 = vmatmul.mubr.bf16.gmra.mrb[188].mxu1 %v9469_v20  ;;  %7752 = vmatprep.subr.bf16.mxu0 %v11795_v47 }
 0x288   :  { %7678 = vmatprep.mubr.msk.bf16.mxu1 %vm9021_vm0, %v11795_v47  ;;  %7839 = vmatpush3.bf16.msra.mxu1 %v8734_v54 }
 0x289   :  { %7840 = vmatprep.subr.bf16.mxu1 %v11795_v47 }
 0x28a   :  { %v1266_v3 = vpop.f32.mrb[84].mxu1  ;;  %v1603_v31 = vpop.f32.mrb[172].mxu0 }
 0x28b   :  { %v1433_v23 = vadd.f32 %v1266_v3, %v9728_v63  ;;  %v7456_v18 = vpop.f32.mrb[85].mxu1  ;;  %v7560_v59 = vpop.f32.mrb[173].mxu0 }
 0x28c   :  { %v1269_v50 = vpop.f32.mrb[86].mxu1  ;;  %v1606_v44 = vpop.f32.mrb[174].mxu0 }
 0x28d   :  { %v1434_v29 = vadd.f32 %v1269_v50, %v9736_v6  ;;  %v7457_v62 = vpop.f32.mrb[87].mxu1  ;;  %v7561_v57 = vpop.f32.mrb[175].mxu0  ;;  %v9985_v53 = vadd.f32 %v1595_v39, %v1433_v23 }
 0x28e   :  { %v8735_v62 = vld [vmem:[#allocation6 + $0x8] sm:$0xff]  }
 0x28f   :  { %7679 = vmatmul.mubr.bf16.gmra.mrb[192].mxu1 %v9489_v37  ;;  %v9988_v20 = vadd.f32 %v1598_v51, %v1434_v29  ;;  %v8736_v29 = vld [vmem:[#allocation6 + $0x10] sm:$0xff]  }
 0x290   :  { %7682 = vmatprep.mubr.msk.bf16.mxu1 %vm9021_vm0, %v11795_v47  ;;  %7841 = vmatpush3.bf16.msra.mxu1 %v8735_v62 }
 0x291   :  { %7842 = vmatprep.subr.bf16.mxu1 %v11795_v47 }
 0x292   :  { %v1274_v63 = vpop.f32.mrb[88].mxu1  ;;  %v1611_v6 = vpop.f32.mrb[176].mxu0 }
 0x293   :  { %v1435_v3 = vadd.f32 %v1274_v63, %v9781_v26  ;;  %v7460_v39 = vpop.f32.mrb[89].mxu1  ;;  %v7564_v23 = vpop.f32.mrb[177].mxu0 }
 0x294   :  { %v1277_v18 = vpop.f32.mrb[90].mxu1  ;;  %v1614_v37 = vpop.f32.mrb[178].mxu0  ;;  %7843 = vmatpush3.bf16.msra.mxu1 %v8736_v29 }
 0x295   :  { %v1436_v51 = vadd.f32 %v1277_v18, %v9783_v56  ;;  %v7461_v59 = vpop.f32.mrb[91].mxu1  ;;  %v7565_v50 = vpop.f32.mrb[179].mxu0  ;;  %v9997_v57 = vadd.f32 %v1603_v31, %v1435_v3  ;;  %7844 = vmatprep.subr.bf16.mxu1 %v11795_v47  ;;  %v8737_v56 = vld [vmem:[#allocation6 + $0x18] sm:$0xff]   ;;  %v8738_v18 = vld [vmem:[#allocation6 + $0x20] sm:$0xff]  }
 0x297   :  { %7683 = vmatmul.mubr.bf16.gmra.mrb[196].mxu1 %v9511_v11  ;;  %v10000_v40 = vadd.f32 %v1606_v44, %v1436_v51 }
 0x298   :  { %7686 = vmatprep.mubr.msk.bf16.mxu1 %vm9021_vm0, %v11795_v47  ;;  %7845 = vmatpush3.bf16.msra.mxu1 %v8737_v56 }
 0x299   :  { %7846 = vmatprep.subr.bf16.mxu1 %v11795_v47 }
 0x29a   :  { %v1282_v26 = vpop.f32.mrb[92].mxu1  ;;  %v1619_v54 = vpop.f32.mrb[180].mxu0 }
 0x29b   :  { %v1437_v63 = vadd.f32 %v1282_v26, %v9791_v0  ;;  %v7464_v62 = vpop.f32.mrb[93].mxu1  ;;  %v7568_v39 = vpop.f32.mrb[181].mxu0 }
 0x29c   :  { %v1285_v23 = vpop.f32.mrb[94].mxu1  ;;  %v1622_v31 = vpop.f32.mrb[182].mxu0  ;;  %7847 = vmatpush3.bf16.msra.mxu1 %v8738_v18  ;;  %v8739_v62 = vld [vmem:[#allocation6 + $0x78] sm:$0xff]  }
 0x29d   :  { %v1438_v11 = vadd.f32 %v1285_v23, %v9793_v38  ;;  %v7465_v44 = vpop.f32.mrb[95].mxu1  ;;  %v7569_v3 = vpop.f32.mrb[183].mxu0  ;;  %v10008_v51 = vadd.f32 %v1611_v6, %v1437_v63  ;;  %7848 = vmatprep.subr.bf16.mxu1 %v11795_v47  ;;  %v8740_v38 = vld [vmem:[#allocation6 + $0x28] sm:$0xff]   ;;  %7753 = vmatpush3.bf16.msra.mxu0 %v8739_v62  ;;  %v8741_v23 = vld [vmem:[#allocation6 + $0x30] sm:$0xff]  }
 0x29e   :  { %7938 = vmatprep.subr.bf16.mxu0 %v11795_v47  ;;  %v8742_v3 = vld [vmem:[#allocation6 + $0x38] sm:$0xff]  }
 0x29f   :  { %7687 = vmatmul.mubr.bf16.gmra.mrb[200].mxu1 %v9533_v14  ;;  %v10011_v59 = vadd.f32 %v1614_v37, %v1438_v11 }
 0x2a0   :  { %7690 = vmatprep.mubr.msk.bf16.mxu1 %vm9021_vm0, %v11795_v47  ;;  %7849 = vmatpush3.bf16.msra.mxu1 %v8740_v38 }
 0x2a1   :  { %7850 = vmatprep.subr.bf16.mxu1 %v11795_v47  ;;  %7755 = vmatmul.mubr.bf16.vlgmr.msra.gmra.mrb[252].mxu0 %v11799_v9 }
 0x2a2   :  { %v1290_v0 = vpop.f32.mrb[96].mxu1  ;;  %v1627_v50 = vpop.f32.mrb[184].mxu0  ;;  %7758 = vmatprep.mubr.msk.bf16.mxu0 %vm9021_vm0, %v11795_v47 }
 0x2a3   :  { %v1439_v29 = vadd.f32 %v1290_v0, %v9801_v7  ;;  %v7468_v26 = vpop.f32.mrb[97].mxu1  ;;  %v7572_v56 = vpop.f32.mrb[185].mxu0 }
 0x2a4   :  { %v1293_v6 = vpop.f32.mrb[98].mxu1  ;;  %v1630_v63 = vpop.f32.mrb[186].mxu0  ;;  %7851 = vmatpush3.bf16.msra.mxu1 %v8741_v23 }
 0x2a5   :  { %v1440_v14 = vadd.f32 %v1293_v6, %v9803_v24  ;;  %v7469_v37 = vpop.f32.mrb[99].mxu1  ;;  %v7573_v39 = vpop.f32.mrb[187].mxu0  ;;  %v10019_v11 = vadd.f32 %v1619_v54, %v1439_v29  ;;  %7852 = vmatprep.subr.bf16.mxu1 %v11795_v47 }
 0x2a7   :  { %7691 = vmatmul.mubr.bf16.gmra.mrb[204].mxu1 %v9553_v4  ;;  %v10023_v7 = vadd.f32 %v1622_v31, %v1440_v14 }
 0x2a8   :  { %7694 = vmatprep.mubr.msk.bf16.mxu1 %vm9021_vm0, %v11795_v47  ;;  %7853 = vmatpush3.bf16.msra.mxu1 %v8742_v3 }
 0x2a9   :  { %8038 = vmatprep.subr.bf16.mxu1 %v11795_v47 }
 0x2aa   :  { %v1298_v24 = vpop.f32.mrb[100].mxu1  ;;  %v1635_v44 = vpop.f32.mrb[188].mxu0 }
 0x2ab   :  { %v1441_v54 = vadd.f32 %v1298_v24, %v9811_v49  ;;  %v7472_v18 = vpop.f32.mrb[101].mxu1  ;;  %v7576_v4 = vpop.f32.mrb[189].mxu0 }
 0x2ac   :  { %v1301_v31 = vpop.f32.mrb[102].mxu1  ;;  %v1638_v0 = vpop.f32.mrb[190].mxu0 }
 0x2ad   :  { %v1442_v38 = vadd.f32 %v1301_v31, %v9813_v32  ;;  %v7473_v29 = vpop.f32.mrb[103].mxu1  ;;  %v7577_v26 = vpop.f32.mrb[191].mxu0  ;;  %v10033_v56 = vadd.f32 %v1627_v50, %v1441_v54 }
 0x2af   :  { %7695 = vmatmul.mubr.bf16.gmra.mrb[208].mxu1 %v9573_v34  ;;  %v10037_v62 = vadd.f32 %v1630_v63, %v1442_v38 }
 0x2b0   :  { %7698 = vmatprep.mubr.msk.bf16.mxu1 %vm9021_vm0, %v11795_v47 }
 0x2b2   :  { %v1306_v49 = vpop.f32.mrb[104].mxu1  ;;  %v1643_v6 = vpop.f32.mrb[192].mxu0 }
 0x2b3   :  { %v1443_v14 = vadd.f32 %v1306_v49, %v9821_v15  ;;  %v7476_v37 = vpop.f32.mrb[105].mxu1  ;;  %v7580_v39 = vpop.f32.mrb[193].mxu0  ;;  %v8743_v49 = vld [vmem:[#allocation6 + $0x80] sm:$0xff]  }
 0x2b4   :  { %v1309_v32 = vpop.f32.mrb[106].mxu1  ;;  %v1646_v23 = vpop.f32.mrb[194].mxu0  ;;  %7939 = vmatpush3.bf16.msra.mxu0 %v8743_v49 }
 0x2b5   :  { %v1444_v50 = vadd.f32 %v1309_v32, %v9823_v46  ;;  %v7477_v24 = vpop.f32.mrb[107].mxu1  ;;  %v7581_v3 = vpop.f32.mrb[195].mxu0  ;;  %v10043_v54 = vadd.f32 %v1635_v44, %v1443_v14  ;;  %7940 = vmatprep.subr.bf16.mxu0 %v11795_v47 }
 0x2b7   :  { %7699 = vmatmul.mubr.bf16.gmra.mrb[212].mxu1 %v9593_v1  ;;  %v10046_v34 = vadd.f32 %v1638_v0, %v1444_v50 }
 0x2b8   :  { %7702 = vmatprep.mubr.msk.bf16.mxu1 %vm9021_vm0, %v11795_v47 }
 0x2ba   :  { %v1314_v63 = vpop.f32.mrb[108].mxu1  ;;  %v1651_v18 = vpop.f32.mrb[196].mxu0 }
 0x2bb   :  { %v1445_v15 = vadd.f32 %v1314_v63, %v9832_v52  ;;  %v7480_v4 = vpop.f32.mrb[109].mxu1  ;;  %v7584_v31 = vpop.f32.mrb[197].mxu0 }
 0x2bc   :  { %v1317_v38 = vpop.f32.mrb[110].mxu1  ;;  %v1654_v29 = vpop.f32.mrb[198].mxu0 }
 0x2bd   :  { %v1446_v46 = vadd.f32 %v1317_v38, %v9834_v41  ;;  %v7481_v26 = vpop.f32.mrb[111].mxu1  ;;  %v7585_v44 = vpop.f32.mrb[199].mxu0  ;;  %v10052_v14 = vadd.f32 %v1643_v6, %v1445_v15 }
 0x2bf   :  { %7703 = vmatmul.mubr.bf16.gmra.mrb[216].mxu1 %v9613_v48  ;;  %v10055_v1 = vadd.f32 %v1646_v23, %v1446_v46 }
 0x2c0   :  { %7706 = vmatprep.mubr.msk.bf16.mxu1 %vm9021_vm0, %v11795_v47 }
 0x2c2   :  { %v1322_v52 = vpop.f32.mrb[112].mxu1  ;;  %v1659_v0 = vpop.f32.mrb[200].mxu0 }
 0x2c3   :  { %v1447_v37 = vadd.f32 %v1322_v52, %v9842_v27  ;;  %v7484_v41 = vpop.f32.mrb[113].mxu1  ;;  %v7588_v39 = vpop.f32.mrb[201].mxu0 }
 0x2c4   :  { %v1325_v32 = vpop.f32.mrb[114].mxu1  ;;  %v1662_v50 = vpop.f32.mrb[202].mxu0 }
 0x2c5   :  { %v1448_v6 = vadd.f32 %v1325_v32, %v9844_v55  ;;  %v7485_v24 = vpop.f32.mrb[115].mxu1  ;;  %v7589_v48 = vpop.f32.mrb[203].mxu0  ;;  %v10062_v3 = vadd.f32 %v1651_v18, %v1447_v37 }
 0x2c7   :  { %7707 = vmatmul.mubr.bf16.gmra.mrb[220].mxu1 %v9633_v30  ;;  %v10065_v23 = vadd.f32 %v1654_v29, %v1448_v6  ;;  %v8744_v6 = vld [vmem:[#allocation6 + $0x88] sm:$0xff]  }
 0x2c8   :  { %7710 = vmatprep.mubr.msk.bf16.mxu1 %vm9021_vm0, %v11795_v47  ;;  %7941 = vmatpush3.bf16.msra.mxu0 %v8744_v6 }
 0x2c9   :  { %7942 = vmatprep.subr.bf16.mxu0 %v11795_v47 }
 0x2ca   :  { %v1330_v63 = vpop.f32.mrb[116].mxu1  ;;  %v1667_v15 = vpop.f32.mrb[204].mxu0 }
 0x2cb   :  { %v1449_v27 = vadd.f32 %v1330_v63, %v9852_v61  ;;  %v7488_v4 = vpop.f32.mrb[117].mxu1  ;;  %v7592_v31 = vpop.f32.mrb[205].mxu0 }
 0x2cc   :  { %v1333_v38 = vpop.f32.mrb[118].mxu1  ;;  %v1670_v46 = vpop.f32.mrb[206].mxu0 }
 0x2cd   :  { %v1450_v55 = vadd.f32 %v1333_v38, %v9854_v43  ;;  %v7489_v26 = vpop.f32.mrb[119].mxu1  ;;  %v7593_v18 = vpop.f32.mrb[207].mxu0  ;;  %v10071_v44 = vadd.f32 %v1659_v0, %v1449_v27 }
 0x2cf   :  { %7711 = vmatmul.mubr.bf16.gmra.mrb[224].mxu1 %v9653_v16  ;;  %v10074_v30 = vadd.f32 %v1662_v50, %v1450_v55 }
 0x2d0   :  { %7714 = vmatprep.mubr.msk.bf16.mxu1 %vm9021_vm0, %v11795_v47 }
 0x2d2   :  { %v1338_v29 = vpop.f32.mrb[120].mxu1  ;;  %v1675_v49 = vpop.f32.mrb[208].mxu0 }
 0x2d3   :  { %v1451_v61 = vadd.f32 %v1338_v29, %v9863_v35  ;;  %v7492_v52 = vpop.f32.mrb[121].mxu1  ;;  %v7596_v37 = vpop.f32.mrb[209].mxu0 }
 0x2d4   :  { %v1341_v41 = vpop.f32.mrb[122].mxu1  ;;  %v1678_v39 = vpop.f32.mrb[210].mxu0 }
 0x2d5   :  { %v1452_v43 = vadd.f32 %v1341_v41, %v9865_v28  ;;  %v7493_v32 = vpop.f32.mrb[123].mxu1  ;;  %v7597_v0 = vpop.f32.mrb[211].mxu0  ;;  %v10080_v24 = vadd.f32 %v1667_v15, %v1451_v61  ;;  %v8745_v41 = vld [vmem:[#allocation6 + $0x90] sm:$0xff]  }
 0x2d6   :  { %7943 = vmatpush3.bf16.msra.mxu0 %v8745_v41 }
 0x2d7   :  { %7715 = vmatmul.mubr.bf16.gmra.mrb[228].mxu1 %v9673_v58  ;;  %v10083_v16 = vadd.f32 %v1670_v46, %v1452_v43  ;;  %7944 = vmatprep.subr.bf16.mxu0 %v11795_v47 }
 0x2d8   :  { %7718 = vmatprep.mubr.msk.bf16.mxu1 %vm9021_vm0, %v11795_v47 }
 0x2da   :  { %v1346_v35 = vpop.f32.mrb[124].mxu1  ;;  %v1683_v50 = vpop.f32.mrb[212].mxu0 }
 0x2db   :  { %v1453_v48 = vadd.f32 %v1346_v35, %v9873_v5  ;;  %v7496_v28 = vpop.f32.mrb[125].mxu1  ;;  %v7600_v63 = vpop.f32.mrb[213].mxu0 }
 0x2dc   :  { %v1349_v27 = vpop.f32.mrb[126].mxu1  ;;  %v1686_v4 = vpop.f32.mrb[214].mxu0 }
 0x2dd   :  { %v1454_v15 = vadd.f32 %v1349_v27, %v9875_v60  ;;  %v7497_v31 = vpop.f32.mrb[127].mxu1  ;;  %v7601_v58 = vpop.f32.mrb[215].mxu0  ;;  %v10090_v38 = vadd.f32 %v1675_v49, %v1453_v48 }
 0x2df   :  { %7719 = vmatmul.mubr.bf16.gmra.mrb[232].mxu1 %v9693_v19  ;;  %v10093_v46 = vadd.f32 %v1678_v39, %v1454_v15 }
 0x2e0   :  { %7722 = vmatprep.mubr.msk.bf16.mxu1 %vm9021_vm0, %v11795_v47 }
 0x2e2   :  { %v1354_v55 = vpop.f32.mrb[128].mxu1  ;;  %v1691_v26 = vpop.f32.mrb[216].mxu0 }
 0x2e3   :  { %v1455_v5 = vadd.f32 %v1354_v55, %v9893_v12  ;;  %v7500_v18 = vpop.f32.mrb[129].mxu1  ;;  %v7604_v29 = vpop.f32.mrb[217].mxu0 }
 0x2e4   :  { %v1357_v61 = vpop.f32.mrb[130].mxu1  ;;  %v1694_v52 = vpop.f32.mrb[218].mxu0 }
 0x2e5   :  { %v1456_v60 = vadd.f32 %v1357_v61, %v9895_v33  ;;  %v7501_v37 = vpop.f32.mrb[131].mxu1  ;;  %v7605_v49 = vpop.f32.mrb[219].mxu0  ;;  %v10099_v43 = vadd.f32 %v1683_v50, %v1455_v5 }
 0x2e7   :  { %7723 = vmatmul.mubr.bf16.gmra.mrb[236].mxu1 %v9713_v17  ;;  %v10102_v19 = vadd.f32 %v1686_v4, %v1456_v60 }
 0x2e8   :  { %7726 = vmatprep.mubr.msk.bf16.mxu1 %vm9021_vm0, %v11795_v47 }
 0x2ea   :  { %v1362_v12 = vpop.f32.mrb[132].mxu1  ;;  %v1699_v39 = vpop.f32.mrb[220].mxu0 }
 0x2eb   :  { %v1457_v32 = vadd.f32 %v1362_v12, %v9905_v36  ;;  %v7504_v33 = vpop.f32.mrb[133].mxu1  ;;  %v7608_v0 = vpop.f32.mrb[221].mxu0 }
 0x2ec   :  { %v1365_v6 = vpop.f32.mrb[134].mxu1  ;;  %v1702_v35 = vpop.f32.mrb[222].mxu0 }
 0x2ed   :  { %v1458_v50 = vadd.f32 %v1365_v6, %v9913_v45  ;;  %v7505_v48 = vpop.f32.mrb[135].mxu1  ;;  %v7609_v17 = vpop.f32.mrb[223].mxu0  ;;  %v10109_v28 = vadd.f32 %v1691_v26, %v1457_v32  ;;  %v11808_v45 = vld [vmem:[#allocation53_spill] sm:$0xff]  ;;  %v11810_v32 = vld [vmem:[#allocation55_spill] sm:$0xff]  ;;  %v8746_v6 = vld [vmem:[#allocation6 + $0x98] sm:$0xff]  }
 0x2ee   :  { %7945 = vmatpush3.bf16.msra.mxu0 %v8746_v6  ;;  %v8747_v6 = vld [vmem:[#allocation6 + $0xa0] sm:$0xff]  }
 0x2ef   :  { %7727 = vmatmul.mubr.bf16.gmra.mrb[240].mxu1 %v9911_v21  ;;  %v10112_v63 = vadd.f32 %v1694_v52, %v1458_v50  ;;  %7946 = vmatprep.subr.bf16.mxu0 %v11795_v47 }
 0x2f0   :  { %7730 = vmatprep.mubr.msk.bf16.mxu1 %vm9021_vm0, %v11795_v47 }
 0x2f2   :  { %v1370_v27 = vpop.f32.mrb[136].mxu1  ;;  %v1707_v4 = vpop.f32.mrb[224].mxu0  ;;  %7947 = vmatpush3.bf16.msra.mxu0 %v8747_v6 }
 0x2f3   :  { %v1459_v36 = vadd.f32 %v1370_v27, %v9921_v25  ;;  %v7508_v15 = vpop.f32.mrb[137].mxu1  ;;  %v7612_v31 = vpop.f32.mrb[225].mxu0  ;;  %v11809_v25 = vld [vmem:[#allocation54_spill] sm:$0xff]  ;;  %v11811_v27 = vld [vmem:[#allocation56_spill] sm:$0xff]  ;;  %7948 = vmatprep.subr.bf16.mxu0 %v11795_v47 }
 0x2f4   :  { %v1373_v58 = vpop.f32.mrb[138].mxu1  ;;  %v1710_v55 = vpop.f32.mrb[226].mxu0 }
 0x2f5   :  { %v1460_v5 = vadd.f32 %v1373_v58, %v11808_v45  ;;  %v7509_v18 = vpop.f32.mrb[139].mxu1  ;;  %v7613_v26 = vpop.f32.mrb[227].mxu0  ;;  %v10118_v29 = vadd.f32 %v1699_v39, %v1459_v36 }
 0x2f7   :  { %7731 = vmatmul.mubr.bf16.gmra.mrb[244].mxu1 %v11799_v9  ;;  %v10121_v21 = vadd.f32 %v1702_v35, %v1460_v5 }
 0x2f8   :  { %7734 = vmatprep.mubr.msk.bf16.mxu1 %vm9021_vm0, %v11795_v47 }
 0x2fa   :  { %v1378_v61 = vpop.f32.mrb[140].mxu1  ;;  %v1715_v52 = vpop.f32.mrb[228].mxu0 }
 0x2fb   :  { %v1461_v60 = vadd.f32 %v1378_v61, %v11809_v25  ;;  %v7512_v37 = vpop.f32.mrb[141].mxu1  ;;  %v7616_v49 = vpop.f32.mrb[229].mxu0 }
 0x2fc   :  { %v1381_v41 = vpop.f32.mrb[142].mxu1  ;;  %v1718_v12 = vpop.f32.mrb[230].mxu0 }
 0x2fd   :  { %v1462_v33 = vadd.f32 %v1381_v41, %v11810_v32  ;;  %v7513_v0 = vpop.f32.mrb[143].mxu1  ;;  %v7617_v39 = vpop.f32.mrb[231].mxu0  ;;  %v10127_v50 = vadd.f32 %v1707_v4, %v1461_v60 }
 0x2ff   :  { %7735 = vmatmul.mubr.bf16.gmra.mrb[248].mxu1 %v11799_v9  ;;  %v10130_v35 = vadd.f32 %v1710_v55, %v1462_v33 }
 0x300   :  { %7854 = vmatprep.mubr.msk.bf16.mxu1 %vm9021_vm0, %v11795_v47 }
 0x302   :  { %v1386_v48 = vpop.f32.mrb[144].mxu1  ;;  %v1723_v17 = vpop.f32.mrb[232].mxu0 }
 0x303   :  { %v1463_v36 = vadd.f32 %v1386_v48, %v11811_v27  ;;  %v7516_v15 = vpop.f32.mrb[145].mxu1  ;;  %v7620_v31 = vpop.f32.mrb[233].mxu0  ;;  %v11813_v27 = vld [vmem:[#allocation58_spill] sm:$0xff] }
 0x304   :  { %v1389_v58 = vpop.f32.mrb[146].mxu1  ;;  %v1726_v45 = vpop.f32.mrb[234].mxu0 }
 0x305   :  { %v1464_v4 = vadd.f32 %v1389_v58, %v9941_v10  ;;  %v7517_v5 = vpop.f32.mrb[147].mxu1  ;;  %v7621_v18 = vpop.f32.mrb[235].mxu0  ;;  %v10137_v26 = vadd.f32 %v1715_v52, %v1463_v36  ;;  %v11812_v10 = vld [vmem:[#allocation57_spill] sm:$0xff] }
 0x307   :  { %7855 = vmatmul.mubr.bf16.vlgmr.msra.gmra.mrb[252].mxu1 %v11799_v9  ;;  %v10140_v55 = vadd.f32 %v1718_v12, %v1464_v4 }
 0x308   :  { %7858 = vmatprep.mubr.msk.bf16.mxu1 %vm9021_vm0, %v11795_v47 }
 0x30a   :  { %v1394_v61 = vpop.f32.mrb[148].mxu1  ;;  %v1731_v25 = vpop.f32.mrb[236].mxu0 }
 0x30b   :  { %v1465_v60 = vadd.f32 %v1394_v61, %v9946_v22  ;;  %v7520_v37 = vpop.f32.mrb[149].mxu1  ;;  %v7624_v49 = vpop.f32.mrb[237].mxu0 }
 0x30c   :  { %v1397_v41 = vpop.f32.mrb[150].mxu1  ;;  %v1734_v32 = vpop.f32.mrb[238].mxu0 }
 0x30d   :  { %v1466_v33 = vadd.f32 %v1397_v41, %v11812_v10  ;;  %v7521_v0 = vpop.f32.mrb[151].mxu1  ;;  %v7625_v52 = vpop.f32.mrb[239].mxu0  ;;  %v10146_v39 = vadd.f32 %v1723_v17, %v1465_v60 }
 0x30e   :  { %v11814_v52 = vld [vmem:[#allocation59_spill] sm:$0xff] }
 0x30f   :  { %7859 = vmatmul.mubr.bf16.gmra.mrb[0].mxu1 %v11799_v9  ;;  %v10149_v12 = vadd.f32 %v1726_v45, %v1466_v33 }
 0x310   :  { %7862 = vmatprep.mubr.msk.bf16.mxu1 %vm9021_vm0, %v11795_v47 }
 0x312   :  { %v1402_v48 = vpop.f32.mrb[152].mxu1  ;;  %v1739_v22 = vpop.f32.mrb[240].mxu0 }
 0x313   :  { %v1467_v36 = vadd.f32 %v1402_v48, %v11813_v27  ;;  %v7524_v15 = vpop.f32.mrb[153].mxu1  ;;  %v7628_v31 = vpop.f32.mrb[241].mxu0 }
 0x314   :  { %v1405_v58 = vpop.f32.mrb[154].mxu1  ;;  %v1742_v4 = vpop.f32.mrb[242].mxu0 }
 0x315   :  { %v1468_v17 = vadd.f32 %v1405_v58, %v9956_v8  ;;  %v7525_v5 = vpop.f32.mrb[155].mxu1  ;;  %v7629_v45 = vpop.f32.mrb[243].mxu0  ;;  %v10156_v18 = vadd.f32 %v1731_v25, %v1467_v36 }
 0x317   :  { %v10158_v61 = vadd.f32 %v1734_v32, %v1468_v17  ;;  %v11815_v32 = vld [vmem:[#allocation60_spill] sm:$0xff] }
 0x31a   :  { %v1410_v60 = vpop.f32.mrb[156].mxu1  ;;  %v1747_v37 = vpop.f32.mrb[244].mxu0 }
 0x31b   :  { %v1469_v49 = vadd.f32 %v1410_v60, %v9961_v13  ;;  %v7528_v41 = vpop.f32.mrb[157].mxu1  ;;  %v7632_v10 = vpop.f32.mrb[245].mxu0 }
 0x31c   :  { %v1413_v33 = vpop.f32.mrb[158].mxu1  ;;  %v1750_v0 = vpop.f32.mrb[246].mxu0  ;;  %v8748_v41 = vld [vmem:[#allocation6 + $0xa8] sm:$0xff]  }
 0x31d   :  { %v1470_v6 = vadd.f32 %v1413_v33, %v11814_v52  ;;  %v7529_v48 = vpop.f32.mrb[159].mxu1  ;;  %v7633_v27 = vpop.f32.mrb[247].mxu0  ;;  %v10162_v15 = vadd.f32 %v1739_v22, %v1469_v49  ;;  %7949 = vmatpush3.bf16.msra.mxu0 %v8748_v41  ;;  %v11816_v49 = vld [vmem:[#allocation61_spill] sm:$0xff] }
 0x31e   :  { %7950 = vmatprep.subr.bf16.mxu0 %v11795_v47 }
 0x31f   :  { %v10164_v8 = vadd.f32 %v1742_v4, %v1470_v6 }
 0x322   :  { %v1418_v25 = vpop.f32.mrb[160].mxu1  ;;  %v1755_v36 = vpop.f32.mrb[248].mxu0 }
 0x323   :  { %v1471_v31 = vadd.f32 %v1418_v25, %v11815_v32  ;;  %v7532_v58 = vpop.f32.mrb[161].mxu1  ;;  %v7636_v17 = vpop.f32.mrb[249].mxu0 }
 0x324   :  { %v1421_v5 = vpop.f32.mrb[162].mxu1  ;;  %v1758_v13 = vpop.f32.mrb[250].mxu0 }
 0x325   :  { %v1472_v45 = vadd.f32 %v1421_v5, %v9971_v2  ;;  %v7533_v60 = vpop.f32.mrb[163].mxu1  ;;  %v10168_v10 = vadd.f32 %v1747_v37, %v1471_v31  ;;  %v7637_v33 = vpop.f32.mrb[251].mxu0 }
 0x326   :  { %v8750_v60 = vld [vmem:[#allocation6 + $0xc0] sm:$0xff]  }
 0x327   :  { %v10170_v22 = vadd.f32 %v1750_v0, %v1472_v45  ;;  %v10182_v0 = vld [vmem:[%s11616_s4] ss:$0 sm:$0xff]  ;;  %8039 = vmatpush3.bf16.msra.mxu1 %v8750_v60 }
 0x328   :  { %8040 = vmatprep.subr.bf16.mxu1 %v11795_v47 }
 0x32a   :  { %v1426_v4 = vpop.f32.mrb[164].mxu1 }
 0x32b   :  { %v1473_v52 = vadd.f32 %v1426_v4, %v11816_v49  ;;  %v7536_v6 = vpop.f32.mrb[165].mxu1  ;;  %v8751_v4 = vld [vmem:[#allocation6 + $0xc8] sm:$0xff]   ;;  %v11817_v49 = vld [vmem:[#allocation11_spill] sm:$0xff] }
 0x32c   :  { %v1429_v48 = vpop.f32.mrb[166].mxu1  ;;  %v11820_v6 = vld [vmem:[#allocation12_spill] sm:$0xff]  ;;  %8041 = vmatpush3.bf16.msra.mxu1 %v8751_v4 }
 0x32d   :  { %v1474_v27 = vadd.f32 %v1429_v48, %v9978_v42  ;;  %v7537_v25 = vpop.f32.mrb[167].mxu1  ;;  %v10175_v32 = vadd.f32 %v1755_v36, %v1473_v52  ;;  %v11818_v52 = vmax.f32 %v11817_v49, 0.0  ;;  %v11821_v48 = vmax.f32 %v11820_v6, 0.0  ;;  %8042 = vmatprep.subr.bf16.mxu1 %v11795_v47  ;;  %v11826_v49 = vld [vmem:[#allocation14_spill] sm:$0xff] }
 0x32f   :  { %v10177_v2 = vadd.f32 %v1758_v13, %v1474_v27 }
 0x332   :  { %v1924_v37 = vpop.f32.mrb[168].mxu1 }
 0x333   :  { %v2091_v31 = vadd.f32 %v1924_v37, %v9985_v53  ;;  %v7656_v58 = vpop.f32.mrb[169].mxu1 }
 0x334   :  { %v1927_v17 = vpop.f32.mrb[170].mxu1 }
 0x335   :  { %v2140_v5 = vadd.f32 %v10182_v0, %v2091_v31  ;;  %v2092_v45 = vadd.f32 %v1927_v17, %v9988_v20  ;;  %v7657_v42 = vpop.f32.mrb[171].mxu1 }
 0x336   :  { %v8752_v42 = vld [vmem:[#allocation6 + $0xd0] sm:$0xff]  }
 0x337   :  { %v2182_v36 = vmax.f32 %v2140_v5, 0.0  ;;  %v2141_v13 = vadd.f32 %v10182_v0, %v2092_v45  ;;  %v8749_v45 = vld [vmem:[#allocation6 + $0xb0] sm:$0xff]   ;;  %8043 = vmatpush3.bf16.msra.mxu1 %v8752_v42 }
 0x338   :  { %7951 = vmatpush3.bf16.msra.mxu0 %v8749_v45  ;;  %8044 = vmatprep.subr.bf16.mxu1 %v11795_v47  ;;  %v8754_v45 = vld [vmem:[#allocation6 + $0xe0] sm:$0xff]  }
 0x339   :  { %v2183_v41 = vmax.f32 %v2141_v13, 0.0  ;;  %v10191_v53 = vadd.f32 %v2182_v36, %v11818_v52  ;;  %v8753_v13 = vld [vmem:[#allocation6 + $0xd8] sm:$0xff]   ;;  %7952 = vmatprep.subr.bf16.mxu0 %v11795_v47  ;;  %v11827_v52 = vmax.f32 %v11826_v49, 0.0 }
 0x33a   :  { %v1932_v33 = vpop.f32.mrb[172].mxu1 }
 0x33b   :  { %11819 = vst [vmem:[#allocation53_spill] sm:$0xff] %v10191_v53  ;;  %v10195_v27 = vadd.f32 %v2183_v41, %v11821_v48  ;;  %v2093_v20 = vadd.f32 %v1932_v33, %v9997_v57  ;;  %v7660_v25 = vpop.f32.mrb[173].mxu1  ;;  %v11823_v41 = vld [vmem:[#allocation13_spill] sm:$0xff]  ;;  %8045 = vmatpush3.bf16.msra.mxu1 %v8753_v13 }
 0x33c   :  { %v1935_v37 = vpop.f32.mrb[174].mxu1  ;;  %v11824_v33 = vmax.f32 %v11823_v41, 0.0  ;;  %8046 = vmatprep.subr.bf16.mxu1 %v11795_v47  ;;  %v11832_v41 = vld [vmem:[#allocation16_spill] sm:$0xff] }
 0x33d   :  { %11822 = vst [vmem:[#allocation54_spill] sm:$0xff] %v10195_v27  ;;  %v10200_v31 = vpack.c.bf16 %v10195_v27, %v10191_v53  ;;  %v2142_v58 = vadd.f32 %v10182_v0, %v2093_v20  ;;  %v2094_v17 = vadd.f32 %v1935_v37, %v10000_v40  ;;  %v7661_v5 = vpop.f32.mrb[175].mxu1 }
 0x33f   :  { %v2184_v60 = vmax.f32 %v2142_v58, 0.0  ;;  %v2143_v36 = vadd.f32 %v10182_v0, %v2094_v17  ;;  %7759 = vmatmul.mubr.bf16.gmra.mrb[0].mxu0 %v10200_v31  ;;  %7863 = vmatmul.mubr.bf16.gmra.mrb[4].mxu1 %v10200_v31 }
 0x340   :  { %7762 = vmatprep.mubr.msk.bf16.mxu0 %vm9021_vm0, %v11795_v47  ;;  %7866 = vmatprep.mubr.msk.bf16.mxu1 %vm9021_vm0, %v11795_v47 }
 0x341   :  { %v2185_v57 = vmax.f32 %v2143_v36, 0.0  ;;  %v10216_v4 = vadd.f32 %v2184_v60, %v11824_v33  ;;  %8047 = vmatpush3.bf16.msra.mxu1 %v8754_v45  ;;  %v8756_v36 = vld [vmem:[#allocation6 + $0xe8] sm:$0xff]   ;;  %v11833_v33 = vmax.f32 %v11832_v41, 0.0  ;;  %v8757_v45 = vld [vmem:[#allocation6 + $0xf0] sm:$0xff]   ;;  %v11838_v41 = vld [vmem:[#allocation18_spill] sm:$0xff] }
 0x342   :  { %v1940_v40 = vpop.f32.mrb[176].mxu1  ;;  %8048 = vmatprep.subr.bf16.mxu1 %v11795_v47 }
 0x343   :  { %11825 = vst [vmem:[#allocation55_spill] sm:$0xff] %v10216_v4  ;;  %v10220_v6 = vadd.f32 %v2185_v57, %v11827_v52  ;;  %v2095_v48 = vadd.f32 %v1940_v40, %v10008_v51  ;;  %v7664_v20 = vpop.f32.mrb[177].mxu1  ;;  %v11829_v57 = vld [vmem:[#allocation15_spill] sm:$0xff] }
 0x344   :  { %v1943_v25 = vpop.f32.mrb[178].mxu1  ;;  %v11830_v40 = vmax.f32 %v11829_v57, 0.0 }
 0x345   :  { %11828 = vst [vmem:[#allocation56_spill] sm:$0xff] %v10220_v6  ;;  %v10225_v37 = vpack.c.bf16 %v10220_v6, %v10216_v4  ;;  %v2144_v58 = vadd.f32 %v10182_v0, %v2095_v48  ;;  %v2096_v17 = vadd.f32 %v1943_v25, %v10011_v59  ;;  %v7665_v5 = vpop.f32.mrb[179].mxu1  ;;  %8049 = vmatpush3.bf16.msra.mxu1 %v8756_v36  ;;  %v11835_v36 = vld [vmem:[#allocation17_spill] sm:$0xff] }
 0x346   :  { %8050 = vmatprep.subr.bf16.mxu1 %v11795_v47  ;;  %v11836_v57 = vmax.f32 %v11835_v36, 0.0  ;;  %v11844_v36 = vld [vmem:[#allocation20_spill] sm:$0xff] }
 0x347   :  { %v2186_v42 = vmax.f32 %v2144_v58, 0.0  ;;  %v2145_v60 = vadd.f32 %v10182_v0, %v2096_v17  ;;  %7763 = vmatmul.mubr.bf16.gmra.mrb[4].mxu0 %v10225_v37  ;;  %7867 = vmatmul.mubr.bf16.gmra.mrb[8].mxu1 %v10225_v37 }
 0x348   :  { %7766 = vmatprep.mubr.msk.bf16.mxu0 %vm9021_vm0, %v11795_v47  ;;  %7870 = vmatprep.mubr.msk.bf16.mxu1 %vm9021_vm0, %v11795_v47 }
 0x349   :  { %v2187_v51 = vmax.f32 %v2145_v60, 0.0  ;;  %v10240_v13 = vadd.f32 %v2186_v42, %v11830_v40  ;;  %8051 = vmatpush3.bf16.msra.mxu1 %v8757_v45 }
 0x34a   :  { %v1948_v59 = vpop.f32.mrb[180].mxu1  ;;  %8052 = vmatprep.subr.bf16.mxu1 %v11795_v47 }
 0x34b   :  { %11831 = vst [vmem:[#allocation57_spill] sm:$0xff] %v10240_v13  ;;  %v10244_v49 = vadd.f32 %v2187_v51, %v11833_v33  ;;  %v2097_v52 = vadd.f32 %v1948_v59, %v10019_v11  ;;  %v7668_v48 = vpop.f32.mrb[181].mxu1  ;;  %v8758_v59 = vld [vmem:[#allocation6 + $0xf8] sm:$0xff]   ;;  %v11839_v33 = vmax.f32 %v11838_v41, 0.0 }
 0x34c   :  { %v1951_v20 = vpop.f32.mrb[182].mxu1 }
 0x34d   :  { %11834 = vst [vmem:[#allocation58_spill] sm:$0xff] %v10244_v49  ;;  %v10249_v25 = vpack.c.bf16 %v10244_v49, %v10240_v13  ;;  %v2146_v58 = vadd.f32 %v10182_v0, %v2097_v52  ;;  %v2098_v17 = vadd.f32 %v1951_v20, %v10023_v7  ;;  %v7669_v5 = vpop.f32.mrb[183].mxu1  ;;  %v8755_v7 = vld [vmem:[#allocation6 + $0xb8] sm:$0xff]   ;;  %8053 = vmatpush3.bf16.msra.mxu1 %v8758_v59 }
 0x34e   :  { %7953 = vmatpush3.bf16.msra.mxu0 %v8755_v7  ;;  %8238 = vmatprep.subr.bf16.mxu1 %v11795_v47 }
 0x34f   :  { %v2188_v42 = vmax.f32 %v2146_v58, 0.0  ;;  %v2147_v60 = vadd.f32 %v10182_v0, %v2098_v17  ;;  %7767 = vmatmul.mubr.bf16.gmra.mrb[8].mxu0 %v10249_v25  ;;  %7871 = vmatmul.mubr.bf16.gmra.mrb[12].mxu1 %v10249_v25 }
 0x350   :  { %7770 = vmatprep.mubr.msk.bf16.mxu0 %vm9021_vm0, %v11795_v47  ;;  %7874 = vmatprep.mubr.msk.bf16.mxu1 %vm9021_vm0, %v11795_v47 }
 0x351   :  { %v2189_v11 = vmax.f32 %v2147_v60, 0.0  ;;  %v10264_v40 = vadd.f32 %v2188_v42, %v11836_v57  ;;  %8138 = vmatprep.subr.bf16.mxu0 %v11795_v47  ;;  %v11845_v57 = vmax.f32 %v11844_v36, 0.0 }
 0x352   :  { %v1956_v51 = vpop.f32.mrb[184].mxu1 }
 0x353   :  { %11837 = vst [vmem:[#allocation59_spill] sm:$0xff] %v10264_v40  ;;  %v10268_v52 = vadd.f32 %v2189_v11, %v11839_v33  ;;  %v2099_v48 = vadd.f32 %v1956_v51, %v10033_v56  ;;  %v7672_v20 = vpop.f32.mrb[185].mxu1 }
 0x354   :  { %v1959_v58 = vpop.f32.mrb[186].mxu1 }
 0x355   :  { %11840 = vst [vmem:[#allocation60_spill] sm:$0xff] %v10268_v52  ;;  %v10274_v17 = vpack.c.bf16 %v10268_v52, %v10264_v40  ;;  %v2148_v5 = vadd.f32 %v10182_v0, %v2099_v48  ;;  %v2100_v45 = vadd.f32 %v1959_v58, %v10037_v62  ;;  %v7673_v42 = vpop.f32.mrb[187].mxu1  ;;  %v11841_v62 = vld [vmem:[#allocation19_spill] sm:$0xff] }
 0x356   :  { %v11842_v51 = vmax.f32 %v11841_v62, 0.0 }
 0x357   :  { %v2190_v60 = vmax.f32 %v2148_v5, 0.0  ;;  %v2149_v56 = vadd.f32 %v10182_v0, %v2100_v45  ;;  %7771 = vmatmul.mubr.bf16.gmra.mrb[12].mxu0 %v10274_v17  ;;  %7875 = vmatmul.mubr.bf16.gmra.mrb[16].mxu1 %v10274_v17 }
 0x358   :  { %7774 = vmatprep.mubr.msk.bf16.mxu0 %vm9021_vm0, %v11795_v47  ;;  %7878 = vmatprep.mubr.msk.bf16.mxu1 %vm9021_vm0, %v11795_v47 }
 0x359   :  { %v2191_v11 = vmax.f32 %v2149_v56, 0.0  ;;  %v10288_v59 = vadd.f32 %v2190_v60, %v11842_v51 }
 0x35a   :  { %v1964_v7 = vpop.f32.mrb[188].mxu1 }
 0x35b   :  { %11843 = vst [vmem:[#allocation61_spill] sm:$0xff] %v10288_v59  ;;  %v10292_v41 = vadd.f32 %v2191_v11, %v11845_v57  ;;  %v2101_v33 = vadd.f32 %v1964_v7, %v10043_v54  ;;  %v7676_v48 = vpop.f32.mrb[189].mxu1  ;;  %v11847_v7 = vld [vmem:[#allocation21_spill] sm:$0xff] }
 0x35c   :  { %v1967_v20 = vpop.f32.mrb[190].mxu1  ;;  %v11848_v62 = vmax.f32 %v11847_v7, 0.0 }
 0x35d   :  { %11846 = vst [vmem:[#allocation11_spill] sm:$0xff] %v10292_v41  ;;  %v10297_v58 = vpack.c.bf16 %v10292_v41, %v10288_v59  ;;  %v2150_v5 = vadd.f32 %v10182_v0, %v2101_v33  ;;  %v2102_v45 = vadd.f32 %v1967_v20, %v10046_v34  ;;  %v7677_v42 = vpop.f32.mrb[191].mxu1  ;;  %v11850_v34 = vld [vmem:[#allocation22_spill] sm:$0xff]  ;;  %v8768_v41 = vld [vmem:[#allocation8 + $0x48] sm:$0xff]  }
 0x35e   :  { %v11851_v36 = vmax.f32 %v11850_v34, 0.0 }
 0x35f   :  { %v2192_v56 = vmax.f32 %v2150_v5, 0.0  ;;  %v2151_v60 = vadd.f32 %v10182_v0, %v2102_v45  ;;  %7775 = vmatmul.mubr.bf16.gmra.mrb[16].mxu0 %v10297_v58  ;;  %7879 = vmatmul.mubr.bf16.gmra.mrb[20].mxu1 %v10297_v58 }
 0x360   :  { %7778 = vmatprep.mubr.msk.bf16.mxu0 %vm9021_vm0, %v11795_v47  ;;  %7882 = vmatprep.mubr.msk.bf16.mxu1 %vm9021_vm0, %v11795_v47 }
 0x361   :  { %v2193_v54 = vmax.f32 %v2151_v60, 0.0  ;;  %v10310_v51 = vadd.f32 %v2192_v56, %v11848_v62 }
 0x362   :  { %v1972_v11 = vpop.f32.mrb[192].mxu1 }
 0x363   :  { %11849 = vst [vmem:[#allocation12_spill] sm:$0xff] %v10310_v51  ;;  %v10314_v57 = vadd.f32 %v2193_v54, %v11851_v36  ;;  %v2103_v33 = vadd.f32 %v1972_v11, %v10052_v14  ;;  %v7680_v48 = vpop.f32.mrb[193].mxu1  ;;  %v11853_v11 = vld [vmem:[#allocation23_spill] sm:$0xff] }
 0x364   :  { %v1975_v20 = vpop.f32.mrb[194].mxu1  ;;  %v11854_v62 = vmax.f32 %v11853_v11, 0.0 }
 0x365   :  { %11852 = vst [vmem:[#allocation13_spill] sm:$0xff] %v10314_v57  ;;  %v10319_v5 = vpack.c.bf16 %v10314_v57, %v10310_v51  ;;  %v2152_v45 = vadd.f32 %v10182_v0, %v2103_v33  ;;  %v2104_v42 = vadd.f32 %v1975_v20, %v10055_v1  ;;  %v7681_v60 = vpop.f32.mrb[195].mxu1  ;;  %v11856_v1 = vld [vmem:[#allocation24_spill] sm:$0xff] }
 0x366   :  { %v11857_v36 = vmax.f32 %v11856_v1, 0.0 }
 0x367   :  { %v2194_v7 = vmax.f32 %v2152_v45, 0.0  ;;  %v2153_v56 = vadd.f32 %v10182_v0, %v2104_v42  ;;  %7779 = vmatmul.mubr.bf16.gmra.mrb[20].mxu0 %v10319_v5  ;;  %7883 = vmatmul.mubr.bf16.gmra.mrb[24].mxu1 %v10319_v5 }
 0x368   :  { %7782 = vmatprep.mubr.msk.bf16.mxu0 %vm9021_vm0, %v11795_v47  ;;  %7886 = vmatprep.mubr.msk.bf16.mxu1 %vm9021_vm0, %v11795_v47 }
 0x369   :  { %v2195_v14 = vmax.f32 %v2153_v56, 0.0  ;;  %v10332_v34 = vadd.f32 %v2194_v7, %v11854_v62 }
 0x36a   :  { %v1980_v54 = vpop.f32.mrb[196].mxu1 }
 0x36b   :  { %11855 = vst [vmem:[#allocation14_spill] sm:$0xff] %v10332_v34  ;;  %v10336_v33 = vadd.f32 %v2195_v14, %v11857_v36  ;;  %v2105_v48 = vadd.f32 %v1980_v54, %v10062_v3  ;;  %v7684_v20 = vpop.f32.mrb[197].mxu1  ;;  %v11859_v54 = vld [vmem:[#allocation25_spill] sm:$0xff] }
 0x36c   :  { %v1983_v45 = vpop.f32.mrb[198].mxu1  ;;  %v11860_v62 = vmax.f32 %v11859_v54, 0.0 }
 0x36d   :  { %11858 = vst [vmem:[#allocation15_spill] sm:$0xff] %v10336_v33  ;;  %v10341_v42 = vpack.c.bf16 %v10336_v33, %v10332_v34  ;;  %v2154_v60 = vadd.f32 %v10182_v0, %v2105_v48  ;;  %v2106_v56 = vadd.f32 %v1983_v45, %v10065_v23  ;;  %v7685_v57 = vpop.f32.mrb[199].mxu1  ;;  %v11862_v23 = vld [vmem:[#allocation26_spill] sm:$0xff] }
 0x36e   :  { %v11863_v57 = vmax.f32 %v11862_v23, 0.0 }
 0x36f   :  { %v2196_v11 = vmax.f32 %v2154_v60, 0.0  ;;  %v2155_v7 = vadd.f32 %v10182_v0, %v2106_v56  ;;  %7783 = vmatmul.mubr.bf16.gmra.mrb[24].mxu0 %v10341_v42  ;;  %7887 = vmatmul.mubr.bf16.gmra.mrb[28].mxu1 %v10341_v42 }
 0x370   :  { %7786 = vmatprep.mubr.msk.bf16.mxu0 %vm9021_vm0, %v11795_v47  ;;  %7890 = vmatprep.mubr.msk.bf16.mxu1 %vm9021_vm0, %v11795_v47 }
 0x371   :  { %v2197_v3 = vmax.f32 %v2155_v7, 0.0  ;;  %v10354_v1 = vadd.f32 %v2196_v11, %v11860_v62 }
 0x372   :  { %v1988_v14 = vpop.f32.mrb[200].mxu1 }
 0x373   :  { %11861 = vst [vmem:[#allocation16_spill] sm:$0xff] %v10354_v1  ;;  %v10358_v36 = vadd.f32 %v2197_v3, %v11863_v57  ;;  %v2107_v48 = vadd.f32 %v1988_v14, %v10071_v44  ;;  %v7688_v20 = vpop.f32.mrb[201].mxu1  ;;  %v11865_v14 = vld [vmem:[#allocation27_spill] sm:$0xff] }
 0x374   :  { %v1991_v45 = vpop.f32.mrb[202].mxu1  ;;  %v11866_v62 = vmax.f32 %v11865_v14, 0.0 }
 0x375   :  { %11864 = vst [vmem:[#allocation17_spill] sm:$0xff] %v10358_v36  ;;  %v10363_v60 = vpack.c.bf16 %v10358_v36, %v10354_v1  ;;  %v2156_v56 = vadd.f32 %v10182_v0, %v2107_v48  ;;  %v2108_v7 = vadd.f32 %v1991_v45, %v10074_v30  ;;  %v7689_v33 = vpop.f32.mrb[203].mxu1  ;;  %v11868_v30 = vld [vmem:[#allocation28_spill] sm:$0xff] }
 0x376   :  { %v11869_v33 = vmax.f32 %v11868_v30, 0.0 }
 0x377   :  { %v2198_v54 = vmax.f32 %v2156_v56, 0.0  ;;  %v2157_v11 = vadd.f32 %v10182_v0, %v2108_v7  ;;  %7787 = vmatmul.mubr.bf16.gmra.mrb[28].mxu0 %v10363_v60  ;;  %7891 = vmatmul.mubr.bf16.gmra.mrb[32].mxu1 %v10363_v60 }
 0x378   :  { %7790 = vmatprep.mubr.msk.bf16.mxu0 %vm9021_vm0, %v11795_v47  ;;  %7894 = vmatprep.mubr.msk.bf16.mxu1 %vm9021_vm0, %v11795_v47 }
 0x379   :  { %v2199_v44 = vmax.f32 %v2157_v11, 0.0  ;;  %v10376_v23 = vadd.f32 %v2198_v54, %v11866_v62 }
 0x37a   :  { %v1996_v3 = vpop.f32.mrb[204].mxu1 }
 0x37b   :  { %11867 = vst [vmem:[#allocation18_spill] sm:$0xff] %v10376_v23  ;;  %v10380_v57 = vadd.f32 %v2199_v44, %v11869_v33  ;;  %v2109_v48 = vadd.f32 %v1996_v3, %v10080_v24  ;;  %v7692_v20 = vpop.f32.mrb[205].mxu1  ;;  %v10396_v24 = vpop.f32.mrb[252].mxu0  ;;  %v11874_v33 = vld [vmem:[#allocation30_spill] sm:$0xff] }
 0x37c   :  { %v1999_v45 = vpop.f32.mrb[206].mxu1  ;;  %v7756_v3 = vpop.f32.mrb[253].mxu0 }
 0x37d   :  { %11870 = vst [vmem:[#allocation19_spill] sm:$0xff] %v10380_v57  ;;  %v10385_v56 = vpack.c.bf16 %v10380_v57, %v10376_v23  ;;  %v2158_v7 = vadd.f32 %v10182_v0, %v2109_v48  ;;  %v2110_v11 = vadd.f32 %v1999_v45, %v10083_v16  ;;  %v7693_v36 = vpop.f32.mrb[207].mxu1  ;;  %v11871_v16 = vld [vmem:[#allocation29_spill] sm:$0xff]  ;;  %v11875_v48 = vmax.f32 %v11874_v33, 0.0 }
 0x37e   :  { %v11872_v36 = vmax.f32 %v11871_v16, 0.0 }
 0x37f   :  { %v2200_v14 = vmax.f32 %v2158_v7, 0.0  ;;  %v2159_v54 = vadd.f32 %v10182_v0, %v2110_v11  ;;  %7791 = vmatmul.mubr.bf16.gmra.mrb[32].mxu0 %v10385_v56  ;;  %7895 = vmatmul.mubr.bf16.gmra.mrb[36].mxu1 %v10385_v56 }
 0x380   :  { %7794 = vmatprep.mubr.msk.bf16.mxu0 %vm9021_vm0, %v11795_v47  ;;  %7898 = vmatprep.mubr.msk.bf16.mxu1 %vm9021_vm0, %v11795_v47 }
 0x381   :  { %v2201_v44 = vmax.f32 %v2159_v54, 0.0  ;;  %v10400_v30 = vadd.f32 %v2200_v14, %v11872_v36 }
 0x382   :  { %v2004_v62 = vpop.f32.mrb[208].mxu1 }
 0x383   :  { %11873 = vst [vmem:[#allocation20_spill] sm:$0xff] %v10400_v30  ;;  %v10404_v20 = vadd.f32 %v2201_v44, %v11875_v48  ;;  %v2111_v45 = vadd.f32 %v2004_v62, %v10090_v38  ;;  %v7696_v7 = vpop.f32.mrb[209].mxu1  ;;  %v10416_v44 = vpop.f32.mrb[254].mxu0  ;;  %v11880_v48 = vld [vmem:[#allocation32_spill] sm:$0xff] }
 0x384   :  { %v2007_v11 = vpop.f32.mrb[210].mxu1  ;;  %v7757_v38 = vpop.f32.mrb[255].mxu0 }
 0x385   :  { %11876 = vst [vmem:[#allocation21_spill] sm:$0xff] %v10404_v20  ;;  %v10409_v57 = vpack.c.bf16 %v10404_v20, %v10400_v30  ;;  %v2160_v54 = vadd.f32 %v10182_v0, %v2111_v45  ;;  %v2112_v3 = vadd.f32 %v2007_v11, %v10093_v46  ;;  %v7697_v23 = vpop.f32.mrb[211].mxu1  ;;  %v11877_v46 = vld [vmem:[#allocation31_spill] sm:$0xff]  ;;  %v11881_v45 = vmax.f32 %v11880_v48, 0.0 }
 0x386   :  { %v11878_v23 = vmax.f32 %v11877_v46, 0.0 }
 0x387   :  { %v2202_v16 = vmax.f32 %v2160_v54, 0.0  ;;  %v2161_v14 = vadd.f32 %v10182_v0, %v2112_v3  ;;  %7795 = vmatmul.mubr.bf16.gmra.mrb[36].mxu0 %v10409_v57  ;;  %7899 = vmatmul.mubr.bf16.gmra.mrb[40].mxu1 %v10409_v57 }
 0x388   :  { %7798 = vmatprep.mubr.msk.bf16.mxu0 %vm9021_vm0, %v11795_v47  ;;  %7902 = vmatprep.mubr.msk.bf16.mxu1 %vm9021_vm0, %v11795_v47 }
 0x389   :  { %v2203_v62 = vmax.f32 %v2161_v14, 0.0  ;;  %v10424_v33 = vadd.f32 %v2202_v16, %v11878_v23 }
 0x38a   :  { %v2012_v36 = vpop.f32.mrb[212].mxu1 }
 0x38b   :  { %11879 = vst [vmem:[#allocation22_spill] sm:$0xff] %v10424_v33  ;;  %v10428_v7 = vadd.f32 %v2203_v62, %v11881_v45  ;;  %v2113_v11 = vadd.f32 %v2012_v36, %v10099_v43  ;;  %v7700_v54 = vpop.f32.mrb[213].mxu1  ;;  %v11883_v36 = vld [vmem:[#allocation33_spill] sm:$0xff] }
 0x38c   :  { %v2015_v3 = vpop.f32.mrb[214].mxu1  ;;  %v11884_v23 = vmax.f32 %v11883_v36, 0.0 }
 0x38d   :  { %11882 = vst [vmem:[#allocation23_spill] sm:$0xff] %v10428_v7  ;;  %v10433_v20 = vpack.c.bf16 %v10428_v7, %v10424_v33  ;;  %v2162_v38 = vadd.f32 %v10182_v0, %v2113_v11  ;;  %v2114_v14 = vadd.f32 %v2015_v3, %v10102_v19  ;;  %v7701_v30 = vpop.f32.mrb[215].mxu1  ;;  %v11886_v19 = vld [vmem:[#allocation34_spill] sm:$0xff] }
 0x38e   :  { %v11887_v30 = vmax.f32 %v11886_v19, 0.0 }
 0x38f   :  { %v2204_v46 = vmax.f32 %v2162_v38, 0.0  ;;  %v2163_v16 = vadd.f32 %v10182_v0, %v2114_v14  ;;  %7799 = vmatmul.mubr.bf16.gmra.mrb[40].mxu0 %v10433_v20  ;;  %7903 = vmatmul.mubr.bf16.gmra.mrb[44].mxu1 %v10433_v20 }
 0x390   :  { %7802 = vmatprep.mubr.msk.bf16.mxu0 %vm9021_vm0, %v11795_v47  ;;  %7906 = vmatprep.mubr.msk.bf16.mxu1 %vm9021_vm0, %v11795_v47 }
 0x391   :  { %v2205_v43 = vmax.f32 %v2163_v16, 0.0  ;;  %v10446_v48 = vadd.f32 %v2204_v46, %v11884_v23 }
 0x392   :  { %v2020_v62 = vpop.f32.mrb[216].mxu1 }
 0x393   :  { %11885 = vst [vmem:[#allocation24_spill] sm:$0xff] %v10446_v48  ;;  %v10450_v45 = vadd.f32 %v2205_v43, %v11887_v30  ;;  %v2115_v11 = vadd.f32 %v2020_v62, %v10109_v28  ;;  %v7704_v54 = vpop.f32.mrb[217].mxu1  ;;  %v11889_v62 = vld [vmem:[#allocation35_spill] sm:$0xff] }
 0x394   :  { %v2023_v3 = vpop.f32.mrb[218].mxu1  ;;  %v11890_v23 = vmax.f32 %v11889_v62, 0.0 }
 0x395   :  { %11888 = vst [vmem:[#allocation25_spill] sm:$0xff] %v10450_v45  ;;  %v10455_v38 = vpack.c.bf16 %v10450_v45, %v10446_v48  ;;  %v2164_v14 = vadd.f32 %v10182_v0, %v2115_v11  ;;  %v2116_v16 = vadd.f32 %v2023_v3, %v10112_v63  ;;  %v7705_v7 = vpop.f32.mrb[219].mxu1  ;;  %v11892_v63 = vld [vmem:[#allocation36_spill] sm:$0xff] }
 0x396   :  { %v11893_v7 = vmax.f32 %v11892_v63, 0.0 }
 0x397   :  { %v2206_v36 = vmax.f32 %v2164_v14, 0.0  ;;  %v2165_v46 = vadd.f32 %v10182_v0, %v2116_v16  ;;  %7803 = vmatmul.mubr.bf16.gmra.mrb[44].mxu0 %v10455_v38  ;;  %7907 = vmatmul.mubr.bf16.gmra.mrb[48].mxu1 %v10455_v38 }
 0x398   :  { %7806 = vmatprep.mubr.msk.bf16.mxu0 %vm9021_vm0, %v11795_v47  ;;  %7910 = vmatprep.mubr.msk.bf16.mxu1 %vm9021_vm0, %v11795_v47 }
 0x399   :  { %v2207_v28 = vmax.f32 %v2165_v46, 0.0  ;;  %v10468_v19 = vadd.f32 %v2206_v36, %v11890_v23 }
 0x39a   :  { %v2028_v43 = vpop.f32.mrb[220].mxu1 }
 0x39b   :  { %11891 = vst [vmem:[#allocation26_spill] sm:$0xff] %v10468_v19  ;;  %v10472_v30 = vadd.f32 %v2207_v28, %v11893_v7  ;;  %v2117_v11 = vadd.f32 %v2028_v43, %v10118_v29  ;;  %v7708_v54 = vpop.f32.mrb[221].mxu1  ;;  %v11895_v43 = vld [vmem:[#allocation37_spill] sm:$0xff] }
 0x39c   :  { %v2031_v3 = vpop.f32.mrb[222].mxu1  ;;  %v11896_v23 = vmax.f32 %v11895_v43, 0.0 }
 0x39d   :  { %11894 = vst [vmem:[#allocation27_spill] sm:$0xff] %v10472_v30  ;;  %v10477_v14 = vpack.c.bf16 %v10472_v30, %v10468_v19  ;;  %v2166_v16 = vadd.f32 %v10182_v0, %v2117_v11  ;;  %v2118_v46 = vadd.f32 %v2031_v3, %v10121_v21  ;;  %v7709_v45 = vpop.f32.mrb[223].mxu1  ;;  %v11898_v21 = vld [vmem:[#allocation38_spill] sm:$0xff]  ;;  %v8767_v19 = vld [vmem:[#allocation8 + $0x40] sm:$0xff]  }
 0x39e   :  { %v11899_v45 = vmax.f32 %v11898_v21, 0.0 }
 0x39f   :  { %v2208_v62 = vmax.f32 %v2166_v16, 0.0  ;;  %v2167_v36 = vadd.f32 %v10182_v0, %v2118_v46  ;;  %7807 = vmatmul.mubr.bf16.gmra.mrb[48].mxu0 %v10477_v14  ;;  %7911 = vmatmul.mubr.bf16.gmra.mrb[52].mxu1 %v10477_v14 }
 0x3a0   :  { %7810 = vmatprep.mubr.msk.bf16.mxu0 %vm9021_vm0, %v11795_v47  ;;  %7914 = vmatprep.mubr.msk.bf16.mxu1 %vm9021_vm0, %v11795_v47 }
 0x3a1   :  { %v2209_v29 = vmax.f32 %v2167_v36, 0.0  ;;  %v10490_v63 = vadd.f32 %v2208_v62, %v11896_v23 }
 0x3a2   :  { %v2036_v28 = vpop.f32.mrb[224].mxu1 }
 0x3a3   :  { %11897 = vst [vmem:[#allocation28_spill] sm:$0xff] %v10490_v63  ;;  %v10494_v7 = vadd.f32 %v2209_v29, %v11899_v45  ;;  %v2119_v11 = vadd.f32 %v2036_v28, %v10127_v50  ;;  %v7712_v54 = vpop.f32.mrb[225].mxu1  ;;  %v11901_v28 = vld [vmem:[#allocation39_spill] sm:$0xff] }
 0x3a4   :  { %v2039_v3 = vpop.f32.mrb[226].mxu1  ;;  %v11902_v23 = vmax.f32 %v11901_v28, 0.0 }
 0x3a5   :  { %11900 = vst [vmem:[#allocation29_spill] sm:$0xff] %v10494_v7  ;;  %v10499_v16 = vpack.c.bf16 %v10494_v7, %v10490_v63  ;;  %v2168_v46 = vadd.f32 %v10182_v0, %v2119_v11  ;;  %v2120_v36 = vadd.f32 %v2039_v3, %v10130_v35  ;;  %v7713_v30 = vpop.f32.mrb[227].mxu1  ;;  %v11904_v35 = vld [vmem:[#allocation40_spill] sm:$0xff] }
 0x3a6   :  { %v11905_v30 = vmax.f32 %v11904_v35, 0.0 }
 0x3a7   :  { %v2210_v43 = vmax.f32 %v2168_v46, 0.0  ;;  %v2169_v62 = vadd.f32 %v10182_v0, %v2120_v36  ;;  %7811 = vmatmul.mubr.bf16.gmra.mrb[52].mxu0 %v10499_v16  ;;  %7915 = vmatmul.mubr.bf16.gmra.mrb[56].mxu1 %v10499_v16 }
 0x3a8   :  { %7814 = vmatprep.mubr.msk.bf16.mxu0 %vm9021_vm0, %v11795_v47  ;;  %7918 = vmatprep.mubr.msk.bf16.mxu1 %vm9021_vm0, %v11795_v47 }
 0x3a9   :  { %v2211_v50 = vmax.f32 %v2169_v62, 0.0  ;;  %v10512_v21 = vadd.f32 %v2210_v43, %v11902_v23 }
 0x3aa   :  { %v2044_v29 = vpop.f32.mrb[228].mxu1 }
 0x3ab   :  { %11903 = vst [vmem:[#allocation30_spill] sm:$0xff] %v10512_v21  ;;  %v10516_v45 = vadd.f32 %v2211_v50, %v11905_v30  ;;  %v2121_v11 = vadd.f32 %v2044_v29, %v10137_v26  ;;  %v7716_v54 = vpop.f32.mrb[229].mxu1  ;;  %v11907_v29 = vld [vmem:[#allocation41_spill] sm:$0xff] }
 0x3ac   :  { %v2047_v3 = vpop.f32.mrb[230].mxu1  ;;  %v11908_v23 = vmax.f32 %v11907_v29, 0.0 }
 0x3ad   :  { %11906 = vst [vmem:[#allocation31_spill] sm:$0xff] %v10516_v45  ;;  %v10521_v46 = vpack.c.bf16 %v10516_v45, %v10512_v21  ;;  %v2170_v36 = vadd.f32 %v10182_v0, %v2121_v11  ;;  %v2122_v62 = vadd.f32 %v2047_v3, %v10140_v55  ;;  %v7717_v7 = vpop.f32.mrb[231].mxu1  ;;  %v11910_v55 = vld [vmem:[#allocation42_spill] sm:$0xff] }
 0x3ae   :  { %v11911_v7 = vmax.f32 %v11910_v55, 0.0 }
 0x3af   :  { %v2212_v28 = vmax.f32 %v2170_v36, 0.0  ;;  %v2171_v43 = vadd.f32 %v10182_v0, %v2122_v62  ;;  %7815 = vmatmul.mubr.bf16.gmra.mrb[56].mxu0 %v10521_v46  ;;  %7919 = vmatmul.mubr.bf16.gmra.mrb[60].mxu1 %v10521_v46 }
 0x3b0   :  { %7818 = vmatprep.mubr.msk.bf16.mxu0 %vm9021_vm0, %v11795_v47  ;;  %7922 = vmatprep.mubr.msk.bf16.mxu1 %vm9021_vm0, %v11795_v47 }
 0x3b1   :  { %v2213_v26 = vmax.f32 %v2171_v43, 0.0  ;;  %v10534_v35 = vadd.f32 %v2212_v28, %v11908_v23 }
 0x3b2   :  { %v2052_v50 = vpop.f32.mrb[232].mxu1 }
 0x3b3   :  { %11909 = vst [vmem:[#allocation32_spill] sm:$0xff] %v10534_v35  ;;  %v10538_v30 = vadd.f32 %v2213_v26, %v11911_v7  ;;  %v2123_v11 = vadd.f32 %v2052_v50, %v10146_v39  ;;  %v7720_v54 = vpop.f32.mrb[233].mxu1  ;;  %v11913_v50 = vld [vmem:[#allocation43_spill] sm:$0xff] }
 0x3b4   :  { %v2055_v3 = vpop.f32.mrb[234].mxu1  ;;  %v11914_v23 = vmax.f32 %v11913_v50, 0.0 }
 0x3b5   :  { %11912 = vst [vmem:[#allocation33_spill] sm:$0xff] %v10538_v30  ;;  %v10543_v36 = vpack.c.bf16 %v10538_v30, %v10534_v35  ;;  %v2172_v62 = vadd.f32 %v10182_v0, %v2123_v11  ;;  %v2124_v43 = vadd.f32 %v2055_v3, %v10149_v12  ;;  %v7721_v45 = vpop.f32.mrb[235].mxu1  ;;  %v11916_v12 = vld [vmem:[#allocation44_spill] sm:$0xff] }
 0x3b6   :  { %v11917_v45 = vmax.f32 %v11916_v12, 0.0 }
 0x3b7   :  { %v2214_v29 = vmax.f32 %v2172_v62, 0.0  ;;  %v2173_v28 = vadd.f32 %v10182_v0, %v2124_v43  ;;  %7819 = vmatmul.mubr.bf16.gmra.mrb[60].mxu0 %v10543_v36  ;;  %7923 = vmatmul.mubr.bf16.gmra.mrb[64].mxu1 %v10543_v36 }
 0x3b8   :  { %7822 = vmatprep.mubr.msk.bf16.mxu0 %vm9021_vm0, %v11795_v47  ;;  %7926 = vmatprep.mubr.msk.bf16.mxu1 %vm9021_vm0, %v11795_v47 }
 0x3b9   :  { %v2215_v39 = vmax.f32 %v2173_v28, 0.0  ;;  %v10556_v55 = vadd.f32 %v2214_v29, %v11914_v23 }
 0x3ba   :  { %v2060_v26 = vpop.f32.mrb[236].mxu1 }
 0x3bb   :  { %11915 = vst [vmem:[#allocation34_spill] sm:$0xff] %v10556_v55  ;;  %v10560_v7 = vadd.f32 %v2215_v39, %v11917_v45  ;;  %v2125_v11 = vadd.f32 %v2060_v26, %v10156_v18  ;;  %v7724_v54 = vpop.f32.mrb[237].mxu1  ;;  %v11919_v26 = vld [vmem:[#allocation45_spill] sm:$0xff] }
 0x3bc   :  { %v2063_v3 = vpop.f32.mrb[238].mxu1  ;;  %v11920_v23 = vmax.f32 %v11919_v26, 0.0 }
 0x3bd   :  { %11918 = vst [vmem:[#allocation35_spill] sm:$0xff] %v10560_v7  ;;  %v10565_v62 = vpack.c.bf16 %v10560_v7, %v10556_v55  ;;  %v2174_v43 = vadd.f32 %v10182_v0, %v2125_v11  ;;  %v2126_v28 = vadd.f32 %v2063_v3, %v10158_v61  ;;  %v7725_v30 = vpop.f32.mrb[239].mxu1  ;;  %v11922_v61 = vld [vmem:[#allocation46_spill] sm:$0xff] }
 0x3be   :  { %v11923_v30 = vmax.f32 %v11922_v61, 0.0 }
 0x3bf   :  { %v2216_v50 = vmax.f32 %v2174_v43, 0.0  ;;  %v2175_v29 = vadd.f32 %v10182_v0, %v2126_v28  ;;  %7823 = vmatmul.mubr.bf16.gmra.mrb[64].mxu0 %v10565_v62  ;;  %7927 = vmatmul.mubr.bf16.gmra.mrb[68].mxu1 %v10565_v62 }
 0x3c0   :  { %7826 = vmatprep.mubr.msk.bf16.mxu0 %vm9021_vm0, %v11795_v47  ;;  %7930 = vmatprep.mubr.msk.bf16.mxu1 %vm9021_vm0, %v11795_v47 }
 0x3c1   :  { %v2217_v18 = vmax.f32 %v2175_v29, 0.0  ;;  %v10578_v12 = vadd.f32 %v2216_v50, %v11920_v23 }
 0x3c2   :  { %v2068_v39 = vpop.f32.mrb[240].mxu1 }
 0x3c3   :  { %11921 = vst [vmem:[#allocation36_spill] sm:$0xff] %v10578_v12  ;;  %v10582_v45 = vadd.f32 %v2217_v18, %v11923_v30  ;;  %v2127_v11 = vadd.f32 %v2068_v39, %v10162_v15  ;;  %v7728_v54 = vpop.f32.mrb[241].mxu1  ;;  %v11925_v39 = vld [vmem:[#allocation47_spill] sm:$0xff] }
 0x3c4   :  { %v2071_v3 = vpop.f32.mrb[242].mxu1  ;;  %v11926_v23 = vmax.f32 %v11925_v39, 0.0 }
 0x3c5   :  { %11924 = vst [vmem:[#allocation37_spill] sm:$0xff] %v10582_v45  ;;  %v10587_v43 = vpack.c.bf16 %v10582_v45, %v10578_v12  ;;  %v2176_v28 = vadd.f32 %v10182_v0, %v2127_v11  ;;  %v2128_v29 = vadd.f32 %v2071_v3, %v10164_v8  ;;  %v7729_v7 = vpop.f32.mrb[243].mxu1  ;;  %v11928_v8 = vld [vmem:[#allocation48_spill] sm:$0xff] }
 0x3c6   :  { %v11929_v7 = vmax.f32 %v11928_v8, 0.0 }
 0x3c7   :  { %v2218_v26 = vmax.f32 %v2176_v28, 0.0  ;;  %v2177_v50 = vadd.f32 %v10182_v0, %v2128_v29  ;;  %7827 = vmatmul.mubr.bf16.gmra.mrb[68].mxu0 %v10587_v43  ;;  %7931 = vmatmul.mubr.bf16.gmra.mrb[72].mxu1 %v10587_v43 }
 0x3c8   :  { %7830 = vmatprep.mubr.msk.bf16.mxu0 %vm9021_vm0, %v11795_v47  ;;  %7934 = vmatprep.mubr.msk.bf16.mxu1 %vm9021_vm0, %v11795_v47 }
 0x3c9   :  { %v2219_v15 = vmax.f32 %v2177_v50, 0.0  ;;  %v10600_v61 = vadd.f32 %v2218_v26, %v11926_v23 }
 0x3ca   :  { %v2076_v18 = vpop.f32.mrb[244].mxu1 }
 0x3cb   :  { %11927 = vst [vmem:[#allocation38_spill] sm:$0xff] %v10600_v61  ;;  %v10604_v30 = vadd.f32 %v2219_v15, %v11929_v7  ;;  %v2129_v11 = vadd.f32 %v2076_v18, %v10168_v10  ;;  %v7732_v54 = vpop.f32.mrb[245].mxu1  ;;  %v11931_v18 = vld [vmem:[#allocation49_spill] sm:$0xff] }
 0x3cc   :  { %v2079_v3 = vpop.f32.mrb[246].mxu1  ;;  %v11932_v23 = vmax.f32 %v11931_v18, 0.0 }
 0x3cd   :  { %11930 = vst [vmem:[#allocation39_spill] sm:$0xff] %v10604_v30  ;;  %v10609_v28 = vpack.c.bf16 %v10604_v30, %v10600_v61  ;;  %v2178_v29 = vadd.f32 %v10182_v0, %v2129_v11  ;;  %v2130_v50 = vadd.f32 %v2079_v3, %v10170_v22  ;;  %v7733_v45 = vpop.f32.mrb[247].mxu1  ;;  %v11934_v22 = vld [vmem:[#allocation50_spill] sm:$0xff] }
 0x3ce   :  { %v11935_v45 = vmax.f32 %v11934_v22, 0.0 }
 0x3cf   :  { %v2220_v39 = vmax.f32 %v2178_v29, 0.0  ;;  %v2179_v26 = vadd.f32 %v10182_v0, %v2130_v50  ;;  %7831 = vmatmul.mubr.bf16.gmra.mrb[72].mxu0 %v10609_v28  ;;  %7935 = vmatmul.mubr.bf16.gmra.mrb[76].mxu1 %v10609_v28 }
 0x3d0   :  { %7834 = vmatprep.mubr.msk.bf16.mxu0 %vm9021_vm0, %v11795_v47  ;;  %8054 = vmatprep.mubr.msk.bf16.mxu1 %vm9021_vm0, %v11795_v47 }
 0x3d1   :  { %v2221_v10 = vmax.f32 %v2179_v26, 0.0  ;;  %v10622_v8 = vadd.f32 %v2220_v39, %v11932_v23  ;;  %v8760_v23 = vld [vmem:[#allocation6 + $0x108] sm:$0xff]  }
 0x3d2   :  { %v2084_v15 = vpop.f32.mrb[248].mxu1 }
 0x3d3   :  { %11933 = vst [vmem:[#allocation40_spill] sm:$0xff] %v10622_v8  ;;  %v10626_v7 = vadd.f32 %v2221_v10, %v11935_v45  ;;  %v10629_v0 = vadd.f32 %v2084_v15, %v10175_v32  ;;  %v7736_v11 = vpop.f32.mrb[249].mxu1  ;;  %v8759_v10 = vld [vmem:[#allocation6 + $0x100] sm:$0xff]   ;;  %v8761_v45 = vld [vmem:[#allocation6 + $0x110] sm:$0xff]  }
 0x3d4   :  { %v2087_v54 = vpop.f32.mrb[250].mxu1  ;;  %v8762_v11 = vld [vmem:[#allocation6 + $0x118] sm:$0xff]  }
 0x3d5   :  { %11936 = vst [vmem:[#allocation41_spill] sm:$0xff] %v10626_v7  ;;  %v10633_v3 = vpack.c.bf16 %v10626_v7, %v10622_v8  ;;  %v10636_v29 = vadd.f32 %v2087_v54, %v10177_v2  ;;  %v7737_v50 = vpop.f32.mrb[251].mxu1  ;;  %v8763_v54 = vld [vmem:[#allocation6 + $0x120] sm:$0xff]  }
 0x3d6   :  { %v8765_v50 = vld [vmem:[#allocation6 + $0x130] sm:$0xff]  }
 0x3d7   :  { %7835 = vmatmul.mubr.bf16.gmra.mrb[76].mxu0 %v10633_v3  ;;  %8055 = vmatmul.mubr.bf16.vlgmr.msra.gmra.mrb[80].mxu1 %v10225_v37 }
 0x3d8   :  { %7954 = vmatprep.mubr.msk.bf16.mxu0 %vm9021_vm0, %v11795_v47  ;;  %8058 = vmatprep.mubr.msk.bf16.mxu1 %vm9021_vm0, %v11795_v47 }
 0x3d9   :  { %8239 = vmatpush3.bf16.msra.mxu1 %v8767_v19 }
 0x3da   :  { %v2694_v32 = vpop.f32.mrb[252].mxu1  ;;  %8240 = vmatprep.subr.bf16.mxu1 %v11795_v47 }
 0x3db   :  { %v10645_v39 = vadd.f32 %v2694_v32, %v10396_v24  ;;  %v7856_v26 = vpop.f32.mrb[253].mxu1  ;;  %v8766_v32 = vld [vmem:[#allocation6 + $0x138] sm:$0xff]  }
 0x3dc   :  { %v2697_v15 = vpop.f32.mrb[254].mxu1 }
 0x3dd   :  { %v10648_v2 = vadd.f32 %v2697_v15, %v10416_v44  ;;  %v7857_v18 = vpop.f32.mrb[255].mxu1  ;;  %8241 = vmatpush3.bf16.msra.mxu1 %v8768_v41  ;;  %v11937_v41 = vld [vmem:[#allocation52_spill] sm:$0xff] }
 0x3de   :  { %8242 = vmatprep.subr.bf16.mxu1 %v11795_v47 }
 0x3df   :  { %7955 = vmatmul.mubr.bf16.vlgmr.msra.gmra.mrb[80].mxu0 %v10200_v31  ;;  %8059 = vmatmul.mubr.bf16.gmra.mrb[84].mxu1 %v10249_v25 }
 0x3e0   :  { %8139 = vmatpush3.bf16.msra.mxu0 %v8759_v10  ;;  %7958 = vmatprep.mubr.msk.bf16.mxu0 %vm9021_vm0, %v11795_v47 }
 0x3e1   :  { %8062 = vmatprep.mubr.msk.bf16.mxu1 %vm9021_vm0, %v11795_v47  ;;  %8140 = vmatprep.subr.bf16.mxu0 %v11795_v47 }
 0x3e2   :  { %v2702_v24 = vpop.f32.mrb[0].mxu1 }
 0x3e3   :  { %v7860_v22 = vpop.f32.mrb[1].mxu1 }
 0x3e4   :  { %8141 = vmatpush3.bf16.msra.mxu0 %v8760_v23  ;;  %v2705_v44 = vpop.f32.mrb[2].mxu1 }
 0x3e5   :  { %8142 = vmatprep.subr.bf16.mxu0 %v11795_v47  ;;  %v7861_v31 = vpop.f32.mrb[3].mxu1 }
 0x3e7   :  { %7959 = vmatmul.mubr.bf16.gmra.mrb[84].mxu0 %v10225_v37  ;;  %8063 = vmatmul.mubr.bf16.gmra.mrb[88].mxu1 %v10274_v17  ;;  %v8764_v37 = vld [vmem:[#allocation6 + $0x128] sm:$0xff]  }
 0x3e8   :  { %7962 = vmatprep.mubr.msk.bf16.mxu0 %vm9021_vm0, %v11795_v47  ;;  %8066 = vmatprep.mubr.msk.bf16.mxu1 %vm9021_vm0, %v11795_v47 }
 0x3e9   :  { %8143 = vmatpush3.bf16.msra.mxu0 %v8761_v45 }
 0x3ea   :  { %8144 = vmatprep.subr.bf16.mxu0 %v11795_v47 }
 0x3ed   :  { %8145 = vmatpush3.bf16.msra.mxu0 %v8762_v11 }
 0x3ee   :  { %8146 = vmatprep.subr.bf16.mxu0 %v11795_v47 }
 0x3ef   :  { %7963 = vmatmul.mubr.bf16.gmra.mrb[88].mxu0 %v10249_v25  ;;  %8067 = vmatmul.mubr.bf16.gmra.mrb[92].mxu1 %v10297_v58 }
 0x3f0   :  { %7966 = vmatprep.mubr.msk.bf16.mxu0 %vm9021_vm0, %v11795_v47  ;;  %8070 = vmatprep.mubr.msk.bf16.mxu1 %vm9021_vm0, %v11795_v47 }
 0x3f1   :  { %8147 = vmatpush3.bf16.msra.mxu0 %v8763_v54 }
 0x3f2   :  { %8148 = vmatprep.subr.bf16.mxu0 %v11795_v47 }
 0x3f5   :  { %8149 = vmatpush3.bf16.msra.mxu0 %v8764_v37 }
 0x3f6   :  { %8150 = vmatprep.subr.bf16.mxu0 %v11795_v47 }
 0x3f7   :  { %7967 = vmatmul.mubr.bf16.gmra.mrb[92].mxu0 %v10274_v17  ;;  %8071 = vmatmul.mubr.bf16.gmra.mrb[96].mxu1 %v10319_v5 }
 0x3f8   :  { %7970 = vmatprep.mubr.msk.bf16.mxu0 %vm9021_vm0, %v11795_v47  ;;  %8074 = vmatprep.mubr.msk.bf16.mxu1 %vm9021_vm0, %v11795_v47 }
 0x3f9   :  { %8151 = vmatpush3.bf16.msra.mxu0 %v8765_v50 }
 0x3fa   :  { %8152 = vmatprep.subr.bf16.mxu0 %v11795_v47 }
 0x3fd   :  { %8153 = vmatpush3.bf16.msra.mxu0 %v8766_v32 }
 0x3fe   :  { %8338 = vmatprep.subr.bf16.mxu0 %v11795_v47 }
 0x3ff   :  { %7971 = vmatmul.mubr.bf16.gmra.mrb[96].mxu0 %v10297_v58  ;;  %8075 = vmatmul.mubr.bf16.gmra.mrb[100].mxu1 %v10341_v42 }
 0x400   :  { %7974 = vmatprep.mubr.msk.bf16.mxu0 %vm9021_vm0, %v11795_v47  ;;  %8078 = vmatprep.mubr.msk.bf16.mxu1 %vm9021_vm0, %v11795_v47 }
 0x407   :  { %7975 = vmatmul.mubr.bf16.gmra.mrb[100].mxu0 %v10319_v5  ;;  %8079 = vmatmul.mubr.bf16.gmra.mrb[104].mxu1 %v10363_v60 }
 0x408   :  { %7978 = vmatprep.mubr.msk.bf16.mxu0 %vm9021_vm0, %v11795_v47  ;;  %8082 = vmatprep.mubr.msk.bf16.mxu1 %vm9021_vm0, %v11795_v47 }
 0x40f   :  { %7979 = vmatmul.mubr.bf16.gmra.mrb[104].mxu0 %v10341_v42  ;;  %8083 = vmatmul.mubr.bf16.gmra.mrb[108].mxu1 %v10385_v56 }
 0x410   :  { %7982 = vmatprep.mubr.msk.bf16.mxu0 %vm9021_vm0, %v11795_v47  ;;  %8086 = vmatprep.mubr.msk.bf16.mxu1 %vm9021_vm0, %v11795_v47 }
 0x412   :  { %v2453_v26 = vpop.f32.mrb[0].mxu0  ;;  %v2710_v10 = vpop.f32.mrb[4].mxu1 }
 0x413   :  { %v7760_v15 = vpop.f32.mrb[1].mxu0  ;;  %v7864_v18 = vpop.f32.mrb[5].mxu1  ;;  %v10700_v23 = vadd.f32 %v2702_v24, %v2453_v26 }
 0x414   :  { %v2456_v22 = vpop.f32.mrb[2].mxu0  ;;  %v2713_v45 = vpop.f32.mrb[6].mxu1 }
 0x415   :  { %v7761_v31 = vpop.f32.mrb[3].mxu0  ;;  %v7865_v11 = vpop.f32.mrb[7].mxu1  ;;  %v10702_v54 = vadd.f32 %v2705_v44, %v2456_v22 }
 0x417   :  { %7983 = vmatmul.mubr.bf16.gmra.mrb[108].mxu0 %v10363_v60  ;;  %8087 = vmatmul.mubr.bf16.gmra.mrb[112].mxu1 %v10409_v57 }
 0x418   :  { %7986 = vmatprep.mubr.msk.bf16.mxu0 %vm9021_vm0, %v11795_v47  ;;  %8090 = vmatprep.mubr.msk.bf16.mxu1 %vm9021_vm0, %v11795_v47 }
 0x41a   :  { %v2461_v37 = vpop.f32.mrb[4].mxu0  ;;  %v2718_v50 = vpop.f32.mrb[8].mxu1 }
 0x41b   :  { %v7764_v24 = vpop.f32.mrb[5].mxu0  ;;  %v7868_v32 = vpop.f32.mrb[9].mxu1  ;;  %v10710_v26 = vadd.f32 %v2710_v10, %v2461_v37 }
 0x41c   :  { %v2464_v15 = vpop.f32.mrb[6].mxu0  ;;  %v2721_v18 = vpop.f32.mrb[10].mxu1 }
 0x41d   :  { %v7765_v44 = vpop.f32.mrb[7].mxu0  ;;  %v7869_v22 = vpop.f32.mrb[11].mxu1  ;;  %v10712_v31 = vadd.f32 %v2713_v45, %v2464_v15 }
 0x41f   :  { %7987 = vmatmul.mubr.bf16.gmra.mrb[112].mxu0 %v10385_v56  ;;  %8091 = vmatmul.mubr.bf16.gmra.mrb[116].mxu1 %v10433_v20 }
 0x420   :  { %7990 = vmatprep.mubr.msk.bf16.mxu0 %vm9021_vm0, %v11795_v47  ;;  %8094 = vmatprep.mubr.msk.bf16.mxu1 %vm9021_vm0, %v11795_v47 }
 0x422   :  { %v2469_v11 = vpop.f32.mrb[8].mxu0  ;;  %v2726_v24 = vpop.f32.mrb[12].mxu1 }
 0x423   :  { %v7768_v10 = vpop.f32.mrb[9].mxu0  ;;  %v7872_v37 = vpop.f32.mrb[13].mxu1  ;;  %v10720_v32 = vadd.f32 %v2718_v50, %v2469_v11 }
 0x424   :  { %v2472_v44 = vpop.f32.mrb[10].mxu0  ;;  %v2729_v22 = vpop.f32.mrb[14].mxu1 }
 0x425   :  { %v7769_v45 = vpop.f32.mrb[11].mxu0  ;;  %v7873_v15 = vpop.f32.mrb[15].mxu1  ;;  %v10722_v7 = vadd.f32 %v2721_v18, %v2472_v44 }
 0x427   :  { %7991 = vmatmul.mubr.bf16.gmra.mrb[116].mxu0 %v10409_v57  ;;  %8095 = vmatmul.mubr.bf16.gmra.mrb[120].mxu1 %v10455_v38 }
 0x428   :  { %7994 = vmatprep.mubr.msk.bf16.mxu0 %vm9021_vm0, %v11795_v47  ;;  %8098 = vmatprep.mubr.msk.bf16.mxu1 %vm9021_vm0, %v11795_v47 }
 0x42a   :  { %v2477_v10 = vpop.f32.mrb[12].mxu0  ;;  %v2734_v37 = vpop.f32.mrb[16].mxu1 }
 0x42b   :  { %v7772_v50 = vpop.f32.mrb[13].mxu0  ;;  %v7876_v11 = vpop.f32.mrb[17].mxu1  ;;  %v10730_v8 = vadd.f32 %v2726_v24, %v2477_v10 }
 0x42c   :  { %v2480_v45 = vpop.f32.mrb[14].mxu0  ;;  %v2737_v15 = vpop.f32.mrb[18].mxu1 }
 0x42d   :  { %v7773_v18 = vpop.f32.mrb[15].mxu0  ;;  %v7877_v44 = vpop.f32.mrb[19].mxu1  ;;  %v10732_v30 = vadd.f32 %v2729_v22, %v2480_v45 }
 0x42f   :  { %7995 = vmatmul.mubr.bf16.gmra.mrb[120].mxu0 %v10433_v20  ;;  %8099 = vmatmul.mubr.bf16.gmra.mrb[124].mxu1 %v10477_v14 }
 0x430   :  { %7998 = vmatprep.mubr.msk.bf16.mxu0 %vm9021_vm0, %v11795_v47  ;;  %8102 = vmatprep.mubr.msk.bf16.mxu1 %vm9021_vm0, %v11795_v47 }
 0x432   :  { %v2485_v50 = vpop.f32.mrb[16].mxu0  ;;  %v2742_v11 = vpop.f32.mrb[20].mxu1 }
 0x433   :  { %v7776_v24 = vpop.f32.mrb[17].mxu0  ;;  %v7880_v10 = vpop.f32.mrb[21].mxu1  ;;  %v10740_v61 = vadd.f32 %v2734_v37, %v2485_v50 }
 0x434   :  { %v2488_v18 = vpop.f32.mrb[18].mxu0  ;;  %v2745_v44 = vpop.f32.mrb[22].mxu1 }
 0x435   :  { %v7777_v22 = vpop.f32.mrb[19].mxu0  ;;  %v7881_v45 = vpop.f32.mrb[23].mxu1  ;;  %v10742_v12 = vadd.f32 %v2737_v15, %v2488_v18 }
 0x437   :  { %7999 = vmatmul.mubr.bf16.gmra.mrb[124].mxu0 %v10455_v38  ;;  %8103 = vmatmul.mubr.bf16.gmra.mrb[128].mxu1 %v10499_v16 }
 0x438   :  { %8002 = vmatprep.mubr.msk.bf16.mxu0 %vm9021_vm0, %v11795_v47  ;;  %8106 = vmatprep.mubr.msk.bf16.mxu1 %vm9021_vm0, %v11795_v47 }
 0x43a   :  { %v2493_v24 = vpop.f32.mrb[20].mxu0  ;;  %v2750_v10 = vpop.f32.mrb[24].mxu1 }
 0x43b   :  { %v7780_v37 = vpop.f32.mrb[21].mxu0  ;;  %v7884_v50 = vpop.f32.mrb[25].mxu1  ;;  %v10750_v55 = vadd.f32 %v2742_v11, %v2493_v24 }
 0x43c   :  { %v2496_v22 = vpop.f32.mrb[22].mxu0  ;;  %v2753_v45 = vpop.f32.mrb[26].mxu1 }
 0x43d   :  { %v7781_v15 = vpop.f32.mrb[23].mxu0  ;;  %v7885_v18 = vpop.f32.mrb[27].mxu1  ;;  %v10752_v35 = vadd.f32 %v2745_v44, %v2496_v22 }
 0x43f   :  { %8003 = vmatmul.mubr.bf16.gmra.mrb[128].mxu0 %v10477_v14  ;;  %8107 = vmatmul.mubr.bf16.gmra.mrb[132].mxu1 %v10521_v46 }
 0x440   :  { %8006 = vmatprep.mubr.msk.bf16.mxu0 %vm9021_vm0, %v11795_v47  ;;  %8110 = vmatprep.mubr.msk.bf16.mxu1 %vm9021_vm0, %v11795_v47 }
 0x442   :  { %v2501_v37 = vpop.f32.mrb[24].mxu0  ;;  %v2758_v50 = vpop.f32.mrb[28].mxu1 }
 0x443   :  { %v10760_v11 = vadd.f32 %v2750_v10, %v2501_v37  ;;  %v7784_v24 = vpop.f32.mrb[25].mxu0  ;;  %v7888_v21 = vpop.f32.mrb[29].mxu1 }
 0x444   :  { %v2504_v15 = vpop.f32.mrb[26].mxu0  ;;  %v2761_v18 = vpop.f32.mrb[30].mxu1 }
 0x445   :  { %v10762_v44 = vadd.f32 %v2753_v45, %v2504_v15  ;;  %v7785_v22 = vpop.f32.mrb[27].mxu0  ;;  %v7889_v63 = vpop.f32.mrb[31].mxu1 }
 0x447   :  { %8007 = vmatmul.mubr.bf16.gmra.mrb[132].mxu0 %v10499_v16  ;;  %8111 = vmatmul.mubr.bf16.gmra.mrb[136].mxu1 %v10543_v36 }
 0x448   :  { %8010 = vmatprep.mubr.msk.bf16.mxu0 %vm9021_vm0, %v11795_v47  ;;  %8114 = vmatprep.mubr.msk.bf16.mxu1 %vm9021_vm0, %v11795_v47 }
 0x44a   :  { %v2509_v10 = vpop.f32.mrb[28].mxu0  ;;  %v2766_v21 = vpop.f32.mrb[32].mxu1 }
 0x44b   :  { %v10771_v45 = vadd.f32 %v2758_v50, %v2509_v10  ;;  %v7788_v37 = vpop.f32.mrb[29].mxu0  ;;  %v7892_v63 = vpop.f32.mrb[33].mxu1 }
 0x44c   :  { %v2512_v24 = vpop.f32.mrb[30].mxu0  ;;  %v2769_v15 = vpop.f32.mrb[34].mxu1 }
 0x44d   :  { %v10773_v22 = vadd.f32 %v2761_v18, %v2512_v24  ;;  %v7789_v48 = vpop.f32.mrb[31].mxu0  ;;  %v7893_v33 = vpop.f32.mrb[35].mxu1 }
 0x44f   :  { %8011 = vmatmul.mubr.bf16.gmra.mrb[136].mxu0 %v10521_v46  ;;  %8115 = vmatmul.mubr.bf16.gmra.mrb[140].mxu1 %v10565_v62 }
 0x450   :  { %8014 = vmatprep.mubr.msk.bf16.mxu0 %vm9021_vm0, %v11795_v47  ;;  %8118 = vmatprep.mubr.msk.bf16.mxu1 %vm9021_vm0, %v11795_v47 }
 0x452   :  { %v2517_v19 = vpop.f32.mrb[32].mxu0  ;;  %v2774_v50 = vpop.f32.mrb[36].mxu1 }
 0x453   :  { %v10781_v10 = vadd.f32 %v2766_v21, %v2517_v19  ;;  %v7792_v37 = vpop.f32.mrb[33].mxu0  ;;  %v7896_v63 = vpop.f32.mrb[37].mxu1 }
 0x454   :  { %v2520_v18 = vpop.f32.mrb[34].mxu0  ;;  %v2777_v24 = vpop.f32.mrb[38].mxu1 }
 0x455   :  { %v10783_v48 = vadd.f32 %v2769_v15, %v2520_v18  ;;  %v7793_v33 = vpop.f32.mrb[35].mxu0  ;;  %v7897_v1 = vpop.f32.mrb[39].mxu1 }
 0x457   :  { %8015 = vmatmul.mubr.bf16.gmra.mrb[140].mxu0 %v10543_v36  ;;  %8119 = vmatmul.mubr.bf16.gmra.mrb[144].mxu1 %v10587_v43 }
 0x458   :  { %8018 = vmatprep.mubr.msk.bf16.mxu0 %vm9021_vm0, %v11795_v47  ;;  %8122 = vmatprep.mubr.msk.bf16.mxu1 %vm9021_vm0, %v11795_v47 }
 0x45a   :  { %v2525_v21 = vpop.f32.mrb[36].mxu0  ;;  %v2782_v19 = vpop.f32.mrb[40].mxu1 }
 0x45b   :  { %v10791_v37 = vadd.f32 %v2774_v50, %v2525_v21  ;;  %v7796_v63 = vpop.f32.mrb[37].mxu0  ;;  %v7900_v34 = vpop.f32.mrb[41].mxu1 }
 0x45c   :  { %v2528_v15 = vpop.f32.mrb[38].mxu0  ;;  %v2785_v18 = vpop.f32.mrb[42].mxu1  ;;  %v8944_v34 = vld [vmem:[%s11616_s4] ss:$0 sm:$0xff] }
 0x45d   :  { %v10793_v33 = vadd.f32 %v2777_v24, %v2528_v15  ;;  %v7797_v1 = vpop.f32.mrb[39].mxu0  ;;  %v7901_v51 = vpop.f32.mrb[43].mxu1  ;;  %v2181_v50 = vadd.f32 %v8944_v34, %v10636_v29  ;;  %v2180_v21 = vadd.f32 %v8944_v34, %v10629_v0  ;;  %v11938_v0 = vmax.f32 %v11937_v41, 0.0 }
 0x45f   :  { %8019 = vmatmul.mubr.bf16.gmra.mrb[144].mxu0 %v10565_v62  ;;  %8123 = vmatmul.mubr.bf16.gmra.mrb[148].mxu1 %v10609_v28  ;;  %v2223_v40 = vmax.f32 %v2181_v50, 0.0  ;;  %v2222_v4 = vmax.f32 %v2180_v21, 0.0 }
 0x460   :  { %8022 = vmatprep.mubr.msk.bf16.mxu0 %vm9021_vm0, %v11795_v47  ;;  %8126 = vmatprep.mubr.msk.bf16.mxu1 %vm9021_vm0, %v11795_v47 }
 0x461   :  { %v10819_v29 = vadd.f32 %v2223_v40, %v11938_v0 }
 0x462   :  { %v2533_v24 = vpop.f32.mrb[40].mxu0  ;;  %v2790_v51 = vpop.f32.mrb[44].mxu1 }
 0x463   :  { %v10807_v63 = vadd.f32 %v2782_v19, %v2533_v24  ;;  %v7800_v15 = vpop.f32.mrb[41].mxu0  ;;  %v7904_v1 = vpop.f32.mrb[45].mxu1  ;;  %11939 = vst [vmem:[#allocation42_spill] sm:$0xff] %v10819_v29 }
 0x464   :  { %v2536_v59 = vpop.f32.mrb[42].mxu0  ;;  %v2793_v52 = vpop.f32.mrb[46].mxu1 }
 0x465   :  { %v10809_v49 = vadd.f32 %v2785_v18, %v2536_v59  ;;  %v7801_v13 = vpop.f32.mrb[43].mxu0  ;;  %v7905_v6 = vpop.f32.mrb[47].mxu1  ;;  %v11940_v18 = vld [vmem:[#allocation51_spill] sm:$0xff] }
 0x466   :  { %v11941_v13 = vmax.f32 %v11940_v18, 0.0 }
 0x467   :  { %8023 = vmatmul.mubr.bf16.gmra.mrb[148].mxu0 %v10587_v43  ;;  %8127 = vmatmul.mubr.bf16.gmra.mrb[152].mxu1 %v10633_v3 }
 0x468   :  { %8026 = vmatprep.mubr.msk.bf16.mxu0 %vm9021_vm0, %v11795_v47  ;;  %8130 = vmatprep.mubr.msk.bf16.mxu1 %vm9021_vm0, %v11795_v47  ;;  %v10823_v6 = vadd.f32 %v2222_v4, %v11941_v13  ;;  %v8769_v4 = vld [vmem:[#allocation8 + $0x50] sm:$0xff]  }
 0x469   :  { %8243 = vmatpush3.bf16.msra.mxu1 %v8769_v4 }
 0x46a   :  { %v2541_v19 = vpop.f32.mrb[44].mxu0  ;;  %v2798_v59 = vpop.f32.mrb[48].mxu1  ;;  %11942 = vst [vmem:[#allocation43_spill] sm:$0xff] %v10823_v6  ;;  %v10829_v1 = vpack.c.bf16 %v10819_v29, %v10823_v6  ;;  %8244 = vmatprep.subr.bf16.mxu1 %v11795_v47 }
 0x46b   :  { %v10825_v34 = vadd.f32 %v2790_v51, %v2541_v19  ;;  %v7804_v50 = vpop.f32.mrb[45].mxu0  ;;  %v7908_v24 = vpop.f32.mrb[49].mxu1 }
 0x46c   :  { %v2544_v21 = vpop.f32.mrb[46].mxu0  ;;  %v2801_v15 = vpop.f32.mrb[50].mxu1 }
 0x46d   :  { %v10831_v27 = vadd.f32 %v2793_v52, %v2544_v21  ;;  %v7805_v40 = vpop.f32.mrb[47].mxu0  ;;  %v7909_v41 = vpop.f32.mrb[51].mxu1 }
 0x46f   :  { %8027 = vmatmul.mubr.bf16.gmra.mrb[152].mxu0 %v10609_v28  ;;  %8131 = vmatmul.mubr.bf16.gmra.mrb[156].mxu1 %v10829_v1 }
 0x470   :  { %8030 = vmatprep.mubr.msk.bf16.mxu0 %vm9021_vm0, %v11795_v47  ;;  %8134 = vmatprep.mubr.msk.bf16.mxu1 %vm9021_vm0, %v11795_v47 }
 0x472   :  { %v2549_v51 = vpop.f32.mrb[48].mxu0  ;;  %v2806_v0 = vpop.f32.mrb[52].mxu1 }
 0x473   :  { %v10840_v52 = vadd.f32 %v2798_v59, %v2549_v51  ;;  %v7808_v19 = vpop.f32.mrb[49].mxu0  ;;  %v7912_v18 = vpop.f32.mrb[53].mxu1 }
 0x474   :  { %v2552_v13 = vpop.f32.mrb[50].mxu0  ;;  %v2809_v50 = vpop.f32.mrb[54].mxu1 }
 0x475   :  { %v10842_v24 = vadd.f32 %v2801_v15, %v2552_v13  ;;  %v7809_v21 = vpop.f32.mrb[51].mxu0  ;;  %v7913_v40 = vpop.f32.mrb[55].mxu1 }
 0x477   :  { %8031 = vmatmul.mubr.bf16.gmra.mrb[156].mxu0 %v10633_v3  ;;  %8135 = vmatmul.mubr.bf16.gmra.mrb[160].mxu1 %v11799_v9 }
 0x478   :  { %8034 = vmatprep.mubr.msk.bf16.mxu0 %vm9021_vm0, %v11795_v47  ;;  %8254 = vmatprep.mubr.msk.bf16.mxu1 %vm9021_vm0, %v11795_v47 }
 0x47a   :  { %v2557_v59 = vpop.f32.mrb[52].mxu0  ;;  %v2814_v41 = vpop.f32.mrb[56].mxu1 }
 0x47b   :  { %v10850_v4 = vadd.f32 %v2806_v0, %v2557_v59  ;;  %v7812_v51 = vpop.f32.mrb[53].mxu0  ;;  %v7916_v19 = vpop.f32.mrb[57].mxu1 }
 0x47c   :  { %v2560_v15 = vpop.f32.mrb[54].mxu0  ;;  %v2817_v18 = vpop.f32.mrb[58].mxu1 }
 0x47d   :  { %11943 = vst [vmem:[#allocation44_spill] sm:$0xff] %v10850_v4  ;;  %v10852_v13 = vadd.f32 %v2809_v50, %v2560_v15  ;;  %v7813_v21 = vpop.f32.mrb[55].mxu0  ;;  %v7917_v40 = vpop.f32.mrb[59].mxu1  ;;  %v8770_v15 = vld [vmem:[#allocation8 + $0x58] sm:$0xff]  }
 0x47e   :  { %8245 = vmatpush3.bf16.msra.mxu1 %v8770_v15 }
 0x47f   :  { %8035 = vmatmul.mubr.bf16.gmra.mrb[160].mxu0 %v10829_v1  ;;  %8246 = vmatprep.subr.bf16.mxu1 %v11795_v47 }
 0x480   :  { %8154 = vmatprep.mubr.msk.bf16.mxu0 %vm9021_vm0, %v11795_v47 }
 0x482   :  { %v2565_v29 = vpop.f32.mrb[56].mxu0  ;;  %v2822_v6 = vpop.f32.mrb[60].mxu1 }
 0x483   :  { %v10857_v53 = vadd.f32 %v2814_v41, %v2565_v29  ;;  %v7816_v9 = vpop.f32.mrb[57].mxu0  ;;  %v7920_v0 = vpop.f32.mrb[61].mxu1 }
 0x484   :  { %v2568_v59 = vpop.f32.mrb[58].mxu0  ;;  %v2825_v51 = vpop.f32.mrb[62].mxu1 }
 0x485   :  { %11944 = vst [vmem:[#allocation45_spill] sm:$0xff] %v10857_v53  ;;  %v10859_v19 = vadd.f32 %v2817_v18, %v2568_v59  ;;  %v7817_v4 = vpop.f32.mrb[59].mxu0  ;;  %v7921_v50 = vpop.f32.mrb[63].mxu1 }
 0x487   :  { %11945 = vst [vmem:[#allocation46_spill] sm:$0xff] %v10859_v19  ;;  %8155 = vmatmul.mubr.bf16.vlgmr.msra.gmra.mrb[164].mxu0 %v10249_v25 }
 0x488   :  { %8158 = vmatprep.mubr.msk.bf16.mxu0 %vm9021_vm0, %v11795_v47 }
 0x48a   :  { %v2573_v21 = vpop.f32.mrb[60].mxu0  ;;  %v2830_v29 = vpop.f32.mrb[64].mxu1 }
 0x48b   :  { %v10865_v41 = vadd.f32 %v2822_v6, %v2573_v21  ;;  %v7820_v9 = vpop.f32.mrb[61].mxu0  ;;  %v7924_v40 = vpop.f32.mrb[65].mxu1 }
 0x48c   :  { %v2576_v0 = vpop.f32.mrb[62].mxu0  ;;  %v2833_v18 = vpop.f32.mrb[66].mxu1 }
 0x48d   :  { %11946 = vst [vmem:[#allocation47_spill] sm:$0xff] %v10865_v41  ;;  %v10867_v59 = vadd.f32 %v2825_v51, %v2576_v0  ;;  %v7821_v4 = vpop.f32.mrb[63].mxu0  ;;  %v7925_v50 = vpop.f32.mrb[67].mxu1 }
 0x48f   :  { %8159 = vmatmul.mubr.bf16.gmra.mrb[168].mxu0 %v10274_v17 }
 0x490   :  { %8162 = vmatprep.mubr.msk.bf16.mxu0 %vm9021_vm0, %v11795_v47 }
 0x492   :  { %v2581_v25 = vpop.f32.mrb[64].mxu0  ;;  %v2838_v15 = vpop.f32.mrb[68].mxu1 }
 0x493   :  { %v10872_v19 = vadd.f32 %v2830_v29, %v2581_v25  ;;  %v7824_v53 = vpop.f32.mrb[65].mxu0  ;;  %v7928_v6 = vpop.f32.mrb[69].mxu1  ;;  %v8771_v25 = vld [vmem:[#allocation8 + $0x60] sm:$0xff]  }
 0x494   :  { %v2584_v21 = vpop.f32.mrb[66].mxu0  ;;  %v2841_v9 = vpop.f32.mrb[70].mxu1  ;;  %8247 = vmatpush3.bf16.msra.mxu1 %v8771_v25 }
 0x495   :  { %11947 = vst [vmem:[#allocation48_spill] sm:$0xff] %v10872_v19  ;;  %v10874_v40 = vadd.f32 %v2833_v18, %v2584_v21  ;;  %v7825_v41 = vpop.f32.mrb[67].mxu0  ;;  %v7929_v51 = vpop.f32.mrb[71].mxu1  ;;  %8248 = vmatprep.subr.bf16.mxu1 %v11795_v47 }
 0x497   :  { %8163 = vmatmul.mubr.bf16.gmra.mrb[172].mxu0 %v10297_v58 }
 0x498   :  { %8166 = vmatprep.mubr.msk.bf16.mxu0 %vm9021_vm0, %v11795_v47 }
 0x49a   :  { %v2589_v17 = vpop.f32.mrb[68].mxu0  ;;  %v2846_v0 = vpop.f32.mrb[72].mxu1 }
 0x49b   :  { %v10879_v4 = vadd.f32 %v2838_v15, %v2589_v17  ;;  %v7828_v50 = vpop.f32.mrb[69].mxu0  ;;  %v7932_v29 = vpop.f32.mrb[73].mxu1 }
 0x49c   :  { %v2592_v53 = vpop.f32.mrb[70].mxu0  ;;  %v2849_v6 = vpop.f32.mrb[74].mxu1 }
 0x49d   :  { %v10881_v19 = vadd.f32 %v2841_v9, %v2592_v53  ;;  %v7829_v18 = vpop.f32.mrb[71].mxu0  ;;  %v7933_v21 = vpop.f32.mrb[75].mxu1 }
 0x49f   :  { %11948 = vst [vmem:[#allocation49_spill] sm:$0xff] %v10881_v19  ;;  %8167 = vmatmul.mubr.bf16.gmra.mrb[176].mxu0 %v10319_v5 }
 0x4a0   :  { %8170 = vmatprep.mubr.msk.bf16.mxu0 %vm9021_vm0, %v11795_v47 }
 0x4a2   :  { %v2597_v58 = vpop.f32.mrb[72].mxu0  ;;  %v2854_v41 = vpop.f32.mrb[76].mxu1 }
 0x4a3   :  { %v10887_v15 = vadd.f32 %v2846_v0, %v2597_v58  ;;  %v7832_v51 = vpop.f32.mrb[73].mxu0  ;;  %v7936_v17 = vpop.f32.mrb[77].mxu1 }
 0x4a4   :  { %v2600_v50 = vpop.f32.mrb[74].mxu0  ;;  %v2857_v29 = vpop.f32.mrb[78].mxu1 }
 0x4a5   :  { %11949 = vst [vmem:[#allocation50_spill] sm:$0xff] %v10887_v15  ;;  %v10889_v9 = vadd.f32 %v2849_v6, %v2600_v50  ;;  %v7833_v53 = vpop.f32.mrb[75].mxu0  ;;  %v7937_v18 = vpop.f32.mrb[79].mxu1  ;;  %v8772_v50 = vld [vmem:[#allocation8 + $0x68] sm:$0xff]  }
 0x4a6   :  { %8249 = vmatpush3.bf16.msra.mxu1 %v8772_v50 }
 0x4a7   :  { %8171 = vmatmul.mubr.bf16.gmra.mrb[180].mxu0 %v10341_v42  ;;  %8250 = vmatprep.subr.bf16.mxu1 %v11795_v47 }
 0x4a8   :  { %8174 = vmatprep.mubr.msk.bf16.mxu0 %vm9021_vm0, %v11795_v47 }
 0x4aa   :  { %v2605_v5 = vpop.f32.mrb[76].mxu0  ;;  %v3310_v25 = vpop.f32.mrb[80].mxu1 }
 0x4ab   :  { %v10894_v21 = vadd.f32 %v2854_v41, %v2605_v5  ;;  %v7836_v19 = vpop.f32.mrb[77].mxu0  ;;  %v8056_v0 = vpop.f32.mrb[81].mxu1 }
 0x4ac   :  { %v2608_v58 = vpop.f32.mrb[78].mxu0  ;;  %v3313_v51 = vpop.f32.mrb[82].mxu1 }
 0x4ad   :  { %11950 = vst [vmem:[#allocation52_spill] sm:$0xff] %v10894_v21  ;;  %v10896_v17 = vadd.f32 %v2857_v29, %v2608_v58  ;;  %v7837_v15 = vpop.f32.mrb[79].mxu0  ;;  %v8057_v6 = vpop.f32.mrb[83].mxu1 }
 0x4af   :  { %11951 = vst [vmem:[#allocation51_spill] sm:$0xff] %v10896_v17  ;;  %8175 = vmatmul.mubr.bf16.gmra.mrb[184].mxu0 %v10363_v60 }
 0x4b0   :  { %8178 = vmatprep.mubr.msk.bf16.mxu0 %vm9021_vm0, %v11795_v47 }
 0x4b2   :  { %v2981_v42 = vpop.f32.mrb[80].mxu0  ;;  %v3318_v41 = vpop.f32.mrb[84].mxu1 }
 0x4b3   :  { %v3148_v19 = vadd.f32 %v2981_v42, %v10645_v39  ;;  %v7956_v53 = vpop.f32.mrb[81].mxu0  ;;  %v8060_v18 = vpop.f32.mrb[85].mxu1 }
 0x4b4   :  { %v2984_v5 = vpop.f32.mrb[82].mxu0  ;;  %v3321_v29 = vpop.f32.mrb[86].mxu1 }
 0x4b5   :  { %v3149_v15 = vadd.f32 %v2984_v5, %v10648_v2  ;;  %v7957_v0 = vpop.f32.mrb[83].mxu0  ;;  %v8061_v58 = vpop.f32.mrb[87].mxu1  ;;  %v10904_v6 = vadd.f32 %v3310_v25, %v3148_v19 }
 0x4b7   :  { %8179 = vmatmul.mubr.bf16.gmra.mrb[188].mxu0 %v10385_v56  ;;  %v10907_v60 = vadd.f32 %v3313_v51, %v3149_v15 }
 0x4b8   :  { %8182 = vmatprep.mubr.msk.bf16.mxu0 %vm9021_vm0, %v11795_v47 }
 0x4ba   :  { %v2989_v50 = vpop.f32.mrb[84].mxu0  ;;  %v3326_v17 = vpop.f32.mrb[88].mxu1 }
 0x4bb   :  { %v3150_v39 = vadd.f32 %v2989_v50, %v10700_v23  ;;  %v7960_v42 = vpop.f32.mrb[85].mxu0  ;;  %v8064_v53 = vpop.f32.mrb[89].mxu1 }
 0x4bc   :  { %v2992_v18 = vpop.f32.mrb[86].mxu0  ;;  %v3329_v21 = vpop.f32.mrb[90].mxu1 }
 0x4bd   :  { %v3151_v2 = vadd.f32 %v2992_v18, %v10702_v54  ;;  %v7961_v5 = vpop.f32.mrb[87].mxu0  ;;  %v8065_v25 = vpop.f32.mrb[91].mxu1  ;;  %v10913_v19 = vadd.f32 %v3318_v41, %v3150_v39  ;;  %v8773_v39 = vld [vmem:[#allocation8 + $0x70] sm:$0xff]  }
 0x4be   :  { %8251 = vmatpush3.bf16.msra.mxu1 %v8773_v39 }
 0x4bf   :  { %8183 = vmatmul.mubr.bf16.gmra.mrb[192].mxu0 %v10409_v57  ;;  %v10916_v56 = vadd.f32 %v3321_v29, %v3151_v2  ;;  %8252 = vmatprep.subr.bf16.mxu1 %v11795_v47 }
 0x4c0   :  { %8186 = vmatprep.mubr.msk.bf16.mxu0 %vm9021_vm0, %v11795_v47 }
 0x4c2   :  { %v2997_v51 = vpop.f32.mrb[88].mxu0  ;;  %v3334_v15 = vpop.f32.mrb[92].mxu1 }
 0x4c3   :  { %v3152_v23 = vadd.f32 %v2997_v51, %v10710_v26  ;;  %v7964_v0 = vpop.f32.mrb[89].mxu0  ;;  %v8068_v58 = vpop.f32.mrb[93].mxu1 }
 0x4c4   :  { %v3000_v50 = vpop.f32.mrb[90].mxu0  ;;  %v3337_v42 = vpop.f32.mrb[94].mxu1 }
 0x4c5   :  { %v3153_v54 = vadd.f32 %v3000_v50, %v10712_v31  ;;  %v7965_v53 = vpop.f32.mrb[91].mxu0  ;;  %v8069_v41 = vpop.f32.mrb[95].mxu1  ;;  %v10922_v18 = vadd.f32 %v3326_v17, %v3152_v23 }
 0x4c7   :  { %8187 = vmatmul.mubr.bf16.gmra.mrb[196].mxu0 %v10433_v20  ;;  %v10925_v57 = vadd.f32 %v3329_v21, %v3153_v54 }
 0x4c8   :  { %8190 = vmatprep.mubr.msk.bf16.mxu0 %vm9021_vm0, %v11795_v47 }
 0x4ca   :  { %v3005_v26 = vpop.f32.mrb[92].mxu0  ;;  %v3342_v29 = vpop.f32.mrb[96].mxu1 }
 0x4cb   :  { %v3154_v2 = vadd.f32 %v3005_v26, %v10720_v32  ;;  %v7968_v31 = vpop.f32.mrb[93].mxu0  ;;  %v8072_v5 = vpop.f32.mrb[97].mxu1 }
 0x4cc   :  { %v3008_v25 = vpop.f32.mrb[94].mxu0  ;;  %v3345_v51 = vpop.f32.mrb[98].mxu1 }
 0x4cd   :  { %v3155_v17 = vadd.f32 %v3008_v25, %v10722_v7  ;;  %v7969_v23 = vpop.f32.mrb[95].mxu0  ;;  %v8073_v20 = vpop.f32.mrb[99].mxu1  ;;  %v10932_v0 = vadd.f32 %v3334_v15, %v3154_v2 }
 0x4cf   :  { %8191 = vmatmul.mubr.bf16.gmra.mrb[200].mxu0 %v10455_v38  ;;  %v10935_v21 = vadd.f32 %v3337_v42, %v3155_v17 }
 0x4d0   :  { %8194 = vmatprep.mubr.msk.bf16.mxu0 %vm9021_vm0, %v11795_v47 }
 0x4d2   :  { %v3013_v58 = vpop.f32.mrb[96].mxu0  ;;  %v3350_v50 = vpop.f32.mrb[100].mxu1 }
 0x4d3   :  { %v3156_v32 = vadd.f32 %v3013_v58, %v10730_v8  ;;  %v7972_v54 = vpop.f32.mrb[97].mxu0  ;;  %v8076_v53 = vpop.f32.mrb[101].mxu1 }
 0x4d4   :  { %v3016_v41 = vpop.f32.mrb[98].mxu0  ;;  %v3353_v39 = vpop.f32.mrb[102].mxu1 }
 0x4d5   :  { %v3157_v7 = vadd.f32 %v3016_v41, %v10732_v30  ;;  %v7973_v26 = vpop.f32.mrb[99].mxu0  ;;  %v8077_v15 = vpop.f32.mrb[103].mxu1  ;;  %v10941_v2 = vadd.f32 %v3342_v29, %v3156_v32 }
 0x4d7   :  { %8195 = vmatmul.mubr.bf16.gmra.mrb[204].mxu0 %v10477_v14  ;;  %v10944_v38 = vadd.f32 %v3345_v51, %v3157_v7  ;;  %v8774_v51 = vld [vmem:[#allocation8 + $0x78] sm:$0xff]  }
 0x4d8   :  { %8198 = vmatprep.mubr.msk.bf16.mxu0 %vm9021_vm0, %v11795_v47  ;;  %8253 = vmatpush3.bf16.msra.mxu1 %v8774_v51 }
 0x4d9   :  { %8258 = vmatprep.subr.bf16.mxu1 %v11795_v47 }
 0x4da   :  { %v3021_v42 = vpop.f32.mrb[100].mxu0  ;;  %v3358_v31 = vpop.f32.mrb[104].mxu1 }
 0x4db   :  { %v3158_v8 = vadd.f32 %v3021_v42, %v10740_v61  ;;  %v7976_v5 = vpop.f32.mrb[101].mxu0  ;;  %v8080_v25 = vpop.f32.mrb[105].mxu1 }
 0x4dc   :  { %v3024_v17 = vpop.f32.mrb[102].mxu0  ;;  %v3361_v23 = vpop.f32.mrb[106].mxu1 }
 0x4dd   :  { %v3159_v30 = vadd.f32 %v3024_v17, %v10742_v12  ;;  %v7977_v20 = vpop.f32.mrb[103].mxu0  ;;  %v8081_v29 = vpop.f32.mrb[107].mxu1  ;;  %v10950_v58 = vadd.f32 %v3350_v50, %v3158_v8 }
 0x4de   :  { %v8775_v29 = vld [vmem:[#allocation8 + $0x140] sm:$0xff]  }
 0x4df   :  { %8199 = vmatmul.mubr.bf16.gmra.mrb[208].mxu0 %v10499_v16  ;;  %v10953_v14 = vadd.f32 %v3353_v39, %v3159_v30 }
 0x4e0   :  { %8202 = vmatprep.mubr.msk.bf16.mxu0 %vm9021_vm0, %v11795_v47  ;;  %8339 = vmatpush3.bf16.msra.mxu0 %v8775_v29 }
 0x4e1   :  { %8340 = vmatprep.subr.bf16.mxu0 %v11795_v47 }
 0x4e2   :  { %v3029_v32 = vpop.f32.mrb[104].mxu0  ;;  %v3366_v61 = vpop.f32.mrb[108].mxu1 }
 0x4e3   :  { %v3160_v54 = vadd.f32 %v3029_v32, %v10750_v55  ;;  %v7980_v53 = vpop.f32.mrb[105].mxu0  ;;  %v8084_v41 = vpop.f32.mrb[109].mxu1  ;;  %v8778_v32 = vld [vmem:[#allocation8 + $0x148] sm:$0xff]  }
 0x4e4   :  { %v3032_v12 = vpop.f32.mrb[106].mxu0  ;;  %v3369_v7 = vpop.f32.mrb[110].mxu1  ;;  %8341 = vmatpush3.bf16.msra.mxu0 %v8778_v32 }
 0x4e5   :  { %v3161_v50 = vadd.f32 %v3032_v12, %v10752_v35  ;;  %v7981_v16 = vpop.f32.mrb[107].mxu0  ;;  %v8085_v39 = vpop.f32.mrb[111].mxu1  ;;  %v10960_v26 = vadd.f32 %v3358_v31, %v3160_v54  ;;  %8342 = vmatprep.subr.bf16.mxu0 %v11795_v47 }
 0x4e6   :  { %v8780_v16 = vld [vmem:[#allocation8 + $0x150] sm:$0xff]  }
 0x4e7   :  { %8203 = vmatmul.mubr.bf16.gmra.mrb[212].mxu0 %v10521_v46  ;;  %v10963_v15 = vadd.f32 %v3361_v23, %v3161_v50 }
 0x4e8   :  { %8206 = vmatprep.mubr.msk.bf16.mxu0 %vm9021_vm0, %v11795_v47  ;;  %8343 = vmatpush3.bf16.msra.mxu0 %v8780_v16 }
 0x4e9   :  { %8344 = vmatprep.subr.bf16.mxu0 %v11795_v47 }
 0x4ea   :  { %v3037_v55 = vpop.f32.mrb[108].mxu0  ;;  %v3374_v42 = vpop.f32.mrb[112].mxu1 }
 0x4eb   :  { %v3162_v8 = vadd.f32 %v3037_v55, %v10760_v11  ;;  %v7984_v5 = vpop.f32.mrb[109].mxu0  ;;  %v8088_v25 = vpop.f32.mrb[113].mxu1 }
 0x4ec   :  { %v3040_v17 = vpop.f32.mrb[110].mxu0  ;;  %v3377_v30 = vpop.f32.mrb[114].mxu1 }
 0x4ed   :  { %v3163_v35 = vadd.f32 %v3040_v17, %v10762_v44  ;;  %v7985_v20 = vpop.f32.mrb[111].mxu0  ;;  %v8089_v31 = vpop.f32.mrb[115].mxu1  ;;  %v10969_v51 = vadd.f32 %v3366_v61, %v3162_v8 }
 0x4ee   :  { %v8784_v31 = vld [vmem:[#allocation8 + $0x160] sm:$0xff]  }
 0x4ef   :  { %8207 = vmatmul.mubr.bf16.gmra.mrb[216].mxu0 %v10543_v36  ;;  %v10972_v46 = vadd.f32 %v3369_v7, %v3163_v35 }
 0x4f0   :  { %8210 = vmatprep.mubr.msk.bf16.mxu0 %vm9021_vm0, %v11795_v47 }
 0x4f2   :  { %v3045_v11 = vpop.f32.mrb[112].mxu0  ;;  %v3382_v23 = vpop.f32.mrb[116].mxu1 }
 0x4f3   :  { %v3164_v44 = vadd.f32 %v3045_v11, %v10771_v45  ;;  %v7988_v54 = vpop.f32.mrb[113].mxu0  ;;  %v8092_v53 = vpop.f32.mrb[117].mxu1 }
 0x4f4   :  { %v3048_v41 = vpop.f32.mrb[114].mxu0  ;;  %v3385_v61 = vpop.f32.mrb[118].mxu1 }
 0x4f5   :  { %v3165_v36 = vadd.f32 %v3048_v41, %v10773_v22  ;;  %v7989_v12 = vpop.f32.mrb[115].mxu0  ;;  %v8093_v7 = vpop.f32.mrb[119].mxu1  ;;  %v10980_v50 = vadd.f32 %v3374_v42, %v3164_v44  ;;  %v8782_v22 = vld [vmem:[#allocation8 + $0x158] sm:$0xff]  }
 0x4f6   :  { %8345 = vmatpush3.bf16.msra.mxu0 %v8782_v22  ;;  %v8788_v12 = vld [vmem:[#allocation8 + $0x170] sm:$0xff]  }
 0x4f7   :  { %8211 = vmatmul.mubr.bf16.gmra.mrb[220].mxu0 %v10565_v62  ;;  %v10983_v39 = vadd.f32 %v3377_v30, %v3165_v36  ;;  %8346 = vmatprep.subr.bf16.mxu0 %v11795_v47 }
 0x4f8   :  { %8214 = vmatprep.mubr.msk.bf16.mxu0 %vm9021_vm0, %v11795_v47 }
 0x4fa   :  { %v3053_v45 = vpop.f32.mrb[116].mxu0  ;;  %v3390_v55 = vpop.f32.mrb[120].mxu1  ;;  %8347 = vmatpush3.bf16.msra.mxu0 %v8784_v31 }
 0x4fb   :  { %v3166_v8 = vadd.f32 %v3053_v45, %v10781_v10  ;;  %v7992_v5 = vpop.f32.mrb[117].mxu0  ;;  %v8096_v25 = vpop.f32.mrb[121].mxu1  ;;  %8348 = vmatprep.subr.bf16.mxu0 %v11795_v47 }
 0x4fc   :  { %v3056_v42 = vpop.f32.mrb[118].mxu0  ;;  %v3393_v17 = vpop.f32.mrb[122].mxu1 }
 0x4fd   :  { %v3167_v62 = vadd.f32 %v3056_v42, %v10783_v48  ;;  %v7993_v30 = vpop.f32.mrb[119].mxu0  ;;  %v8097_v35 = vpop.f32.mrb[123].mxu1  ;;  %v10991_v20 = vadd.f32 %v3382_v23, %v3166_v8  ;;  %v8786_v48 = vld [vmem:[#allocation8 + $0x168] sm:$0xff]  }
 0x4fe   :  { %8349 = vmatpush3.bf16.msra.mxu0 %v8786_v48 }
 0x4ff   :  { %8215 = vmatmul.mubr.bf16.gmra.mrb[224].mxu0 %v10587_v43  ;;  %v10994_v29 = vadd.f32 %v3385_v61, %v3167_v62  ;;  %8350 = vmatprep.subr.bf16.mxu0 %v11795_v47 }
 0x500   :  { %8218 = vmatprep.mubr.msk.bf16.mxu0 %vm9021_vm0, %v11795_v47 }
 0x502   :  { %v3061_v10 = vpop.f32.mrb[120].mxu0  ;;  %v3398_v11 = vpop.f32.mrb[124].mxu1  ;;  %8351 = vmatpush3.bf16.msra.mxu0 %v8788_v12 }
 0x503   :  { %v3168_v32 = vadd.f32 %v3061_v10, %v10791_v37  ;;  %v7996_v44 = vpop.f32.mrb[121].mxu0  ;;  %v8100_v54 = vpop.f32.mrb[125].mxu1  ;;  %8352 = vmatprep.subr.bf16.mxu0 %v11795_v47 }
 0x504   :  { %v3064_v23 = vpop.f32.mrb[122].mxu0  ;;  %v3401_v53 = vpop.f32.mrb[126].mxu1 }
 0x505   :  { %v3169_v43 = vadd.f32 %v3064_v23, %v10793_v33  ;;  %v7997_v41 = vpop.f32.mrb[123].mxu0  ;;  %v8101_v61 = vpop.f32.mrb[127].mxu1  ;;  %v11002_v36 = vadd.f32 %v3390_v55, %v3168_v32  ;;  %v8790_v33 = vld [vmem:[#allocation8 + $0x178] sm:$0xff]  }
 0x506   :  { %8353 = vmatpush3.bf16.msra.mxu0 %v8790_v33 }
 0x507   :  { %8219 = vmatmul.mubr.bf16.gmra.mrb[228].mxu0 %v10609_v28  ;;  %v11005_v7 = vadd.f32 %v3393_v17, %v3169_v43  ;;  %8378 = vmatprep.subr.bf16.mxu0 %v11795_v47 }
 0x508   :  { %8222 = vmatprep.mubr.msk.bf16.mxu0 %vm9021_vm0, %v11795_v47 }
 0x50a   :  { %v3069_v37 = vpop.f32.mrb[124].mxu0  ;;  %v3406_v16 = vpop.f32.mrb[128].mxu1 }
 0x50b   :  { %v3170_v45 = vadd.f32 %v3069_v37, %v10807_v63  ;;  %v8000_v22 = vpop.f32.mrb[125].mxu0  ;;  %v8104_v8 = vpop.f32.mrb[129].mxu1 }
 0x50c   :  { %v3072_v55 = vpop.f32.mrb[126].mxu0  ;;  %v3409_v5 = vpop.f32.mrb[130].mxu1 }
 0x50d   :  { %v3171_v28 = vadd.f32 %v3072_v55, %v10809_v49  ;;  %v8001_v25 = vpop.f32.mrb[127].mxu0  ;;  %v8105_v42 = vpop.f32.mrb[131].mxu1  ;;  %v11013_v17 = vadd.f32 %v3398_v11, %v3170_v45 }
 0x50f   :  { %8223 = vmatmul.mubr.bf16.gmra.mrb[232].mxu0 %v10633_v3  ;;  %v11016_v62 = vadd.f32 %v3401_v53, %v3171_v28 }
 0x510   :  { %8226 = vmatprep.mubr.msk.bf16.mxu0 %vm9021_vm0, %v11795_v47 }
 0x512   :  { %v3077_v63 = vpop.f32.mrb[128].mxu0  ;;  %v3414_v30 = vpop.f32.mrb[132].mxu1 }
 0x513   :  { %v3172_v35 = vadd.f32 %v3077_v63, %v10825_v34  ;;  %v8004_v31 = vpop.f32.mrb[129].mxu0  ;;  %v8108_v10 = vpop.f32.mrb[133].mxu1 }
 0x514   :  { %v3080_v49 = vpop.f32.mrb[130].mxu0  ;;  %v3417_v48 = vpop.f32.mrb[134].mxu1 }
 0x515   :  { %v3173_v32 = vadd.f32 %v3080_v49, %v10831_v27  ;;  %v8005_v44 = vpop.f32.mrb[131].mxu0  ;;  %v8109_v11 = vpop.f32.mrb[135].mxu1  ;;  %v11022_v54 = vadd.f32 %v3406_v16, %v3172_v35 }
 0x517   :  { %8227 = vmatmul.mubr.bf16.gmra.mrb[236].mxu0 %v10829_v1  ;;  %v11025_v3 = vadd.f32 %v3409_v5, %v3173_v32  ;;  %v11952_v1 = vmov 0  }
 0x518   :  { %8230 = vmatprep.mubr.msk.bf16.mxu0 %vm9021_vm0, %v11795_v47 }
 0x51a   :  { %v3085_v23 = vpop.f32.mrb[132].mxu0  ;;  %v3422_v53 = vpop.f32.mrb[136].mxu1 }
 0x51b   :  { %v3174_v34 = vadd.f32 %v3085_v23, %v10840_v52  ;;  %v8008_v43 = vpop.f32.mrb[133].mxu0  ;;  %v8112_v41 = vpop.f32.mrb[137].mxu1  ;;  %v11953_v52 = vld [vmem:[#allocation44_spill] sm:$0xff] }
 0x51c   :  { %v3088_v61 = vpop.f32.mrb[134].mxu0  ;;  %v3425_v12 = vpop.f32.mrb[138].mxu1 }
 0x51d   :  { %v3175_v27 = vadd.f32 %v3088_v61, %v10842_v24  ;;  %v8009_v37 = vpop.f32.mrb[135].mxu0  ;;  %v8113_v16 = vpop.f32.mrb[139].mxu1  ;;  %v11031_v33 = vadd.f32 %v3414_v30, %v3174_v34 }
 0x51e   :  { %v11956_v16 = vld [vmem:[#allocation47_spill] sm:$0xff] }
 0x51f   :  { %8231 = vmatmul.mubr.bf16.gmra.mrb[240].mxu0 %v11952_v1  ;;  %v11034_v45 = vadd.f32 %v3417_v48, %v3175_v27  ;;  %v11954_v48 = vld [vmem:[#allocation45_spill] sm:$0xff] }
 0x520   :  { %8234 = vmatprep.mubr.msk.bf16.mxu0 %vm9021_vm0, %v11795_v47 }
 0x522   :  { %v3093_v22 = vpop.f32.mrb[136].mxu0  ;;  %v3430_v8 = vpop.f32.mrb[140].mxu1 }
 0x523   :  { %v3176_v55 = vadd.f32 %v3093_v22, %v11953_v52  ;;  %v8012_v5 = vpop.f32.mrb[137].mxu0  ;;  %v8116_v28 = vpop.f32.mrb[141].mxu1 }
 0x524   :  { %v3096_v25 = vpop.f32.mrb[138].mxu0  ;;  %v3433_v42 = vpop.f32.mrb[142].mxu1 }
 0x525   :  { %v3177_v24 = vadd.f32 %v3096_v25, %v10852_v13  ;;  %v8013_v63 = vpop.f32.mrb[139].mxu0  ;;  %v8117_v30 = vpop.f32.mrb[143].mxu1  ;;  %v11040_v35 = vadd.f32 %v3422_v53, %v3176_v55  ;;  %v11955_v13 = vld [vmem:[#allocation46_spill] sm:$0xff] }
 0x527   :  { %8235 = vmatmul.mubr.bf16.gmra.mrb[244].mxu0 %v11952_v1  ;;  %v11043_v31 = vadd.f32 %v3425_v12, %v3177_v24 }
 0x528   :  { %8354 = vmatprep.mubr.msk.bf16.mxu0 %vm9021_vm0, %v11795_v47 }
 0x52a   :  { %v3101_v10 = vpop.f32.mrb[140].mxu0  ;;  %v3438_v49 = vpop.f32.mrb[144].mxu1 }
 0x52b   :  { %v3178_v32 = vadd.f32 %v3101_v10, %v11954_v48  ;;  %v8016_v44 = vpop.f32.mrb[141].mxu0  ;;  %v8120_v11 = vpop.f32.mrb[145].mxu1 }
 0x52c   :  { %v3104_v23 = vpop.f32.mrb[142].mxu0  ;;  %v3441_v34 = vpop.f32.mrb[146].mxu1 }
 0x52d   :  { %v3179_v43 = vadd.f32 %v3104_v23, %v11955_v13  ;;  %v8017_v41 = vpop.f32.mrb[143].mxu0  ;;  %v8121_v53 = vpop.f32.mrb[147].mxu1  ;;  %v11049_v61 = vadd.f32 %v3430_v8, %v3178_v32 }
 0x52f   :  { %v11051_v27 = vadd.f32 %v3433_v42, %v3179_v43  ;;  %v11957_v42 = vld [vmem:[#allocation48_spill] sm:$0xff] }
 0x532   :  { %v3109_v12 = vpop.f32.mrb[144].mxu0  ;;  %v3446_v37 = vpop.f32.mrb[148].mxu1 }
 0x533   :  { %v3180_v1 = vadd.f32 %v3109_v12, %v11956_v16  ;;  %v8020_v22 = vpop.f32.mrb[145].mxu0  ;;  %v8124_v52 = vpop.f32.mrb[149].mxu1 }
 0x534   :  { %v3112_v55 = vpop.f32.mrb[146].mxu0  ;;  %v3449_v5 = vpop.f32.mrb[150].mxu1 }
 0x535   :  { %v3181_v28 = vadd.f32 %v3112_v55, %v10867_v59  ;;  %v8021_v25 = vpop.f32.mrb[147].mxu0  ;;  %v8125_v24 = vpop.f32.mrb[151].mxu1  ;;  %v11055_v63 = vadd.f32 %v3438_v49, %v3180_v1  ;;  %v11958_v55 = vld [vmem:[#allocation49_spill] sm:$0xff] }
 0x537   :  { %v11057_v30 = vadd.f32 %v3441_v34, %v3181_v28 }
 0x53a   :  { %v3117_v8 = vpop.f32.mrb[148].mxu0  ;;  %v3454_v10 = vpop.f32.mrb[152].mxu1 }
 0x53b   :  { %v3182_v48 = vadd.f32 %v3117_v8, %v11957_v42  ;;  %v8024_v32 = vpop.f32.mrb[149].mxu0  ;;  %v8128_v44 = vpop.f32.mrb[153].mxu1 }
 0x53c   :  { %v3120_v11 = vpop.f32.mrb[150].mxu0  ;;  %v3457_v23 = vpop.f32.mrb[154].mxu1 }
 0x53d   :  { %v3183_v13 = vadd.f32 %v3120_v11, %v10874_v40  ;;  %v8025_v43 = vpop.f32.mrb[151].mxu0  ;;  %v8129_v41 = vpop.f32.mrb[155].mxu1  ;;  %v11061_v53 = vadd.f32 %v3446_v37, %v3182_v48 }
 0x53f   :  { %v11063_v59 = vadd.f32 %v3449_v5, %v3183_v13  ;;  %v11959_v5 = vld [vmem:[#allocation50_spill] sm:$0xff] }
 0x542   :  { %v3125_v49 = vpop.f32.mrb[152].mxu0  ;;  %v3462_v12 = vpop.f32.mrb[156].mxu1 }
 0x543   :  { %v3184_v34 = vadd.f32 %v3125_v49, %v10879_v4  ;;  %v8028_v16 = vpop.f32.mrb[153].mxu0  ;;  %v8132_v1 = vpop.f32.mrb[157].mxu1 }
 0x544   :  { %v3128_v22 = vpop.f32.mrb[154].mxu0  ;;  %v3465_v52 = vpop.f32.mrb[158].mxu1 }
 0x545   :  { %v3185_v28 = vadd.f32 %v3128_v22, %v11958_v55  ;;  %v8029_v25 = vpop.f32.mrb[155].mxu0  ;;  %v8133_v24 = vpop.f32.mrb[159].mxu1  ;;  %v11067_v8 = vadd.f32 %v3454_v10, %v3184_v34  ;;  %v11960_v34 = vld [vmem:[#allocation52_spill] sm:$0xff]  ;;  %v11961_v55 = vld [vmem:[#allocation51_spill] sm:$0xff] }
 0x547   :  { %v11069_v40 = vadd.f32 %v3457_v23, %v3185_v28 }
 0x54a   :  { %v3133_v37 = vpop.f32.mrb[156].mxu0  ;;  %v3470_v42 = vpop.f32.mrb[160].mxu1 }
 0x54b   :  { %v3186_v48 = vadd.f32 %v3133_v37, %v11959_v5  ;;  %v8032_v32 = vpop.f32.mrb[157].mxu0  ;;  %v8136_v44 = vpop.f32.mrb[161].mxu1 }
 0x54c   :  { %v3136_v11 = vpop.f32.mrb[158].mxu0  ;;  %v3473_v4 = vpop.f32.mrb[162].mxu1 }
 0x54d   :  { %v3187_v13 = vadd.f32 %v3136_v11, %v10889_v9  ;;  %v8033_v43 = vpop.f32.mrb[159].mxu0  ;;  %v11073_v41 = vadd.f32 %v3462_v12, %v3186_v48  ;;  %v8137_v49 = vpop.f32.mrb[163].mxu1  ;;  %v11086_v9 = vld [vmem:[%s11618_s6] ss:$0 sm:$0xff] }
 0x54e   :  { %v11962_v49 = vld [vmem:[#allocation53_spill] sm:$0xff] }
 0x54f   :  { %v11075_v16 = vadd.f32 %v3465_v52, %v3187_v13 }
 0x552   :  { %v3141_v10 = vpop.f32.mrb[160].mxu0 }
 0x553   :  { %v3188_v23 = vadd.f32 %v3141_v10, %v11960_v34  ;;  %v8036_v1 = vpop.f32.mrb[161].mxu0  ;;  %v11963_v34 = vld [vmem:[#allocation54_spill] sm:$0xff] }
 0x554   :  { %v3144_v22 = vpop.f32.mrb[162].mxu0 }
 0x555   :  { %v3189_v28 = vadd.f32 %v3144_v22, %v11961_v55  ;;  %v11079_v25 = vadd.f32 %v3470_v42, %v3188_v23  ;;  %v8037_v24 = vpop.f32.mrb[163].mxu0 }
 0x557   :  { %v11081_v37 = vadd.f32 %v3473_v4, %v3189_v28 }
 0x55a   :  { %v3639_v5 = vpop.f32.mrb[164].mxu0 }
 0x55b   :  { %v3806_v12 = vadd.f32 %v3639_v5, %v10904_v6  ;;  %v8156_v52 = vpop.f32.mrb[165].mxu0 }
 0x55c   :  { %v3642_v48 = vpop.f32.mrb[166].mxu0 }
 0x55d   :  { %v3855_v32 = vadd.f32 %v11086_v9, %v3806_v12  ;;  %v3807_v44 = vadd.f32 %v3642_v48, %v10907_v60  ;;  %v8157_v11 = vpop.f32.mrb[167].mxu0 }
 0x55e   :  { %v11965_v11 = vld [vmem:[#allocation56_spill] sm:$0xff] }
 0x55f   :  { %v3897_v42 = vmax.f32 %v3855_v32, 0.0  ;;  %v3856_v13 = vadd.f32 %v11086_v9, %v3807_v44  ;;  %v11964_v32 = vld [vmem:[#allocation55_spill] sm:$0xff] }
 0x561   :  { %v3898_v4 = vmax.f32 %v3856_v13, 0.0  ;;  %v11093_v10 = vadd.f32 %v3897_v42, %v11962_v49 }
 0x562   :  { %v3647_v43 = vpop.f32.mrb[168].mxu0 }
 0x563   :  { %v11096_v23 = vadd.f32 %v3898_v4, %v11963_v34  ;;  %v3808_v6 = vadd.f32 %v3647_v43, %v10913_v19  ;;  %v8160_v1 = vpop.f32.mrb[169].mxu0  ;;  %v8776_v43 = vld [vmem:[#allocation8] sm:$0xff]  }
 0x564   :  { %v3650_v22 = vpop.f32.mrb[170].mxu0 }
 0x565   :  { %v3981_v55 = vpack.c.bf16 %v11096_v23, %v11093_v10  ;;  %v3857_v60 = vadd.f32 %v11086_v9, %v3808_v6  ;;  %v3809_v28 = vadd.f32 %v3650_v22, %v10916_v56  ;;  %v8161_v24 = vpop.f32.mrb[171].mxu0  ;;  %v11975_v23 = vld [vmem:[#allocation15_spill] sm:$0xff] }
 0x566   :  { %v11966_v24 = vld [vmem:[#allocation57_spill] sm:$0xff] }
 0x567   :  { %v3899_v5 = vmax.f32 %v3857_v60, 0.0  ;;  %v3858_v12 = vadd.f32 %v11086_v9, %v3809_v28  ;;  %v8777_v60 = vld [vmem:[#allocation8 + $0x8] sm:$0xff]  }
 0x569   :  { %v3900_v52 = vmax.f32 %v3858_v12, 0.0  ;;  %v3941_v44 = vadd.f32 %v3899_v5, %v11964_v32  ;;  %v11967_v12 = vld [vmem:[#allocation58_spill] sm:$0xff] }
 0x56a   :  { %v3655_v48 = vpop.f32.mrb[172].mxu0 }
 0x56b   :  { %v3942_v42 = vadd.f32 %v3900_v52, %v11965_v11  ;;  %v3810_v19 = vadd.f32 %v3655_v48, %v10922_v18  ;;  %v8164_v13 = vpop.f32.mrb[173].mxu0 }
 0x56c   :  { %v3658_v4 = vpop.f32.mrb[174].mxu0 }
 0x56d   :  { %v3982_v49 = vpack.c.bf16 %v3942_v42, %v3941_v44  ;;  %v3859_v34 = vadd.f32 %v11086_v9, %v3810_v19  ;;  %v3811_v56 = vadd.f32 %v3658_v4, %v10925_v57  ;;  %v8165_v6 = vpop.f32.mrb[175].mxu0  ;;  %v8779_v44 = vld [vmem:[#allocation8 + $0x10] sm:$0xff]  }
 0x56f   :  { %v3901_v1 = vmax.f32 %v3859_v34, 0.0  ;;  %v3860_v22 = vadd.f32 %v11086_v9, %v3811_v56  ;;  %8255 = vmatmul.mubr.bf16.vlgmr.msra.gmra.mrb[164].mxu1 %v3982_v49  ;;  %v8781_v49 = vld [vmem:[#allocation8 + $0x18] sm:$0xff]   ;;  %v11968_v56 = vld [vmem:[#allocation59_spill] sm:$0xff] }
 0x570   :  { %8259 = vmatpush3.bf16.msra.mxu1 %v8776_v43  ;;  %8274 = vmatprep.mubr.msk.bf16.mxu1 %vm9021_vm0, %v11795_v47 }
 0x571   :  { %v3902_v28 = vmax.f32 %v3860_v22, 0.0  ;;  %8260 = vmatprep.subr.bf16.mxu1 %v11795_v47  ;;  %v11114_v5 = vadd.f32 %v3901_v1, %v11966_v24  ;;  %v11969_v1 = vld [vmem:[#allocation60_spill] sm:$0xff] }
 0x572   :  { %v3663_v18 = vpop.f32.mrb[176].mxu0 }
 0x573   :  { %v11117_v52 = vadd.f32 %v3902_v28, %v11967_v12  ;;  %v3812_v57 = vadd.f32 %v3663_v18, %v10932_v0  ;;  %v8168_v48 = vpop.f32.mrb[177].mxu0  ;;  %v8783_v18 = vld [vmem:[#allocation8 + $0x20] sm:$0xff]  }
 0x574   :  { %8261 = vmatpush3.bf16.msra.mxu1 %v8777_v60  ;;  %v3666_v32 = vpop.f32.mrb[178].mxu0 }
 0x575   :  { %v3983_v11 = vpack.c.bf16 %v11117_v52, %v11114_v5  ;;  %v3861_v42 = vadd.f32 %v11086_v9, %v3812_v57  ;;  %v3813_v19 = vadd.f32 %v3666_v32, %v10935_v21  ;;  %v8169_v13 = vpop.f32.mrb[179].mxu0  ;;  %8262 = vmatprep.subr.bf16.mxu1 %v11795_v47  ;;  %v11983_v52 = vld [vmem:[#allocation23_spill] sm:$0xff] }
 0x576   :  { %v11970_v13 = vld [vmem:[#allocation61_spill] sm:$0xff] }
 0x577   :  { %v3903_v4 = vmax.f32 %v3861_v42, 0.0  ;;  %v3862_v43 = vadd.f32 %v11086_v9, %v3813_v19  ;;  %v8785_v42 = vld [vmem:[#allocation8 + $0x28] sm:$0xff]  }
 0x578   :  { %8263 = vmatpush3.bf16.msra.mxu1 %v8779_v44 }
 0x579   :  { %v3904_v0 = vmax.f32 %v3862_v43, 0.0  ;;  %8264 = vmatprep.subr.bf16.mxu1 %v11795_v47  ;;  %v11128_v6 = vadd.f32 %v3903_v4, %v11968_v56  ;;  %v11971_v43 = vld [vmem:[#allocation11_spill] sm:$0xff]  ;;  %v8787_v56 = vld [vmem:[#allocation8 + $0x30] sm:$0xff]  }
 0x57a   :  { %v3671_v34 = vpop.f32.mrb[180].mxu0 }
 0x57b   :  { %v11131_v22 = vadd.f32 %v3904_v0, %v11969_v1  ;;  %v3814_v21 = vadd.f32 %v3671_v34, %v10941_v2  ;;  %v8172_v60 = vpop.f32.mrb[181].mxu0 }
 0x57c   :  { %8265 = vmatpush3.bf16.msra.mxu1 %v8781_v49  ;;  %v3674_v28 = vpop.f32.mrb[182].mxu0 }
 0x57d   :  { %v3984_v24 = vpack.c.bf16 %v11131_v22, %v11128_v6  ;;  %v3863_v12 = vadd.f32 %v11086_v9, %v3814_v21  ;;  %v3815_v57 = vadd.f32 %v3674_v28, %v10944_v38  ;;  %v8173_v48 = vpop.f32.mrb[183].mxu0  ;;  %8266 = vmatprep.subr.bf16.mxu1 %v11795_v47  ;;  %v11990_v6 = vld [vmem:[#allocation30_spill] sm:$0xff] }
 0x57f   :  { %v3905_v32 = vmax.f32 %v3863_v12, 0.0  ;;  %v3864_v44 = vadd.f32 %v11086_v9, %v3815_v57  ;;  %v8789_v57 = vld [vmem:[#allocation8 + $0x38] sm:$0xff]  }
 0x580   :  { %8267 = vmatpush3.bf16.msra.mxu1 %v8783_v18 }
 0x581   :  { %v3906_v2 = vmax.f32 %v3864_v44, 0.0  ;;  %8268 = vmatprep.subr.bf16.mxu1 %v11795_v47  ;;  %v11142_v4 = vadd.f32 %v3905_v32, %v11970_v13  ;;  %v11972_v32 = vld [vmem:[#allocation12_spill] sm:$0xff] }
 0x582   :  { %v3679_v19 = vpop.f32.mrb[184].mxu0 }
 0x583   :  { %v11145_v49 = vadd.f32 %v3906_v2, %v11971_v43  ;;  %v3816_v38 = vadd.f32 %v3679_v19, %v10950_v58  ;;  %v8176_v0 = vpop.f32.mrb[185].mxu0  ;;  %v8791_v43 = vld [vmem:[#allocation8 + $0x80] sm:$0xff]  }
 0x584   :  { %8269 = vmatpush3.bf16.msra.mxu1 %v8785_v42  ;;  %v3682_v34 = vpop.f32.mrb[186].mxu0  ;;  %v11973_v42 = vld [vmem:[#allocation13_spill] sm:$0xff] }
 0x585   :  { %v3985_v1 = vpack.c.bf16 %v11145_v49, %v11142_v4  ;;  %v3865_v21 = vadd.f32 %v11086_v9, %v3816_v38  ;;  %v3817_v60 = vadd.f32 %v3682_v34, %v10953_v14  ;;  %v8177_v28 = vpop.f32.mrb[187].mxu0  ;;  %8270 = vmatprep.subr.bf16.mxu1 %v11795_v47  ;;  %v8792_v38 = vld [vmem:[#allocation8 + $0x1c0] sm:$0xff]   ;;  %v11998_v4 = vld [vmem:[#allocation38_spill] sm:$0xff] }
 0x587   :  { %v3907_v18 = vmax.f32 %v3865_v21, 0.0  ;;  %v3866_v12 = vadd.f32 %v11086_v9, %v3817_v60 }
 0x588   :  { %8271 = vmatpush3.bf16.msra.mxu1 %v8787_v56 }
 0x589   :  { %v3908_v58 = vmax.f32 %v3866_v12, 0.0  ;;  %8272 = vmatprep.subr.bf16.mxu1 %v11795_v47  ;;  %v3949_v44 = vadd.f32 %v3907_v18, %v11972_v32  ;;  %v8794_v18 = vld [vmem:[#allocation8 + $0x1c8] sm:$0xff]  }
 0x58a   :  { %v3687_v48 = vpop.f32.mrb[188].mxu0 }
 0x58b   :  { %v3950_v2 = vadd.f32 %v3908_v58, %v11973_v42  ;;  %v3818_v19 = vadd.f32 %v3687_v48, %v10960_v26  ;;  %v8180_v13 = vpop.f32.mrb[189].mxu0  ;;  %v8793_v26 = vld [vmem:[#allocation8 + $0x88] sm:$0xff]   ;;  %v8796_v42 = vld [vmem:[#allocation8 + $0x1d0] sm:$0xff]  }
 0x58c   :  { %8273 = vmatpush3.bf16.msra.mxu1 %v8789_v57  ;;  %v3690_v14 = vpop.f32.mrb[190].mxu0  ;;  %v11974_v57 = vld [vmem:[#allocation14_spill] sm:$0xff] }
 0x58d   :  { %v3986_v0 = vpack.c.bf16 %v3950_v2, %v3949_v44  ;;  %v3867_v34 = vadd.f32 %v11086_v9, %v3818_v19  ;;  %v3819_v56 = vadd.f32 %v3690_v14, %v10963_v15  ;;  %v8181_v21 = vpop.f32.mrb[191].mxu0  ;;  %8278 = vmatprep.subr.bf16.mxu1 %v11795_v47  ;;  %v8795_v44 = vld [vmem:[#allocation8 + $0x90] sm:$0xff]  }
 0x58e   :  { %v11976_v21 = vld [vmem:[#allocation16_spill] sm:$0xff] }
 0x58f   :  { %v3909_v60 = vmax.f32 %v3867_v34, 0.0  ;;  %v3868_v28 = vadd.f32 %v11086_v9, %v3819_v56  ;;  %8275 = vmatmul.mubr.bf16.vlgmr.msra.gmra.mrb[168].mxu1 %v3981_v55  ;;  %8355 = vmatmul.mubr.bf16.vlgmr.msra.gmra.mrb[248].mxu0 %v3986_v0  ;;  %v8798_v0 = vld [vmem:[#allocation8 + $0x1d8] sm:$0xff]  }
 0x590   :  { %8279 = vmatpush3.bf16.msra.mxu1 %v8791_v43  ;;  %8379 = vmatpush3.bf16.msra.mxu0 %v8792_v38  ;;  %v8797_v38 = vld [vmem:[#allocation8 + $0x98] sm:$0xff]  }
 0x591   :  { %v3910_v12 = vmax.f32 %v3868_v28, 0.0  ;;  %8280 = vmatprep.subr.bf16.mxu1 %v11795_v47  ;;  %8380 = vmatprep.subr.bf16.mxu0 %v11795_v47  ;;  %v11172_v10 = vadd.f32 %v3909_v60, %v11974_v57  ;;  %v11977_v60 = vld [vmem:[#allocation17_spill] sm:$0xff]  ;;  %v8800_v57 = vld [vmem:[#allocation8 + $0x1e0] sm:$0xff]  }
 0x592   :  { %v3695_v15 = vpop.f32.mrb[192].mxu0  ;;  %8294 = vmatprep.mubr.msk.bf16.mxu1 %vm9021_vm0, %v11795_v47  ;;  %8394 = vmatprep.mubr.msk.bf16.mxu0 %vm9021_vm0, %v11795_v47 }
 0x593   :  { %v11175_v55 = vadd.f32 %v3910_v12, %v11975_v23  ;;  %v3820_v58 = vadd.f32 %v3695_v15, %v10969_v51  ;;  %v8184_v48 = vpop.f32.mrb[193].mxu0  ;;  %v8799_v15 = vld [vmem:[#allocation8 + $0xa0] sm:$0xff]  }
 0x594   :  { %8281 = vmatpush3.bf16.msra.mxu1 %v8793_v26  ;;  %8381 = vmatpush3.bf16.msra.mxu0 %v8794_v18  ;;  %v3698_v32 = vpop.f32.mrb[194].mxu0 }
 0x595   :  { %v3987_v2 = vpack.c.bf16 %v11175_v55, %v11172_v10  ;;  %v3869_v19 = vadd.f32 %v11086_v9, %v3820_v58  ;;  %v3821_v13 = vadd.f32 %v3698_v32, %v10972_v46  ;;  %v8185_v14 = vpop.f32.mrb[195].mxu0  ;;  %8282 = vmatprep.subr.bf16.mxu1 %v11795_v47  ;;  %8382 = vmatprep.subr.bf16.mxu0 %v11795_v47  ;;  %v8859_v10 = vld [vmem:[#allocation8 + $0x210] sm:$0xff]  }
 0x596   :  { %v8860_v55 = vld [vmem:[#allocation8 + $0x3d0] sm:$0xff]  }
 0x597   :  { %v3911_v43 = vmax.f32 %v3869_v19, 0.0  ;;  %v3870_v51 = vadd.f32 %v11086_v9, %v3821_v13  ;;  %v8802_v19 = vld [vmem:[#allocation8 + $0x1e8] sm:$0xff]  }
 0x598   :  { %8283 = vmatpush3.bf16.msra.mxu1 %v8795_v44  ;;  %8383 = vmatpush3.bf16.msra.mxu0 %v8796_v42  ;;  %v8801_v42 = vld [vmem:[#allocation8 + $0xa8] sm:$0xff]  }
 0x599   :  { %v3912_v34 = vmax.f32 %v3870_v51, 0.0  ;;  %8284 = vmatprep.subr.bf16.mxu1 %v11795_v47  ;;  %8384 = vmatprep.subr.bf16.mxu0 %v11795_v47  ;;  %v11188_v46 = vadd.f32 %v3911_v43, %v11976_v21  ;;  %v11978_v43 = vld [vmem:[#allocation18_spill] sm:$0xff]  ;;  %v11979_v51 = vld [vmem:[#allocation19_spill] sm:$0xff]  ;;  %v8803_v21 = vld [vmem:[#allocation8 + $0xb0] sm:$0xff]  }
 0x59a   :  { %v3703_v56 = vpop.f32.mrb[196].mxu0 }
 0x59b   :  { %v11191_v28 = vadd.f32 %v3912_v34, %v11977_v60  ;;  %v3822_v26 = vadd.f32 %v3703_v56, %v10980_v50  ;;  %v8188_v18 = vpop.f32.mrb[197].mxu0 }
 0x59c   :  { %8285 = vmatpush3.bf16.msra.mxu1 %v8797_v38  ;;  %8385 = vmatpush3.bf16.msra.mxu0 %v8798_v0  ;;  %v3706_v12 = vpop.f32.mrb[198].mxu0 }
 0x59d   :  { %v3988_v23 = vpack.c.bf16 %v11191_v28, %v11188_v46  ;;  %v3871_v58 = vadd.f32 %v11086_v9, %v3822_v26  ;;  %v3823_v48 = vadd.f32 %v3706_v12, %v10983_v39  ;;  %v8189_v32 = vpop.f32.mrb[199].mxu0  ;;  %8286 = vmatprep.subr.bf16.mxu1 %v11795_v47  ;;  %8386 = vmatprep.subr.bf16.mxu0 %v11795_v47  ;;  %v8804_v46 = vld [vmem:[#allocation8 + $0x1f0] sm:$0xff]  }
 0x59e   :  { %v11980_v32 = vld [vmem:[#allocation20_spill] sm:$0xff] }
 0x59f   :  { %v3913_v44 = vmax.f32 %v3871_v58, 0.0  ;;  %v3872_v50 = vadd.f32 %v11086_v9, %v3823_v48 }
 0x5a0   :  { %8287 = vmatpush3.bf16.msra.mxu1 %v8799_v15  ;;  %8387 = vmatpush3.bf16.msra.mxu0 %v8800_v57  ;;  %v8805_v15 = vld [vmem:[#allocation8 + $0xb8] sm:$0xff]  }
 0x5a1   :  { %v3914_v13 = vmax.f32 %v3872_v50, 0.0  ;;  %8288 = vmatprep.subr.bf16.mxu1 %v11795_v47  ;;  %8388 = vmatprep.subr.bf16.mxu0 %v11795_v47  ;;  %v11204_v39 = vadd.f32 %v3913_v44, %v11978_v43  ;;  %v8806_v57 = vld [vmem:[#allocation8 + $0x1f8] sm:$0xff]   ;;  %v11981_v44 = vld [vmem:[#allocation21_spill] sm:$0xff]  ;;  %v8808_v43 = vld [vmem:[#allocation8 + $0x240] sm:$0xff]  }
 0x5a2   :  { %v3711_v14 = vpop.f32.mrb[200].mxu0 }
 0x5a3   :  { %v11207_v38 = vadd.f32 %v3914_v13, %v11979_v51  ;;  %v3824_v0 = vadd.f32 %v3711_v14, %v10991_v20  ;;  %v8192_v34 = vpop.f32.mrb[201].mxu0  ;;  %v8807_v14 = vld [vmem:[#allocation8 + $0xc0] sm:$0xff]  }
 0x5a4   :  { %8289 = vmatpush3.bf16.msra.mxu1 %v8801_v42  ;;  %8389 = vmatpush3.bf16.msra.mxu0 %v8802_v19  ;;  %v3714_v56 = vpop.f32.mrb[202].mxu0 }
 0x5a5   :  { %v3989_v60 = vpack.c.bf16 %v11207_v38, %v11204_v39  ;;  %v3873_v28 = vadd.f32 %v11086_v9, %v3824_v0  ;;  %v3825_v26 = vadd.f32 %v3714_v56, %v10994_v29  ;;  %v8193_v18 = vpop.f32.mrb[203].mxu0  ;;  %8290 = vmatprep.subr.bf16.mxu1 %v11795_v47  ;;  %8390 = vmatprep.subr.bf16.mxu0 %v11795_v47  ;;  %v8875_v39 = vld [vmem:[#allocation8 + $0x290] sm:$0xff]  }
 0x5a6   :  { %v11982_v18 = vld [vmem:[#allocation22_spill] sm:$0xff]  ;;  %v8876_v38 = vld [vmem:[#allocation8 + $0x450] sm:$0xff]  }
 0x5a7   :  { %v3915_v12 = vmax.f32 %v3873_v28, 0.0  ;;  %v3874_v20 = vadd.f32 %v11086_v9, %v3825_v26  ;;  %v8810_v28 = vld [vmem:[#allocation8 + $0x248] sm:$0xff]  }
 0x5a8   :  { %8291 = vmatpush3.bf16.msra.mxu1 %v8803_v21  ;;  %8391 = vmatpush3.bf16.msra.mxu0 %v8804_v46  ;;  %v8809_v46 = vld [vmem:[#allocation8 + $0xc8] sm:$0xff]  }
 0x5a9   :  { %v3916_v58 = vmax.f32 %v3874_v20, 0.0  ;;  %8292 = vmatprep.subr.bf16.mxu1 %v11795_v47  ;;  %8392 = vmatprep.subr.bf16.mxu0 %v11795_v47  ;;  %v11220_v29 = vadd.f32 %v3915_v12, %v11980_v32 }
 0x5aa   :  { %v3719_v48 = vpop.f32.mrb[204].mxu0 }
 0x5ab   :  { %v11223_v50 = vadd.f32 %v3916_v58, %v11981_v44  ;;  %v3826_v42 = vadd.f32 %v3719_v48, %v11002_v36  ;;  %v8196_v19 = vpop.f32.mrb[205].mxu0 }
 0x5ac   :  { %8293 = vmatpush3.bf16.msra.mxu1 %v8805_v15  ;;  %8393 = vmatpush3.bf16.msra.mxu0 %v8806_v57  ;;  %v3722_v13 = vpop.f32.mrb[206].mxu0  ;;  %v8811_v15 = vld [vmem:[#allocation8 + $0xd0] sm:$0xff]   ;;  %v8813_v19 = vld [vmem:[#allocation8 + $0xd8] sm:$0xff]  }
 0x5ad   :  { %v3990_v51 = vpack.c.bf16 %v11223_v50, %v11220_v29  ;;  %v3875_v0 = vadd.f32 %v11086_v9, %v3826_v42  ;;  %v3827_v34 = vadd.f32 %v3722_v13, %v11005_v7  ;;  %v8197_v56 = vpop.f32.mrb[207].mxu0  ;;  %8298 = vmatprep.subr.bf16.mxu1 %v11795_v47  ;;  %8418 = vmatprep.subr.bf16.mxu0 %v11795_v47  ;;  %v8812_v57 = vld [vmem:[#allocation8 + $0x250] sm:$0xff]   ;;  %v8814_v13 = vld [vmem:[#allocation8 + $0x258] sm:$0xff]  }
 0x5af   :  { %v3917_v21 = vmax.f32 %v3875_v0, 0.0  ;;  %v3876_v36 = vadd.f32 %v11086_v9, %v3827_v34  ;;  %8295 = vmatmul.mubr.bf16.vlgmr.msra.gmra.mrb[172].mxu1 %v3983_v11  ;;  %8395 = vmatmul.mubr.bf16.vlgmr.msra.gmra.mrb[252].mxu0 %v3988_v23  ;;  %v11984_v0 = vld [vmem:[#allocation24_spill] sm:$0xff]  ;;  %v11985_v34 = vld [vmem:[#allocation25_spill] sm:$0xff] }
 0x5b0   :  { %8299 = vmatpush3.bf16.msra.mxu1 %v8807_v14  ;;  %8419 = vmatpush3.bf16.msra.mxu0 %v8808_v43 }
 0x5b1   :  { %v3918_v26 = vmax.f32 %v3876_v36, 0.0  ;;  %8300 = vmatprep.subr.bf16.mxu1 %v11795_v47  ;;  %8420 = vmatprep.subr.bf16.mxu0 %v11795_v47  ;;  %v11243_v5 = vadd.f32 %v3917_v21, %v11982_v18 }
 0x5b2   :  { %v3727_v7 = vpop.f32.mrb[208].mxu0  ;;  %8314 = vmatprep.mubr.msk.bf16.mxu1 %vm9021_vm0, %v11795_v47  ;;  %8434 = vmatprep.mubr.msk.bf16.mxu0 %vm9021_vm0, %v11795_v47 }
 0x5b3   :  { %v11246_v11 = vadd.f32 %v3918_v26, %v11983_v52  ;;  %v3828_v23 = vadd.f32 %v3727_v7, %v11013_v17  ;;  %v8200_v12 = vpop.f32.mrb[209].mxu0  ;;  %v8816_v26 = vld [vmem:[#allocation8 + $0x260] sm:$0xff]  }
 0x5b4   :  { %8301 = vmatpush3.bf16.msra.mxu1 %v8809_v46  ;;  %8421 = vmatpush3.bf16.msra.mxu0 %v8810_v28  ;;  %v3730_v20 = vpop.f32.mrb[210].mxu0  ;;  %v8815_v28 = vld [vmem:[#allocation8 + $0xe0] sm:$0xff]  }
 0x5b5   :  { %v3991_v58 = vpack.c.bf16 %v11246_v11, %v11243_v5  ;;  %v3877_v48 = vadd.f32 %v11086_v9, %v3828_v23  ;;  %v3829_v32 = vadd.f32 %v3730_v20, %v11016_v62  ;;  %v8201_v44 = vpop.f32.mrb[211].mxu0  ;;  %8302 = vmatprep.subr.bf16.mxu1 %v11795_v47  ;;  %8422 = vmatprep.subr.bf16.mxu0 %v11795_v47  ;;  %v8817_v20 = vld [vmem:[#allocation8 + $0xe8] sm:$0xff]   ;;  %v8891_v5 = vld [vmem:[#allocation8 + $0x310] sm:$0xff]  }
 0x5b6   :  { %v11987_v44 = vld [vmem:[#allocation27_spill] sm:$0xff]  ;;  %v8892_v11 = vld [vmem:[#allocation8 + $0x4d0] sm:$0xff]  }
 0x5b7   :  { %v3919_v42 = vmax.f32 %v3877_v48, 0.0  ;;  %v3878_v17 = vadd.f32 %v11086_v9, %v3829_v32  ;;  %v11986_v32 = vld [vmem:[#allocation26_spill] sm:$0xff] }
 0x5b8   :  { %8303 = vmatpush3.bf16.msra.mxu1 %v8811_v15  ;;  %8423 = vmatpush3.bf16.msra.mxu0 %v8812_v57  ;;  %v8818_v15 = vld [vmem:[#allocation8 + $0x268] sm:$0xff]  }
 0x5b9   :  { %v3920_v14 = vmax.f32 %v3878_v17, 0.0  ;;  %8304 = vmatprep.subr.bf16.mxu1 %v11795_v47  ;;  %8424 = vmatprep.subr.bf16.mxu0 %v11795_v47  ;;  %v11259_v62 = vadd.f32 %v3919_v42, %v11984_v0 }
 0x5ba   :  { %v3735_v43 = vpop.f32.mrb[212].mxu0 }
 0x5bb   :  { %v11262_v56 = vadd.f32 %v3920_v14, %v11985_v34  ;;  %v3830_v21 = vadd.f32 %v3735_v43, %v11022_v54  ;;  %v8204_v36 = vpop.f32.mrb[213].mxu0  ;;  %v8819_v14 = vld [vmem:[#allocation8 + $0xf0] sm:$0xff]  }
 0x5bc   :  { %8305 = vmatpush3.bf16.msra.mxu1 %v8813_v19  ;;  %8425 = vmatpush3.bf16.msra.mxu0 %v8814_v13  ;;  %v3738_v46 = vpop.f32.mrb[214].mxu0  ;;  %v8820_v43 = vld [vmem:[#allocation8 + $0x270] sm:$0xff]  }
 0x5bd   :  { %v3992_v7 = vpack.c.bf16 %v11262_v56, %v11259_v62  ;;  %v3879_v18 = vadd.f32 %v11086_v9, %v3830_v21  ;;  %v3831_v52 = vadd.f32 %v3738_v46, %v11025_v3  ;;  %v8205_v23 = vpop.f32.mrb[215].mxu0  ;;  %8306 = vmatprep.subr.bf16.mxu1 %v11795_v47  ;;  %8426 = vmatprep.subr.bf16.mxu0 %v11795_v47 }
 0x5be   :  { %v11988_v23 = vld [vmem:[#allocation28_spill] sm:$0xff] }
 0x5bf   :  { %v3921_v12 = vmax.f32 %v3879_v18, 0.0  ;;  %v3880_v54 = vadd.f32 %v11086_v9, %v3831_v52 }
 0x5c0   :  { %8307 = vmatpush3.bf16.msra.mxu1 %v8815_v28  ;;  %8427 = vmatpush3.bf16.msra.mxu0 %v8816_v26  ;;  %v8821_v28 = vld [vmem:[#allocation8 + $0xf8] sm:$0xff]  }
 0x5c1   :  { %v3922_v57 = vmax.f32 %v3880_v54, 0.0  ;;  %8308 = vmatprep.subr.bf16.mxu1 %v11795_v47  ;;  %8428 = vmatprep.subr.bf16.mxu0 %v11795_v47  ;;  %v11275_v3 = vadd.f32 %v3921_v12, %v11986_v32  ;;  %v8822_v26 = vld [vmem:[#allocation8 + $0x278] sm:$0xff]   ;;  %v11989_v12 = vld [vmem:[#allocation29_spill] sm:$0xff]  ;;  %v8824_v32 = vld [vmem:[#allocation8 + $0x2c0] sm:$0xff]  }
 0x5c2   :  { %v3743_v48 = vpop.f32.mrb[216].mxu0 }
 0x5c3   :  { %v11278_v42 = vadd.f32 %v3922_v57, %v11987_v44  ;;  %v3832_v17 = vadd.f32 %v3743_v48, %v11031_v33  ;;  %v8208_v19 = vpop.f32.mrb[217].mxu0  ;;  %v8823_v48 = vld [vmem:[#allocation8 + $0x100] sm:$0xff]  }
 0x5c4   :  { %8309 = vmatpush3.bf16.msra.mxu1 %v8817_v20  ;;  %8429 = vmatpush3.bf16.msra.mxu0 %v8818_v15  ;;  %v3746_v13 = vpop.f32.mrb[218].mxu0 }
 0x5c5   :  { %v3993_v0 = vpack.c.bf16 %v11278_v42, %v11275_v3  ;;  %v3881_v34 = vadd.f32 %v11086_v9, %v3832_v17  ;;  %v3833_v21 = vadd.f32 %v3746_v13, %v11034_v45  ;;  %v8209_v36 = vpop.f32.mrb[219].mxu0  ;;  %8310 = vmatprep.subr.bf16.mxu1 %v11795_v47  ;;  %8430 = vmatprep.subr.bf16.mxu0 %v11795_v47  ;;  %v8907_v3 = vld [vmem:[#allocation8 + $0x3a0] sm:$0xff]   ;;  %v8908_v42 = vld [vmem:[#allocation8 + $0x3a8] sm:$0xff]  }
 0x5c7   :  { %v3923_v46 = vmax.f32 %v3881_v34, 0.0  ;;  %v3882_v33 = vadd.f32 %v11086_v9, %v3833_v21 }
 0x5c8   :  { %8311 = vmatpush3.bf16.msra.mxu1 %v8819_v14  ;;  %8431 = vmatpush3.bf16.msra.mxu0 %v8820_v43  ;;  %v8825_v43 = vld [vmem:[#allocation8 + $0x108] sm:$0xff]  }
 0x5c9   :  { %v3924_v18 = vmax.f32 %v3882_v33, 0.0  ;;  %8312 = vmatprep.subr.bf16.mxu1 %v11795_v47  ;;  %8432 = vmatprep.subr.bf16.mxu0 %v11795_v47  ;;  %v11291_v45 = vadd.f32 %v3923_v46, %v11988_v23  ;;  %v8827_v46 = vld [vmem:[#allocation8 + $0x110] sm:$0xff]  }
 0x5ca   :  { %v3751_v52 = vpop.f32.mrb[220].mxu0  ;;  %v8828_v33 = vld [vmem:[#allocation8 + $0x2d0] sm:$0xff]  }
 0x5cb   :  { %v11294_v54 = vadd.f32 %v3924_v18, %v11989_v12  ;;  %v3834_v20 = vadd.f32 %v3751_v52, %v11040_v35  ;;  %v8212_v15 = vpop.f32.mrb[221].mxu0  ;;  %v8829_v12 = vld [vmem:[#allocation8 + $0x118] sm:$0xff]  }
 0x5cc   :  { %8313 = vmatpush3.bf16.msra.mxu1 %v8821_v28  ;;  %8433 = vmatpush3.bf16.msra.mxu0 %v8822_v26  ;;  %v3754_v57 = vpop.f32.mrb[222].mxu0 }
 0x5cd   :  { %v3994_v44 = vpack.c.bf16 %v11294_v54, %v11291_v45  ;;  %v3883_v17 = vadd.f32 %v11086_v9, %v3834_v20  ;;  %v3835_v19 = vadd.f32 %v3754_v57, %v11043_v31  ;;  %v8213_v13 = vpop.f32.mrb[223].mxu0  ;;  %8318 = vmatprep.subr.bf16.mxu1 %v11795_v47  ;;  %8458 = vmatprep.subr.bf16.mxu0 %v11795_v47  ;;  %v8826_v31 = vld [vmem:[#allocation8 + $0x2c8] sm:$0xff]   ;;  %v8830_v20 = vld [vmem:[#allocation8 + $0x2d8] sm:$0xff]   ;;  %v8863_v54 = vld [vmem:[#allocation8 + $0x220] sm:$0xff]  }
 0x5ce   :  { %v8862_v45 = vld [vmem:[#allocation8 + $0x3d8] sm:$0xff]  }
 0x5cf   :  { %v3925_v14 = vmax.f32 %v3883_v17, 0.0  ;;  %v3884_v35 = vadd.f32 %v11086_v9, %v3835_v19  ;;  %8315 = vmatmul.mubr.bf16.vlgmr.msra.gmra.mrb[176].mxu1 %v3984_v24  ;;  %8435 = vmatmul.mubr.bf16.vlgmr.msra.gmra.mrb[0].mxu0 %v3990_v51  ;;  %v11991_v24 = vld [vmem:[#allocation31_spill] sm:$0xff] }
 0x5d0   :  { %8319 = vmatpush3.bf16.msra.mxu1 %v8823_v48  ;;  %8459 = vmatpush3.bf16.msra.mxu0 %v8824_v32  ;;  %v11992_v48 = vld [vmem:[#allocation32_spill] sm:$0xff]  ;;  %v11993_v32 = vld [vmem:[#allocation33_spill] sm:$0xff] }
 0x5d1   :  { %v3926_v34 = vmax.f32 %v3884_v35, 0.0  ;;  %8320 = vmatprep.subr.bf16.mxu1 %v11795_v47  ;;  %8460 = vmatprep.subr.bf16.mxu0 %v11795_v47  ;;  %v11317_v22 = vadd.f32 %v3925_v14, %v11990_v6  ;;  %v8831_v35 = vld [vmem:[#allocation8 + $0x120] sm:$0xff]  }
 0x5d2   :  { %v3759_v21 = vpop.f32.mrb[224].mxu0  ;;  %8334 = vmatprep.mubr.msk.bf16.mxu1 %vm9021_vm0, %v11795_v47  ;;  %8474 = vmatprep.mubr.msk.bf16.mxu0 %vm9021_vm0, %v11795_v47 }
 0x5d3   :  { %v11320_v29 = vadd.f32 %v3926_v34, %v11991_v24  ;;  %v3836_v50 = vadd.f32 %v3759_v21, %v11049_v61  ;;  %v8216_v51 = vpop.f32.mrb[225].mxu0 }
 0x5d4   :  { %8321 = vmatpush3.bf16.msra.mxu1 %v8825_v43  ;;  %8461 = vmatpush3.bf16.msra.mxu0 %v8826_v31  ;;  %v3762_v36 = vpop.f32.mrb[226].mxu0  ;;  %v8832_v43 = vld [vmem:[#allocation8 + $0x2e0] sm:$0xff]   ;;  %v8834_v51 = vld [vmem:[#allocation8 + $0x2e8] sm:$0xff]  }
 0x5d5   :  { %v3995_v28 = vpack.c.bf16 %v11320_v29, %v11317_v22  ;;  %v3885_v26 = vadd.f32 %v11086_v9, %v3836_v50  ;;  %v3837_v18 = vadd.f32 %v3762_v36, %v11051_v27  ;;  %v8217_v52 = vpop.f32.mrb[227].mxu0  ;;  %8322 = vmatprep.subr.bf16.mxu1 %v11795_v47  ;;  %8462 = vmatprep.subr.bf16.mxu0 %v11795_v47  ;;  %v8833_v50 = vld [vmem:[#allocation8 + $0x128] sm:$0xff]  }
 0x5d6   :  { %v8916_v22 = vld [vmem:[#allocation8 + $0x428] sm:$0xff]  }
 0x5d7   :  { %v3927_v23 = vmax.f32 %v3885_v26, 0.0  ;;  %v3886_v61 = vadd.f32 %v11086_v9, %v3837_v18  ;;  %v11995_v26 = vld [vmem:[#allocation35_spill] sm:$0xff] }
 0x5d8   :  { %8323 = vmatpush3.bf16.msra.mxu1 %v8827_v46  ;;  %8463 = vmatpush3.bf16.msra.mxu0 %v8828_v33  ;;  %v11994_v33 = vld [vmem:[#allocation34_spill] sm:$0xff] }
 0x5d9   :  { %v3928_v15 = vmax.f32 %v3886_v61, 0.0  ;;  %8324 = vmatprep.subr.bf16.mxu1 %v11795_v47  ;;  %8464 = vmatprep.subr.bf16.mxu0 %v11795_v47  ;;  %v11333_v27 = vadd.f32 %v3927_v23, %v11992_v48 }
 0x5da   :  { %v3767_v57 = vpop.f32.mrb[228].mxu0 }
 0x5db   :  { %v11336_v17 = vadd.f32 %v3928_v15, %v11993_v32  ;;  %v3838_v19 = vadd.f32 %v3767_v57, %v11055_v63  ;;  %v8220_v13 = vpop.f32.mrb[229].mxu0 }
 0x5dc   :  { %8325 = vmatpush3.bf16.msra.mxu1 %v8829_v12  ;;  %8465 = vmatpush3.bf16.msra.mxu0 %v8830_v20  ;;  %v3770_v14 = vpop.f32.mrb[230].mxu0  ;;  %v8835_v12 = vld [vmem:[#allocation8 + $0x130] sm:$0xff]   ;;  %v8837_v13 = vld [vmem:[#allocation8 + $0x138] sm:$0xff]  }
 0x5dd   :  { %v3996_v31 = vpack.c.bf16 %v11336_v17, %v11333_v27  ;;  %v3887_v34 = vadd.f32 %v11086_v9, %v3838_v19  ;;  %v3839_v21 = vadd.f32 %v3770_v14, %v11057_v30  ;;  %v8221_v6 = vpop.f32.mrb[231].mxu0  ;;  %8326 = vmatprep.subr.bf16.mxu1 %v11795_v47  ;;  %8466 = vmatprep.subr.bf16.mxu0 %v11795_v47  ;;  %v8836_v20 = vld [vmem:[#allocation8 + $0x2f0] sm:$0xff]   ;;  %v8838_v14 = vld [vmem:[#allocation8 + $0x2f8] sm:$0xff]   ;;  %v8879_v17 = vld [vmem:[#allocation8 + $0x2a0] sm:$0xff]  }
 0x5de   :  { %v8878_v27 = vld [vmem:[#allocation8 + $0x458] sm:$0xff]  }
 0x5df   :  { %v3929_v24 = vmax.f32 %v3887_v34, 0.0  ;;  %v3888_v63 = vadd.f32 %v11086_v9, %v3839_v21  ;;  %v11996_v34 = vld [vmem:[#allocation36_spill] sm:$0xff]  ;;  %v11997_v21 = vld [vmem:[#allocation37_spill] sm:$0xff] }
 0x5e0   :  { %8327 = vmatpush3.bf16.msra.mxu1 %v8831_v35  ;;  %8467 = vmatpush3.bf16.msra.mxu0 %v8832_v43 }
 0x5e1   :  { %v3930_v36 = vmax.f32 %v3888_v63, 0.0  ;;  %8328 = vmatprep.subr.bf16.mxu1 %v11795_v47  ;;  %8468 = vmatprep.subr.bf16.mxu0 %v11795_v47  ;;  %v11349_v30 = vadd.f32 %v3929_v24, %v11994_v33 }
 0x5e2   :  { %v3775_v46 = vpop.f32.mrb[232].mxu0 }
 0x5e3   :  { %v11352_v18 = vadd.f32 %v3930_v36, %v11995_v26  ;;  %v3840_v52 = vadd.f32 %v3775_v46, %v11061_v53  ;;  %v8224_v23 = vpop.f32.mrb[233].mxu0  ;;  %v8840_v36 = vld [vmem:[#allocation8 + $0x340] sm:$0xff]  }
 0x5e4   :  { %8329 = vmatpush3.bf16.msra.mxu1 %v8833_v50  ;;  %8469 = vmatpush3.bf16.msra.mxu0 %v8834_v51  ;;  %v3778_v61 = vpop.f32.mrb[234].mxu0  ;;  %v8839_v51 = vld [vmem:[#allocation8 + $0x180] sm:$0xff]  }
 0x5e5   :  { %v3997_v15 = vpack.c.bf16 %v11352_v18, %v11349_v30  ;;  %v3889_v57 = vadd.f32 %v11086_v9, %v3840_v52  ;;  %v3841_v48 = vadd.f32 %v3778_v61, %v11063_v59  ;;  %v8225_v32 = vpop.f32.mrb[235].mxu0  ;;  %8330 = vmatprep.subr.bf16.mxu1 %v11795_v47  ;;  %8470 = vmatprep.subr.bf16.mxu0 %v11795_v47  ;;  %v8841_v61 = vld [vmem:[#allocation8 + $0x188] sm:$0xff]  }
 0x5e6   :  { %v8844_v32 = vld [vmem:[#allocation8 + $0x350] sm:$0xff]   ;;  %v8924_v30 = vld [vmem:[#allocation8 + $0x4a8] sm:$0xff]  }
 0x5e7   :  { %v3931_v19 = vmax.f32 %v3889_v57, 0.0  ;;  %v3890_v53 = vadd.f32 %v11086_v9, %v3841_v48  ;;  %v8843_v48 = vld [vmem:[#allocation8 + $0x190] sm:$0xff]  }
 0x5e8   :  { %8331 = vmatpush3.bf16.msra.mxu1 %v8835_v12  ;;  %8471 = vmatpush3.bf16.msra.mxu0 %v8836_v20 }
 0x5e9   :  { %v3932_v35 = vmax.f32 %v3890_v53, 0.0  ;;  %8332 = vmatprep.subr.bf16.mxu1 %v11795_v47  ;;  %8472 = vmatprep.subr.bf16.mxu0 %v11795_v47  ;;  %v11365_v59 = vadd.f32 %v3931_v19, %v11996_v34  ;;  %v8846_v34 = vld [vmem:[#allocation8 + $0x358] sm:$0xff]  }
 0x5ea   :  { %v3783_v43 = vpop.f32.mrb[236].mxu0 }
 0x5eb   :  { %v11368_v6 = vadd.f32 %v3932_v35, %v11997_v21  ;;  %v3842_v24 = vadd.f32 %v3783_v43, %v11067_v8  ;;  %v8228_v63 = vpop.f32.mrb[237].mxu0  ;;  %v8845_v43 = vld [vmem:[#allocation8 + $0x198] sm:$0xff]  }
 0x5ec   :  { %8333 = vmatpush3.bf16.msra.mxu1 %v8837_v13  ;;  %8473 = vmatpush3.bf16.msra.mxu0 %v8838_v14  ;;  %v3786_v50 = vpop.f32.mrb[238].mxu0  ;;  %v12000_v63 = vld [vmem:[#allocation40_spill] sm:$0xff] }
 0x5ed   :  { %v3998_v46 = vpack.c.bf16 %v11368_v6, %v11365_v59  ;;  %v3891_v33 = vadd.f32 %v11086_v9, %v3842_v24  ;;  %v3843_v26 = vadd.f32 %v3786_v50, %v11069_v40  ;;  %v8229_v52 = vpop.f32.mrb[239].mxu0  ;;  %8358 = vmatprep.subr.bf16.mxu1 %v11795_v47  ;;  %8498 = vmatprep.subr.bf16.mxu0 %v11795_v47  ;;  %v8842_v40 = vld [vmem:[#allocation8 + $0x348] sm:$0xff]   ;;  %v12001_v50 = vld [vmem:[#allocation41_spill] sm:$0xff]  ;;  %v8894_v59 = vld [vmem:[#allocation8 + $0x4d8] sm:$0xff]  }
 0x5ee   :  { %v8847_v52 = vld [vmem:[#allocation8 + $0x1a0] sm:$0xff]  }
 0x5ef   :  { %v3933_v23 = vmax.f32 %v3891_v33, 0.0  ;;  %v3892_v8 = vadd.f32 %v11086_v9, %v3843_v26  ;;  %8335 = vmatmul.mubr.bf16.vlgmr.msra.gmra.mrb[180].mxu1 %v3985_v1  ;;  %8475 = vmatmul.mubr.bf16.vlgmr.msra.gmra.mrb[4].mxu0 %v3992_v7  ;;  %v11999_v1 = vld [vmem:[#allocation39_spill] sm:$0xff] }
 0x5f0   :  { %8359 = vmatpush3.bf16.msra.mxu1 %v8839_v51  ;;  %8499 = vmatpush3.bf16.msra.mxu0 %v8840_v36  ;;  %v8895_v6 = vld [vmem:[#allocation8 + $0x320] sm:$0xff]  }
 0x5f1   :  { %v3934_v12 = vmax.f32 %v3892_v8, 0.0  ;;  %8360 = vmatprep.subr.bf16.mxu1 %v11795_v47  ;;  %8500 = vmatprep.subr.bf16.mxu0 %v11795_v47  ;;  %v11391_v49 = vadd.f32 %v3933_v23, %v11998_v4  ;;  %v8848_v23 = vld [vmem:[#allocation8 + $0x360] sm:$0xff]   ;;  %v8849_v4 = vld [vmem:[#allocation8 + $0x1a8] sm:$0xff]  }
 0x5f2   :  { %v3791_v20 = vpop.f32.mrb[240].mxu0  ;;  %8374 = vmatprep.mubr.msk.bf16.mxu1 %vm9021_vm0, %v11795_v47  ;;  %8514 = vmatprep.mubr.msk.bf16.mxu0 %vm9021_vm0, %v11795_v47 }
 0x5f3   :  { %v11394_v62 = vadd.f32 %v3934_v12, %v11999_v1  ;;  %v3844_v56 = vadd.f32 %v3791_v20, %v11073_v41  ;;  %v8232_v7 = vpop.f32.mrb[241].mxu0  ;;  %v8850_v1 = vld [vmem:[#allocation8 + $0x368] sm:$0xff]  }
 0x5f4   :  { %8361 = vmatpush3.bf16.msra.mxu1 %v8841_v61  ;;  %8501 = vmatpush3.bf16.msra.mxu0 %v8842_v40  ;;  %v3794_v57 = vpop.f32.mrb[242].mxu0  ;;  %v12002_v7 = vld [vmem:[#allocation43_spill] sm:$0xff] }
 0x5f5   :  { %v3999_v19 = vpack.c.bf16 %v11394_v62, %v11391_v49  ;;  %v3893_v53 = vadd.f32 %v11086_v9, %v3844_v56  ;;  %v3845_v13 = vadd.f32 %v3794_v57, %v11075_v16  ;;  %8362 = vmatprep.subr.bf16.mxu1 %v11795_v47  ;;  %8502 = vmatprep.subr.bf16.mxu0 %v11795_v47  ;;  %v8233_v14 = vpop.f32.mrb[243].mxu0  ;;  %v8932_v49 = vld [vmem:[#allocation8 + $0x528] sm:$0xff]  }
 0x5f6   :  { %v8854_v14 = vld [vmem:[#allocation8 + $0x378] sm:$0xff]  }
 0x5f7   :  { %v3935_v35 = vmax.f32 %v3893_v53, 0.0  ;;  %v3894_v41 = vadd.f32 %v11086_v9, %v3845_v13  ;;  %v8852_v53 = vld [vmem:[#allocation8 + $0x370] sm:$0xff]   ;;  %v8853_v13 = vld [vmem:[#allocation8 + $0x1b8] sm:$0xff]  }
 0x5f8   :  { %8363 = vmatpush3.bf16.msra.mxu1 %v8843_v48  ;;  %8503 = vmatpush3.bf16.msra.mxu0 %v8844_v32  ;;  %v8851_v32 = vld [vmem:[#allocation8 + $0x1b0] sm:$0xff]  }
 0x5f9   :  { %v3936_v21 = vmax.f32 %v3894_v41, 0.0  ;;  %8364 = vmatprep.subr.bf16.mxu1 %v11795_v47  ;;  %8504 = vmatprep.subr.bf16.mxu0 %v11795_v47  ;;  %v11407_v16 = vadd.f32 %v3935_v35, %v12000_v63  ;;  %v8855_v35 = vld [vmem:[#allocation8 + $0x200] sm:$0xff]   ;;  %v8867_v63 = vld [vmem:[#allocation8 + $0x230] sm:$0xff]  }
 0x5fa   :  { %v3799_v24 = vpop.f32.mrb[244].mxu0  ;;  %v8856_v41 = vld [vmem:[#allocation8 + $0x3c0] sm:$0xff]  }
 0x5fb   :  { %v11410_v51 = vadd.f32 %v3936_v21, %v12001_v50  ;;  %v3846_v36 = vadd.f32 %v3799_v24, %v11079_v25  ;;  %v8236_v33 = vpop.f32.mrb[245].mxu0  ;;  %v8865_v21 = vld [vmem:[#allocation8 + $0x228] sm:$0xff]   ;;  %v8868_v50 = vld [vmem:[#allocation8 + $0x3f0] sm:$0xff]  }
 0x5fc   :  { %8365 = vmatpush3.bf16.msra.mxu1 %v8845_v43  ;;  %8505 = vmatpush3.bf16.msra.mxu0 %v8846_v34  ;;  %v3802_v26 = vpop.f32.mrb[246].mxu0  ;;  %v8857_v43 = vld [vmem:[#allocation8 + $0x208] sm:$0xff]   ;;  %v8870_v33 = vld [vmem:[#allocation8 + $0x3f8] sm:$0xff]  }
 0x5fd   :  { %v4000_v8 = vpack.c.bf16 %v11410_v51, %v11407_v16  ;;  %v3895_v61 = vadd.f32 %v11086_v9, %v3846_v36  ;;  %v3847_v40 = vadd.f32 %v3802_v26, %v11081_v37  ;;  %8366 = vmatprep.subr.bf16.mxu1 %v11795_v47  ;;  %8506 = vmatprep.subr.bf16.mxu0 %v11795_v47  ;;  %v8237_v12 = vpop.f32.mrb[247].mxu0  ;;  %v12003_v37 = vld [vmem:[#allocation42_spill] sm:$0xff]  ;;  %v8858_v34 = vld [vmem:[#allocation8 + $0x3c8] sm:$0xff]   ;;  %v8871_v26 = vld [vmem:[#allocation8 + $0x280] sm:$0xff]  }
 0x5fe   :  { %v8866_v24 = vld [vmem:[#allocation8 + $0x3e8] sm:$0xff]   ;;  %v8869_v36 = vld [vmem:[#allocation8 + $0x238] sm:$0xff]  }
 0x5ff   :  { %v3937_v20 = vmax.f32 %v3895_v61, 0.0  ;;  %v3896_v25 = vadd.f32 %v11086_v9, %v3847_v40  ;;  %v8874_v61 = vld [vmem:[#allocation8 + $0x448] sm:$0xff]  }
 0x600   :  { %8367 = vmatpush3.bf16.msra.mxu1 %v8847_v52  ;;  %8507 = vmatpush3.bf16.msra.mxu0 %v8848_v23  ;;  %v8872_v52 = vld [vmem:[#allocation8 + $0x440] sm:$0xff]   ;;  %v8873_v23 = vld [vmem:[#allocation8 + $0x288] sm:$0xff]  }
 0x601   :  { %v3938_v56 = vmax.f32 %v3896_v25, 0.0  ;;  %8368 = vmatprep.subr.bf16.mxu1 %v11795_v47  ;;  %8508 = vmatprep.subr.bf16.mxu0 %v11795_v47  ;;  %v11423_v57 = vadd.f32 %v3937_v20, %v12002_v7  ;;  %v8881_v40 = vld [vmem:[#allocation8 + $0x2a8] sm:$0xff]  }
 0x602   :  { %v8882_v12 = vld [vmem:[#allocation8 + $0x468] sm:$0xff]  }
 0x603   :  { %v11426_v48 = vadd.f32 %v3938_v56, %v12003_v37  ;;  %v8884_v56 = vld [vmem:[#allocation8 + $0x470] sm:$0xff]   ;;  %v8885_v37 = vld [vmem:[#allocation8 + $0x2b8] sm:$0xff]  }
 0x604   :  { %8369 = vmatpush3.bf16.msra.mxu1 %v8849_v4  ;;  %8509 = vmatpush3.bf16.msra.mxu0 %v8850_v1  ;;  %v8883_v1 = vld [vmem:[#allocation8 + $0x2b0] sm:$0xff]  }
 0x605   :  { %v4001_v9 = vpack.c.bf16 %v11426_v48, %v11423_v57  ;;  %8370 = vmatprep.subr.bf16.mxu1 %v11795_v47  ;;  %8510 = vmatprep.subr.bf16.mxu0 %v11795_v47 }
 0x608   :  { %8371 = vmatpush3.bf16.msra.mxu1 %v8851_v32  ;;  %8511 = vmatpush3.bf16.msra.mxu0 %v8852_v53  ;;  %v8886_v32 = vld [vmem:[#allocation8 + $0x478] sm:$0xff]   ;;  %v8887_v53 = vld [vmem:[#allocation8 + $0x300] sm:$0xff]  }
 0x609   :  { %8372 = vmatprep.subr.bf16.mxu1 %v11795_v47  ;;  %8512 = vmatprep.subr.bf16.mxu0 %v11795_v47 }
 0x60c   :  { %8373 = vmatpush3.bf16.msra.mxu1 %v8853_v13  ;;  %8513 = vmatpush3.bf16.msra.mxu0 %v8854_v14  ;;  %v8888_v13 = vld [vmem:[#allocation8 + $0x4c0] sm:$0xff]   ;;  %v8889_v14 = vld [vmem:[#allocation8 + $0x308] sm:$0xff]  }
 0x60d   :  { %8398 = vmatprep.subr.bf16.mxu1 %v11795_v47  ;;  %8538 = vmatprep.subr.bf16.mxu0 %v11795_v47 }
 0x60f   :  { %8375 = vmatmul.mubr.bf16.vlgmr.msra.gmra.mrb[184].mxu1 %v3987_v2  ;;  %8515 = vmatmul.mubr.bf16.vlgmr.msra.gmra.mrb[8].mxu0 %v3994_v44  ;;  %v8861_v2 = vld [vmem:[#allocation8 + $0x218] sm:$0xff]   ;;  %v8864_v44 = vld [vmem:[#allocation8 + $0x3e0] sm:$0xff]  }
 0x610   :  { %8399 = vmatpush3.bf16.msra.mxu1 %v8855_v35  ;;  %8539 = vmatpush3.bf16.msra.mxu0 %v8856_v41  ;;  %v8890_v35 = vld [vmem:[#allocation8 + $0x4c8] sm:$0xff]  }
 0x611   :  { %8400 = vmatprep.subr.bf16.mxu1 %v11795_v47  ;;  %8540 = vmatprep.subr.bf16.mxu0 %v11795_v47  ;;  %v8897_v41 = vld [vmem:[#allocation8 + $0x328] sm:$0xff]  }
 0x612   :  { %8414 = vmatprep.mubr.msk.bf16.mxu1 %vm9021_vm0, %v11795_v47  ;;  %8554 = vmatprep.mubr.msk.bf16.mxu0 %vm9021_vm0, %v11795_v47 }
 0x614   :  { %8401 = vmatpush3.bf16.msra.mxu1 %v8857_v43  ;;  %8541 = vmatpush3.bf16.msra.mxu0 %v8858_v34  ;;  %v8898_v43 = vld [vmem:[#allocation8 + $0x4e8] sm:$0xff]  }
 0x615   :  { %8402 = vmatprep.subr.bf16.mxu1 %v11795_v47  ;;  %8542 = vmatprep.subr.bf16.mxu0 %v11795_v47 }
 0x618   :  { %8403 = vmatpush3.bf16.msra.mxu1 %v8859_v10  ;;  %8543 = vmatpush3.bf16.msra.mxu0 %v8860_v55 }
 0x619   :  { %8404 = vmatprep.subr.bf16.mxu1 %v11795_v47  ;;  %8544 = vmatprep.subr.bf16.mxu0 %v11795_v47 }
 0x61c   :  { %8405 = vmatpush3.bf16.msra.mxu1 %v8861_v2  ;;  %8545 = vmatpush3.bf16.msra.mxu0 %v8862_v45 }
 0x61d   :  { %8406 = vmatprep.subr.bf16.mxu1 %v11795_v47  ;;  %8546 = vmatprep.subr.bf16.mxu0 %v11795_v47 }
 0x620   :  { %8407 = vmatpush3.bf16.msra.mxu1 %v8863_v54  ;;  %8547 = vmatpush3.bf16.msra.mxu0 %v8864_v44 }
 0x621   :  { %8408 = vmatprep.subr.bf16.mxu1 %v11795_v47  ;;  %8548 = vmatprep.subr.bf16.mxu0 %v11795_v47 }
 0x624   :  { %8409 = vmatpush3.bf16.msra.mxu1 %v8865_v21  ;;  %8549 = vmatpush3.bf16.msra.mxu0 %v8866_v24  ;;  %v8899_v21 = vld [vmem:[#allocation8 + $0x330] sm:$0xff]  }
 0x625   :  { %8410 = vmatprep.subr.bf16.mxu1 %v11795_v47  ;;  %8550 = vmatprep.subr.bf16.mxu0 %v11795_v47  ;;  %v8900_v24 = vld [vmem:[#allocation8 + $0x4f0] sm:$0xff]  }
 0x628   :  { %8411 = vmatpush3.bf16.msra.mxu1 %v8867_v63  ;;  %8551 = vmatpush3.bf16.msra.mxu0 %v8868_v50 }
 0x629   :  { %8412 = vmatprep.subr.bf16.mxu1 %v11795_v47  ;;  %8552 = vmatprep.subr.bf16.mxu0 %v11795_v47 }
 0x62c   :  { %8413 = vmatpush3.bf16.msra.mxu1 %v8869_v36  ;;  %8553 = vmatpush3.bf16.msra.mxu0 %v8870_v33  ;;  %v8901_v33 = vld [vmem:[#allocation8 + $0x338] sm:$0xff]  }
 0x62d   :  { %8438 = vmatprep.subr.bf16.mxu1 %v11795_v47  ;;  %8578 = vmatprep.subr.bf16.mxu0 %v11795_v47 }
 0x62f   :  { %8415 = vmatmul.mubr.bf16.vlgmr.msra.gmra.mrb[188].mxu1 %v3989_v60  ;;  %8555 = vmatmul.mubr.bf16.vlgmr.msra.gmra.mrb[12].mxu0 %v3996_v31  ;;  %v8877_v60 = vld [vmem:[#allocation8 + $0x298] sm:$0xff]   ;;  %v8880_v31 = vld [vmem:[#allocation8 + $0x460] sm:$0xff]  }
 0x630   :  { %8439 = vmatpush3.bf16.msra.mxu1 %v8871_v26  ;;  %8579 = vmatpush3.bf16.msra.mxu0 %v8872_v52  ;;  %v8902_v26 = vld [vmem:[#allocation8 + $0x4f8] sm:$0xff]   ;;  %v8903_v52 = vld [vmem:[#allocation8 + $0x380] sm:$0xff]  }
 0x631   :  { %8440 = vmatprep.subr.bf16.mxu1 %v11795_v47  ;;  %8580 = vmatprep.subr.bf16.mxu0 %v11795_v47 }
 0x632   :  { %8454 = vmatprep.mubr.msk.bf16.mxu1 %vm9021_vm0, %v11795_v47  ;;  %8594 = vmatprep.mubr.msk.bf16.mxu0 %vm9021_vm0, %v11795_v47 }
 0x634   :  { %8441 = vmatpush3.bf16.msra.mxu1 %v8873_v23  ;;  %8581 = vmatpush3.bf16.msra.mxu0 %v8874_v61  ;;  %v8904_v23 = vld [vmem:[#allocation8 + $0x388] sm:$0xff]   ;;  %v8905_v61 = vld [vmem:[#allocation8 + $0x390] sm:$0xff]  }
 0x635   :  { %8442 = vmatprep.subr.bf16.mxu1 %v11795_v47  ;;  %8582 = vmatprep.subr.bf16.mxu0 %v11795_v47 }
 0x638   :  { %8443 = vmatpush3.bf16.msra.mxu1 %v8875_v39  ;;  %8583 = vmatpush3.bf16.msra.mxu0 %v8876_v38  ;;  %v8906_v39 = vld [vmem:[#allocation8 + $0x398] sm:$0xff]  }
 0x639   :  { %8444 = vmatprep.subr.bf16.mxu1 %v11795_v47  ;;  %8584 = vmatprep.subr.bf16.mxu0 %v11795_v47 }
 0x63c   :  { %8445 = vmatpush3.bf16.msra.mxu1 %v8877_v60  ;;  %8585 = vmatpush3.bf16.msra.mxu0 %v8878_v27 }
 0x63d   :  { %8446 = vmatprep.subr.bf16.mxu1 %v11795_v47  ;;  %8586 = vmatprep.subr.bf16.mxu0 %v11795_v47 }
 0x640   :  { %8447 = vmatpush3.bf16.msra.mxu1 %v8879_v17  ;;  %8587 = vmatpush3.bf16.msra.mxu0 %v8880_v31  ;;  %v8909_v17 = vld [vmem:[#allocation8 + $0x3b0] sm:$0xff]  }
 0x641   :  { %8448 = vmatprep.subr.bf16.mxu1 %v11795_v47  ;;  %8588 = vmatprep.subr.bf16.mxu0 %v11795_v47 }
 0x642   :  { %v4140_v20 = vpop.f32.mrb[164].mxu1 }
 0x643   :  { %v8256_v25 = vpop.f32.mrb[165].mxu1 }
 0x644   :  { %8449 = vmatpush3.bf16.msra.mxu1 %v8881_v40  ;;  %8589 = vmatpush3.bf16.msra.mxu0 %v8882_v12  ;;  %v11482_v4 = vpop.f32.mrb[166].mxu1  ;;  %v8911_v25 = vld [vmem:[#allocation8 + $0x400] sm:$0xff]  }
 0x645   :  { %v8257_v7 = vpop.f32.mrb[167].mxu1  ;;  %8450 = vmatprep.subr.bf16.mxu1 %v11795_v47  ;;  %8590 = vmatprep.subr.bf16.mxu0 %v11795_v47 }
 0x646   :  { %v8915_v7 = vld [vmem:[#allocation8 + $0x420] sm:$0xff]  }
 0x648   :  { %8451 = vmatpush3.bf16.msra.mxu1 %v8883_v1  ;;  %8591 = vmatpush3.bf16.msra.mxu0 %v8884_v56  ;;  %v8913_v1 = vld [vmem:[#allocation8 + $0x410] sm:$0xff]   ;;  %v8914_v56 = vld [vmem:[#allocation8 + $0x418] sm:$0xff]  }
 0x649   :  { %8452 = vmatprep.subr.bf16.mxu1 %v11795_v47  ;;  %8592 = vmatprep.subr.bf16.mxu0 %v11795_v47 }
 0x64c   :  { %8453 = vmatpush3.bf16.msra.mxu1 %v8885_v37  ;;  %8593 = vmatpush3.bf16.msra.mxu0 %v8886_v32 }
 0x64d   :  { %8478 = vmatprep.subr.bf16.mxu1 %v11795_v47  ;;  %8618 = vmatprep.subr.bf16.mxu0 %v11795_v47 }
 0x64f   :  { %8455 = vmatmul.mubr.bf16.vlgmr.msra.gmra.mrb[192].mxu1 %v3991_v58  ;;  %8595 = vmatmul.mubr.bf16.vlgmr.msra.gmra.mrb[16].mxu0 %v3998_v46  ;;  %v8893_v58 = vld [vmem:[#allocation8 + $0x318] sm:$0xff]   ;;  %v8896_v46 = vld [vmem:[#allocation8 + $0x4e0] sm:$0xff]  }
 0x650   :  { %8479 = vmatpush3.bf16.msra.mxu1 %v8887_v53  ;;  %8619 = vmatpush3.bf16.msra.mxu0 %v8888_v13 }
 0x651   :  { %8480 = vmatprep.subr.bf16.mxu1 %v11795_v47  ;;  %8620 = vmatprep.subr.bf16.mxu0 %v11795_v47 }
 0x652   :  { %8494 = vmatprep.mubr.msk.bf16.mxu1 %vm9021_vm0, %v11795_v47  ;;  %8634 = vmatprep.mubr.msk.bf16.mxu0 %vm9021_vm0, %v11795_v47 }
 0x654   :  { %8481 = vmatpush3.bf16.msra.mxu1 %v8889_v14  ;;  %8621 = vmatpush3.bf16.msra.mxu0 %v8890_v35  ;;  %v8917_v35 = vld [vmem:[#allocation8 + $0x430] sm:$0xff]  }
 0x655   :  { %8482 = vmatprep.subr.bf16.mxu1 %v11795_v47  ;;  %8622 = vmatprep.subr.bf16.mxu0 %v11795_v47 }
 0x658   :  { %8483 = vmatpush3.bf16.msra.mxu1 %v8891_v5  ;;  %8623 = vmatpush3.bf16.msra.mxu0 %v8892_v11 }
 0x659   :  { %8484 = vmatprep.subr.bf16.mxu1 %v11795_v47  ;;  %8624 = vmatprep.subr.bf16.mxu0 %v11795_v47 }
 0x65c   :  { %8485 = vmatpush3.bf16.msra.mxu1 %v8893_v58  ;;  %8625 = vmatpush3.bf16.msra.mxu0 %v8894_v59  ;;  %v8918_v59 = vld [vmem:[#allocation8 + $0x438] sm:$0xff]  }
 0x65d   :  { %8486 = vmatprep.subr.bf16.mxu1 %v11795_v47  ;;  %8626 = vmatprep.subr.bf16.mxu0 %v11795_v47 }
 0x660   :  { %8487 = vmatpush3.bf16.msra.mxu1 %v8895_v6  ;;  %8627 = vmatpush3.bf16.msra.mxu0 %v8896_v46  ;;  %v8919_v6 = vld [vmem:[#allocation8 + $0x480] sm:$0xff]   ;;  %v8920_v46 = vld [vmem:[#allocation8 + $0x488] sm:$0xff]  }
 0x661   :  { %8488 = vmatprep.subr.bf16.mxu1 %v11795_v47  ;;  %8628 = vmatprep.subr.bf16.mxu0 %v11795_v47 }
 0x662   :  { %v4229_v34 = vpop.f32.mrb[168].mxu1  ;;  %v11510_v10 = vpop.f32.mrb[248].mxu0 }
 0x663   :  { %v4230_v55 = vadd.f32 %v4229_v34, %v4140_v20  ;;  %v8276_v2 = vpop.f32.mrb[169].mxu1  ;;  %v8356_v45 = vpop.f32.mrb[249].mxu0  ;;  %v8910_v20 = vld [vmem:[#allocation8 + $0x3b8] sm:$0xff]   ;;  %v8923_v34 = vld [vmem:[#allocation8 + $0x4a0] sm:$0xff]  }
 0x664   :  { %v4232_v54 = vpop.f32.mrb[170].mxu1  ;;  %8489 = vmatpush3.bf16.msra.mxu1 %v8897_v41  ;;  %8629 = vmatpush3.bf16.msra.mxu0 %v8898_v43  ;;  %v11512_v44 = vpop.f32.mrb[250].mxu0  ;;  %v8921_v41 = vld [vmem:[#allocation8 + $0x490] sm:$0xff]   ;;  %v8922_v43 = vld [vmem:[#allocation8 + $0x498] sm:$0xff]  }
 0x665   :  { %v4233_v63 = vadd.f32 %v4232_v54, %v11482_v4  ;;  %v8277_v50 = vpop.f32.mrb[171].mxu1  ;;  %v8357_v36 = vpop.f32.mrb[251].mxu0  ;;  %8490 = vmatprep.subr.bf16.mxu1 %v11795_v47  ;;  %8630 = vmatprep.subr.bf16.mxu0 %v11795_v47  ;;  %v8912_v4 = vld [vmem:[#allocation8 + $0x408] sm:$0xff]  }
 0x668   :  { %8491 = vmatpush3.bf16.msra.mxu1 %v8899_v21  ;;  %8631 = vmatpush3.bf16.msra.mxu0 %v8900_v24  ;;  %v8925_v24 = vld [vmem:[#allocation8 + $0x4b0] sm:$0xff]  }
 0x669   :  { %8492 = vmatprep.subr.bf16.mxu1 %v11795_v47  ;;  %8632 = vmatprep.subr.bf16.mxu0 %v11795_v47 }
 0x66c   :  { %8493 = vmatpush3.bf16.msra.mxu1 %v8901_v33  ;;  %8633 = vmatpush3.bf16.msra.mxu0 %v8902_v26 }
 0x66d   :  { %8518 = vmatprep.subr.bf16.mxu1 %v11795_v47 }
 0x66f   :  { %8495 = vmatmul.mubr.bf16.vlgmr.msra.gmra.mrb[196].mxu1 %v3993_v0  ;;  %8635 = vmatmul.mubr.bf16.vlgmr.msra.gmra.mrb[20].mxu0 %v4000_v8 }
 0x670   :  { %8519 = vmatpush3.bf16.msra.mxu1 %v8903_v52  ;;  %8534 = vmatprep.mubr.msk.bf16.mxu1 %vm9021_vm0, %v11795_v47  ;;  %v8926_v52 = vld [vmem:[#allocation8 + $0x4b8] sm:$0xff]  }
 0x671   :  { %8520 = vmatprep.subr.bf16.mxu1 %v11795_v47 }
 0x674   :  { %8521 = vmatpush3.bf16.msra.mxu1 %v8904_v23  ;;  %v8927_v23 = vld [vmem:[#allocation8 + $0x500] sm:$0xff]  }
 0x675   :  { %8522 = vmatprep.subr.bf16.mxu1 %v11795_v47 }
 0x678   :  { %8523 = vmatpush3.bf16.msra.mxu1 %v8905_v61  ;;  %v8928_v61 = vld [vmem:[#allocation8 + $0x508] sm:$0xff]  }
 0x679   :  { %8524 = vmatprep.subr.bf16.mxu1 %v11795_v47 }
 0x67c   :  { %8525 = vmatpush3.bf16.msra.mxu1 %v8906_v39  ;;  %v8931_v39 = vld [vmem:[#allocation8 + $0x520] sm:$0xff]  }
 0x67d   :  { %8526 = vmatprep.subr.bf16.mxu1 %v11795_v47 }
 0x680   :  { %8527 = vmatpush3.bf16.msra.mxu1 %v8907_v3 }
 0x681   :  { %8528 = vmatprep.subr.bf16.mxu1 %v11795_v47 }
 0x682   :  { %v4336_v0 = vpop.f32.mrb[172].mxu1  ;;  %v11533_v16 = vpop.f32.mrb[252].mxu0 }
 0x683   :  { %v4343_v51 = vadd.f32 %v4336_v0, %v4230_v55  ;;  %v8296_v8 = vpop.f32.mrb[173].mxu1  ;;  %v8396_v38 = vpop.f32.mrb[253].mxu0 }
 0x684   :  { %v4339_v60 = vpop.f32.mrb[174].mxu1  ;;  %v11535_v27 = vpop.f32.mrb[254].mxu0  ;;  %8529 = vmatpush3.bf16.msra.mxu1 %v8908_v42  ;;  %v8933_v38 = vld [vmem:[#allocation8 + $0x530] sm:$0xff]  }
 0x685   :  { %v4344_v31 = vadd.f32 %v4339_v60, %v4233_v63  ;;  %v8297_v40 = vpop.f32.mrb[175].mxu1  ;;  %v8397_v12 = vpop.f32.mrb[255].mxu0  ;;  %8530 = vmatprep.subr.bf16.mxu1 %v11795_v47 }
 0x688   :  { %8531 = vmatpush3.bf16.msra.mxu1 %v8909_v17 }
 0x689   :  { %8532 = vmatprep.subr.bf16.mxu1 %v11795_v47 }
 0x68c   :  { %8533 = vmatpush3.bf16.msra.mxu1 %v8910_v20  ;;  %v8934_v20 = vld [vmem:[#allocation8 + $0x538] sm:$0xff]  }
 0x68d   :  { %8558 = vmatprep.subr.bf16.mxu1 %v11795_v47 }
 0x68f   :  { %8535 = vmatmul.mubr.bf16.vlgmr.msra.gmra.mrb[200].mxu1 %v3995_v28 }
 0x690   :  { %8559 = vmatpush3.bf16.msra.mxu1 %v8911_v25  ;;  %8574 = vmatprep.mubr.msk.bf16.mxu1 %vm9021_vm0, %v11795_v47 }
 0x691   :  { %8560 = vmatprep.subr.bf16.mxu1 %v11795_v47 }
 0x694   :  { %8561 = vmatpush3.bf16.msra.mxu1 %v8912_v4 }
 0x695   :  { %8562 = vmatprep.subr.bf16.mxu1 %v11795_v47 }
 0x698   :  { %8563 = vmatpush3.bf16.msra.mxu1 %v8913_v1 }
 0x699   :  { %8564 = vmatprep.subr.bf16.mxu1 %v11795_v47 }
 0x69c   :  { %8565 = vmatpush3.bf16.msra.mxu1 %v8914_v56 }
 0x69d   :  { %8566 = vmatprep.subr.bf16.mxu1 %v11795_v47 }
 0x6a0   :  { %8567 = vmatpush3.bf16.msra.mxu1 %v8915_v7 }
 0x6a1   :  { %8568 = vmatprep.subr.bf16.mxu1 %v11795_v47 }
 0x6a2   :  { %v4445_v29 = vpop.f32.mrb[176].mxu1  ;;  %v11550_v28 = vpop.f32.mrb[0].mxu0 }
 0x6a3   :  { %v4452_v37 = vadd.f32 %v4445_v29, %v4343_v51  ;;  %v8316_v32 = vpop.f32.mrb[177].mxu1  ;;  %v8436_v53 = vpop.f32.mrb[1].mxu0 }
 0x6a4   :  { %v4448_v13 = vpop.f32.mrb[178].mxu1  ;;  %v11552_v14 = vpop.f32.mrb[2].mxu0  ;;  %8569 = vmatpush3.bf16.msra.mxu1 %v8916_v22 }
 0x6a5   :  { %v4453_v5 = vadd.f32 %v4448_v13, %v4344_v31  ;;  %v8317_v11 = vpop.f32.mrb[179].mxu1  ;;  %v8437_v58 = vpop.f32.mrb[3].mxu0  ;;  %8570 = vmatprep.subr.bf16.mxu1 %v11795_v47 }
 0x6a8   :  { %8571 = vmatpush3.bf16.msra.mxu1 %v8917_v35 }
 0x6a9   :  { %8572 = vmatprep.subr.bf16.mxu1 %v11795_v47 }
 0x6ac   :  { %8573 = vmatpush3.bf16.msra.mxu1 %v8918_v59 }
 0x6ad   :  { %8598 = vmatprep.subr.bf16.mxu1 %v11795_v47 }
 0x6af   :  { %8575 = vmatmul.mubr.bf16.vlgmr.msra.gmra.mrb[204].mxu1 %v3997_v15 }
 0x6b0   :  { %8599 = vmatpush3.bf16.msra.mxu1 %v8919_v6  ;;  %8614 = vmatprep.mubr.msk.bf16.mxu1 %vm9021_vm0, %v11795_v47 }
 0x6b1   :  { %8600 = vmatprep.subr.bf16.mxu1 %v11795_v47 }
 0x6b4   :  { %8601 = vmatpush3.bf16.msra.mxu1 %v8920_v46 }
 0x6b5   :  { %8602 = vmatprep.subr.bf16.mxu1 %v11795_v47 }
 0x6b8   :  { %8603 = vmatpush3.bf16.msra.mxu1 %v8921_v41 }
 0x6b9   :  { %8604 = vmatprep.subr.bf16.mxu1 %v11795_v47 }
 0x6bc   :  { %8605 = vmatpush3.bf16.msra.mxu1 %v8922_v43 }
 0x6bd   :  { %8606 = vmatprep.subr.bf16.mxu1 %v11795_v47 }
 0x6c0   :  { %8607 = vmatpush3.bf16.msra.mxu1 %v8923_v34 }
 0x6c1   :  { %8608 = vmatprep.subr.bf16.mxu1 %v11795_v47 }
 0x6c2   :  { %v4554_v18 = vpop.f32.mrb[180].mxu1  ;;  %v11567_v15 = vpop.f32.mrb[4].mxu0 }
 0x6c3   :  { %v4561_v55 = vadd.f32 %v4554_v18, %v4452_v37  ;;  %v8336_v2 = vpop.f32.mrb[181].mxu1  ;;  %v8476_v45 = vpop.f32.mrb[5].mxu0 }
 0x6c4   :  { %v4557_v54 = vpop.f32.mrb[182].mxu1  ;;  %v11569_v21 = vpop.f32.mrb[6].mxu0  ;;  %8609 = vmatpush3.bf16.msra.mxu1 %v8924_v30 }
 0x6c5   :  { %v4562_v63 = vadd.f32 %v4557_v54, %v4453_v5  ;;  %v8337_v50 = vpop.f32.mrb[183].mxu1  ;;  %v8477_v36 = vpop.f32.mrb[7].mxu0  ;;  %8610 = vmatprep.subr.bf16.mxu1 %v11795_v47  ;;  %v4670_v33 = vadd.f32 %v11510_v10, %v4561_v55  ;;  %v8929_v10 = vld [vmem:[#allocation8 + $0x510] sm:$0xff]  }
 0x6c7   :  { %v4671_v26 = vadd.f32 %v11512_v44, %v4562_v63  ;;  %v8930_v44 = vld [vmem:[#allocation8 + $0x518] sm:$0xff]  }
 0x6c8   :  { %8611 = vmatpush3.bf16.msra.mxu1 %v8925_v24 }
 0x6c9   :  { %8612 = vmatprep.subr.bf16.mxu1 %v11795_v47 }
 0x6cc   :  { %8613 = vmatpush3.bf16.msra.mxu1 %v8926_v52 }
 0x6cd   :  { %8638 = vmatprep.subr.bf16.mxu1 %v11795_v47 }
 0x6cf   :  { %8615 = vmatmul.mubr.bf16.vlgmr.msra.gmra.mrb[208].mxu1 %v3999_v19 }
 0x6d0   :  { %8639 = vmatpush3.bf16.msra.mxu1 %v8927_v23  ;;  %8654 = vmatprep.mubr.msk.bf16.mxu1 %vm9021_vm0, %v11795_v47 }
 0x6d1   :  { %8640 = vmatprep.subr.bf16.mxu1 %v11795_v47 }
 0x6d4   :  { %8641 = vmatpush3.bf16.msra.mxu1 %v8928_v61 }
 0x6d5   :  { %8642 = vmatprep.subr.bf16.mxu1 %v11795_v47 }
 0x6d8   :  { %8643 = vmatpush3.bf16.msra.mxu1 %v8929_v10 }
 0x6d9   :  { %8644 = vmatprep.subr.bf16.mxu1 %v11795_v47 }
 0x6dc   :  { %8645 = vmatpush3.bf16.msra.mxu1 %v8930_v44 }
 0x6dd   :  { %8646 = vmatprep.subr.bf16.mxu1 %v11795_v47 }
 0x6e0   :  { %8647 = vmatpush3.bf16.msra.mxu1 %v8931_v39 }
 0x6e1   :  { %8648 = vmatprep.subr.bf16.mxu1 %v11795_v47 }
 0x6e2   :  { %v4772_v62 = vpop.f32.mrb[184].mxu1  ;;  %v5535_v19 = vpop.f32.mrb[8].mxu0 }
 0x6e3   :  { %v4779_v3 = vadd.f32 %v4772_v62, %v4670_v33  ;;  %v8376_v42 = vpop.f32.mrb[185].mxu1  ;;  %v8516_v0 = vpop.f32.mrb[9].mxu0 }
 0x6e4   :  { %v4775_v51 = vpop.f32.mrb[186].mxu1  ;;  %v5538_v8 = vpop.f32.mrb[10].mxu0  ;;  %8649 = vmatpush3.bf16.msra.mxu1 %v8932_v49 }
 0x6e5   :  { %v4780_v60 = vadd.f32 %v4775_v51, %v4671_v26  ;;  %v8377_v17 = vpop.f32.mrb[187].mxu1  ;;  %v8517_v31 = vpop.f32.mrb[11].mxu0  ;;  %8650 = vmatprep.subr.bf16.mxu1 %v11795_v47  ;;  %v4888_v40 = vadd.f32 %v11533_v16, %v4779_v3 }
 0x6e7   :  { %v4889_v12 = vadd.f32 %v11535_v27, %v4780_v60 }
 0x6e8   :  { %8651 = vmatpush3.bf16.msra.mxu1 %v8933_v38 }
 0x6e9   :  { %8652 = vmatprep.subr.bf16.mxu1 %v11795_v47 }
 0x6ec   :  { %8653 = vmatpush3.bf16.msra.mxu1 %v8934_v20 }
 0x6ef   :  { %8655 = vmatmul.mubr.bf16.vlgmr.msra.gmra.mrb[212].mxu1 %v4001_v9 }
 0x702   :  { %v4990_v25 = vpop.f32.mrb[188].mxu1  ;;  %v5753_v4 = vpop.f32.mrb[12].mxu0 }
 0x703   :  { %v4997_v1 = vadd.f32 %v4990_v25, %v4888_v40  ;;  %v8416_v56 = vpop.f32.mrb[189].mxu1  ;;  %v8556_v7 = vpop.f32.mrb[13].mxu0  ;;  %v6649_v40 = vld [vmem:[%s11620_s8] ss:$0 sm:$0xff] }
 0x704   :  { %v4993_v22 = vpop.f32.mrb[190].mxu1  ;;  %v5756_v29 = vpop.f32.mrb[14].mxu0  ;;  %v6650_v7 = vld [vmem:[%s11621_s9] ss:$0 sm:$0xff] }
 0x705   :  { %v4998_v37 = vadd.f32 %v4993_v22, %v4889_v12  ;;  %v8417_v16 = vpop.f32.mrb[191].mxu1  ;;  %v8557_v32 = vpop.f32.mrb[15].mxu0  ;;  %v5106_v27 = vadd.f32 %v11550_v28, %v4997_v1 }
 0x707   :  { %v5107_v53 = vadd.f32 %v11552_v14, %v4998_v37 }
 0x722   :  { %v5208_v47 = vpop.f32.mrb[192].mxu1  ;;  %v5971_v13 = vpop.f32.mrb[16].mxu0 }
 0x723   :  { %v5215_v35 = vadd.f32 %v5208_v47, %v5106_v27  ;;  %v8456_v5 = vpop.f32.mrb[193].mxu1  ;;  %v8596_v57 = vpop.f32.mrb[17].mxu0  ;;  %v6332_v27 = vstv %s11622_s10 }
 0x724   :  { %v5211_v48 = vpop.f32.mrb[194].mxu1  ;;  %v5974_v9 = vpop.f32.mrb[18].mxu0 }
 0x725   :  { %v5216_v11 = vadd.f32 %v5211_v48, %v5107_v53  ;;  %v8457_v58 = vpop.f32.mrb[195].mxu1  ;;  %v8597_v59 = vpop.f32.mrb[19].mxu0  ;;  %v5324_v6 = vadd.f32 %v11567_v15, %v5215_v35 }
 0x727   :  { %v5325_v46 = vadd.f32 %v11569_v21, %v5216_v11 }
 0x742   :  { %v5426_v41 = vpop.f32.mrb[196].mxu1  ;;  %v6189_v43 = vpop.f32.mrb[20].mxu0 }
 0x743   :  { %v5433_v34 = vadd.f32 %v5426_v41, %v5324_v6  ;;  %v8496_v28 = vpop.f32.mrb[197].mxu1  ;;  %v8636_v30 = vpop.f32.mrb[21].mxu0 }
 0x744   :  { %v5429_v14 = vpop.f32.mrb[198].mxu1  ;;  %v6192_v18 = vpop.f32.mrb[22].mxu0 }
 0x745   :  { %v5434_v55 = vadd.f32 %v5429_v14, %v5325_v46  ;;  %v8497_v2 = vpop.f32.mrb[199].mxu1  ;;  %v8637_v45 = vpop.f32.mrb[23].mxu0  ;;  %v5542_v54 = vadd.f32 %v5535_v19, %v5433_v34 }
 0x747   :  { %v5543_v24 = vadd.f32 %v5538_v8, %v5434_v55 }
 0x762   :  { %v5644_v63 = vpop.f32.mrb[200].mxu1 }
 0x763   :  { %v5651_v50 = vadd.f32 %v5644_v63, %v5542_v54  ;;  %v8536_v36 = vpop.f32.mrb[201].mxu1 }
 0x764   :  { %v5647_v33 = vpop.f32.mrb[202].mxu1 }
 0x765   :  { %v5652_v26 = vadd.f32 %v5647_v33, %v5543_v24  ;;  %v8537_v15 = vpop.f32.mrb[203].mxu1  ;;  %v5760_v52 = vadd.f32 %v5753_v4, %v5651_v50 }
 0x767   :  { %v5761_v21 = vadd.f32 %v5756_v29, %v5652_v26 }
 0x782   :  { %v5862_v23 = vpop.f32.mrb[204].mxu1 }
 0x783   :  { %v5869_v61 = vadd.f32 %v5862_v23, %v5760_v52  ;;  %v8576_v10 = vpop.f32.mrb[205].mxu1 }
 0x784   :  { %v5865_v44 = vpop.f32.mrb[206].mxu1 }
 0x785   :  { %v5870_v39 = vadd.f32 %v5865_v44, %v5761_v21  ;;  %v8577_v49 = vpop.f32.mrb[207].mxu1  ;;  %v5978_v62 = vadd.f32 %v5971_v13, %v5869_v61 }
 0x787   :  { %v5979_v3 = vadd.f32 %v5974_v9, %v5870_v39 }
 0x7a2   :  { %v6080_v42 = vpop.f32.mrb[208].mxu1 }
 0x7a3   :  { %v6087_v0 = vadd.f32 %v6080_v42, %v5978_v62  ;;  %v8616_v19 = vpop.f32.mrb[209].mxu1 }
 0x7a4   :  { %v6083_v51 = vpop.f32.mrb[210].mxu1 }
 0x7a5   :  { %v6088_v8 = vadd.f32 %v6083_v51, %v5979_v3  ;;  %v8617_v38 = vpop.f32.mrb[211].mxu1  ;;  %v6196_v60 = vadd.f32 %v6189_v43, %v6087_v0 }
 0x7a7   :  { %v6197_v17 = vadd.f32 %v6192_v18, %v6088_v8 }
 0x7c2   :  { %v6298_v31 = vpop.f32.mrb[212].mxu1 }
 0x7c3   :  { %v6305_v12 = vadd.f32 %v6298_v31, %v6196_v60  ;;  %v8656_v20 = vpop.f32.mrb[213].mxu1 }
 0x7c4   :  { %v6301_v25 = vpop.f32.mrb[214].mxu1 }
 0x7c5   :  { %v6306_v4 = vadd.f32 %v6301_v25, %v6197_v17  ;;  %v8657_v1 = vpop.f32.mrb[215].mxu1  ;;  %v6314_v56 = vadd.f32 %v6649_v40, %v6305_v12 }
 0x7c7   :  { %v6315_v22 = vadd.f32 %v6649_v40, %v6306_v4  ;;  %v6316_v29 = vmax.f32 %v6314_v56, 0.0 }
 0x7c9   :  { %v6317_v37 = vmax.f32 %v6315_v22, 0.0  ;;  %v6325_v16 = vmul.f32 %v6650_v7, %v6316_v29 }
 0x7cb   :  { %6327 = vadd.xlane.f32.xlu0 %v6325_v16  ;;  %v6326_v32 = vmul.f32 %v6650_v7, %v6317_v37 }
 0x7cf   :  { %6329 = vadd.xlane.f32.xlu0 %v6326_v32 }
 0x858   :  { %v6328_v53 = vpop.xlane.xlu0 %6327 }
 0x859   :  { %v6333_v47 = vadd.f32 %v6332_v27, %v6328_v53 }
 0x85b   :  { %v6335_v13 = vsub.f32 0.0, %v6333_v47 }
 0x85c   :  { %v6330_v35 = vpop.xlane.xlu0 %6329 }
 0x85d   :  { %v6337_v5 = vmul.f32 1.442695, %v6335_v13  ;;  %v6334_v57 = vadd.f32 %v6332_v27, %v6330_v35 }
 0x85f   :  { %8935 = vpow2.f32 %v6337_v5  ;;  %v6336_v48 = vsub.f32 0.0, %v6334_v57 }
 0x861   :  { %v6339_v9 = vmul.f32 1.442695, %v6336_v48 }
 0x863   :  { %8937 = vpow2.f32 %v6339_v9 }
 0x869   :  { %v8936_v11 = vpop.eup %8935 }
 0x86a   :  { %v6341_v58 = vadd.f32 1.0, %v8936_v11 }
 0x86c   :  { %8939 = vrcp.f32 %v6341_v58 }
 0x86d   :  { %v8938_v59 = vpop.eup %8937 }
 0x86e   :  { %v6342_v6 = vadd.f32 1.0, %v8938_v59 }
 0x870   :  { %8941 = vrcp.f32 %v6342_v6 }
 0x876   :  { %v8940_v46 = vpop.eup %8939 }
 0x877   :  { %6348 = vst.msk [vmem:[%s11623_s11] sm:$0xff] %vm6347_vm3, %v8940_v46 }
 0x87a   :  { %v8942_v41 = vpop.eup %8941 }
 0x87b   :  { %6349 = vst.msk [vmem:[%s11623_s11 + $0x8] sm:$0xff] %vm6347_vm3, %v8942_v41 }
 0x87c   :  { %6354 = vsyncpa [#allocation5], 1 }
 0x87d   :  { %6355 = vsyncpa [#allocation7], 1 }

</bundles_post_ra>
